<compile_context>
chip_gen: v7x
topology: tpu7x:2x2x1
jax: 0.10.0
libtpu: 0.0.40
codegen_flags: <defaults>
</compile_context>

<pallas_src>
import functools

import jax
import jax.numpy as jnp
from jax.experimental import pallas as pl
from jax.experimental.pallas import tpu as pltpu


def encoder_gru_kernel(gi_ref,        # VMEM (S, 3H) f32 : precomputed x @ W_ih^T + b_ih
                       h0_ref,        # VMEM (1, H)  f32
                       w_hh_ref,      # VMEM (H, 3H) bf16
                       bias_ref,      # VMEM (2, 3H) f32 : row 0 = b_hh, row 1 = b_ih
                       *rest,         # [w_ih_ref (H,3H) bf16 if n_layers>1], out_ref (S,H) f32
                       hidden_size, seq_len, n_layers):
    H = hidden_size
    if n_layers > 1:
        w_ih_ref, out_ref = rest
    else:
        (out_ref,) = rest

    # Tiny loop-invariant biases (a few vregs) are fine to hoist; the big (H, 3H)
    # weights stay as refs and are streamed by the MXU from VMEM each step.
    b_hh = bias_ref[pl.ds(0, 1), :]                         # (1, 3H)
    b_hh_rz = b_hh[:, :2 * H]
    b_hn = b_hh[:, 2 * H:]
    if n_layers > 1:
        b_ih_full = bias_ref[pl.ds(1, 1), :]                # (1, 3H)

    def gru_cell(gi, h):
        # gi already contains x @ W_ih^T + b_ih for all three gates.
        gh = jnp.dot(h.astype(jnp.bfloat16), w_hh_ref[...],
                     preferred_element_type=jnp.float32)    # (1, 3H) f32 acc
        rz = jax.nn.sigmoid(gi[:, :2 * H] + gh[:, :2 * H] + b_hh_rz)
        r, z = rz[:, :H], rz[:, H:]
        n = jnp.tanh(gi[:, 2 * H:] + r * (gh[:, 2 * H:] + b_hn))
        return (1.0 - z) * n + z * h                        # (1, H) f32

    def step(t, h):
        gi0 = gi_ref[pl.ds(t, 1), :]                        # (1, 3H) precomputed row
        h = gru_cell(gi0, h)
        # seq2seq-tutorial quirk: the SAME GRU is re-applied n_layers times with x = h,
        # so inner applications must compute the input projection in-kernel.
        for _ in range(n_layers - 1):
            gi = jnp.dot(h.astype(jnp.bfloat16), w_ih_ref[...],
                         preferred_element_type=jnp.float32) + b_ih_full
            h = gru_cell(gi, h)
        out_ref[pl.ds(t, 1), :] = h                         # dense (S, H) store
        return h

    # seq_len is static -> full unroll gives the scheduler cross-step visibility.
    jax.lax.fori_loop(0, seq_len, step, h0_ref[...], unroll=True)


def prepare_encoder_params(emb, w_ih, w_hh, b_ih, b_hh):
    """Convert PyTorch-layout f32 params to the kernel layout (done once).

    emb: (V, H); w_ih / w_hh: (3H, H) (torch weight_ih_l0 / weight_hh_l0);
    b_ih / b_hh: (3H,).  Returns (gi_table (V,3H) f32, w_ih_t (H,3H) bf16,
    w_hh_t (H,3H) bf16, bias (2,3H) f32 = [b_hh; b_ih])."""
    V, H = emb.shape
    emb_b = emb.astype(jnp.bfloat16)
    w_ih_t = jnp.asarray(w_ih).T.astype(jnp.bfloat16)        # (H, 3H)
    w_hh_t = jnp.asarray(w_hh).T.astype(jnp.bfloat16)        # (H, 3H)
    b_ih_r = jnp.asarray(b_ih).reshape(1, 3 * H).astype(jnp.float32)
    b_hh_r = jnp.asarray(b_hh).reshape(1, 3 * H).astype(jnp.float32)
    # Input projection for every vocab row, with b_ih folded in (valid for the
    # first GRU application only; inner applications use W_ih in-kernel).
    gi_table = jnp.dot(emb_b, w_ih_t,
                       preferred_element_type=jnp.float32) + b_ih_r   # (V, 3H) f32
    bias = jnp.concatenate([b_hh_r, b_ih_r], axis=0)                  # (2, 3H) f32
    return gi_table, w_ih_t, w_hh_t, bias


def encoder_rnn_forward(tokens, hidden, params, *, n_layers=1):
    """tokens: int32 (S,); hidden: (1,1,H) f32; params from prepare_encoder_params.
    Returns (outputs (S,1,H) f32, final hidden (1,1,H) f32).
    For S == 1 this is exactly EncoderRNN.forward(input, hidden)."""
    gi_table, w_ih_t, w_hh_t, bias = params
    H = w_hh_t.shape[0]
    S = int(tokens.shape[0])
    h0 = hidden.reshape(1, H).astype(jnp.float32)

    # Embedding lookup + input projection resolved outside the recurrence
    # (plain-JAX gather of precomputed rows).
    gi_seq = jnp.take(gi_table, tokens.astype(jnp.int32), axis=0)     # (S, 3H) f32

    kernel = functools.partial(encoder_gru_kernel, hidden_size=H,
                               seq_len=S, n_layers=n_layers)

    in_specs = [
        pl.BlockSpec((S, 3 * H), lambda i: (0, 0)),      # gi_seq
        pl.BlockSpec((1, H), lambda i: (0, 0)),          # h0
        pl.BlockSpec((H, 3 * H), lambda i: (0, 0)),      # W_hh^T (bf16)
        pl.BlockSpec((2, 3 * H), lambda i: (0, 0)),      # [b_hh; b_ih]
    ]
    args = [gi_seq, h0, w_hh_t, bias]
    if n_layers > 1:
        in_specs.append(pl.BlockSpec((H, 3 * H), lambda i: (0, 0)))   # W_ih^T (bf16)
        args.append(w_ih_t)

    out = pl.pallas_call(
        kernel,
        out_shape=jax.ShapeDtypeStruct((S, H), jnp.float32),
        grid=(1,),                                        # whole sequence in one shot
        in_specs=in_specs,
        out_specs=pl.BlockSpec((S, H), lambda i: (0, 0)),
        compiler_params=pltpu.CompilerParams(
            dimension_semantics=("arbitrary",),
            vmem_limit_bytes=32 * 1024 * 1024),
    )(*args)

    # output == hidden at every step for this module; last row is the final hidden.
    return out.reshape(S, 1, H), out[S - 1].reshape(1, 1, H)


def _reference_forward(tokens, hidden, emb, w_ih, w_hh, b_ih, b_hh, n_layers=1):
    """Pure-JAX reference applying the same bf16 rounding to weights and to the
    MXU operands (x, h) that the kernel uses, so parity holds for any S."""
    H = emb.shape[1]
    f32 = jnp.float32
    emb_b = emb.astype(jnp.bfloat16).astype(f32)
    w_ih_t = jnp.asarray(w_ih).T.astype(jnp.bfloat16).astype(f32)
    w_hh_t = jnp.asarray(w_hh).T.astype(jnp.bfloat16).astype(f32)
    b_ih = jnp.asarray(b_ih).reshape(1, 3 * H).astype(f32)
    b_hh = jnp.asarray(b_hh).reshape(1, 3 * H).astype(f32)
    h = hidden.reshape(1, H).astype(f32)
    outs = []
    for t in range(tokens.shape[0]):
        x = emb_b[int(tokens[t])][None, :]
        for _ in range(n_layers):
            xq = x.astype(jnp.bfloat16).astype(f32)
            hq = h.astype(jnp.bfloat16).astype(f32)
            gi = jnp.dot(xq, w_ih_t, preferred_element_type=f32) + b_ih
            gh = jnp.dot(hq, w_hh_t, preferred_element_type=f32)
            r = jax.nn.sigmoid(gi[:, :H] + gh[:, :H] + b_hh[:, :H])
            z = jax.nn.sigmoid(gi[:, H:2 * H] + gh[:, H:2 * H] + b_hh[:, H:2 * H])
            n = jnp.tanh(gi[:, 2 * H:] + r * (gh[:, 2 * H:] + b_hh[:, 2 * H:]))
            h = (1.0 - z) * n + z * h
            x = h
        outs.append(h)
    return jnp.stack(outs).reshape(-1, 1, H), h.reshape(1, 1, H)


if __name__ == "__main__":
    V = 64           # vocab (input_size)
    H = 256          # hidden_size (matches the module's constant)
    S = 8            # number of encoder steps (tokens)

    key = jax.random.PRNGKey(0)
    k_emb, k_wih, k_whh, k_bih, k_bhh, k_tok = jax.random.split(key, 6)

    bound = 1.0 / (H ** 0.5)
    emb = jax.random.normal(k_emb, (V, H), dtype=jnp.float32)
    # PyTorch GRU layout: weight_ih_l0 / weight_hh_l0 are (3H, H), biases (3H,).
    w_ih = jax.random.uniform(k_wih, (3 * H, H), jnp.float32, -bound, bound)
    w_hh = jax.random.uniform(k_whh, (3 * H, H), jnp.float32, -bound, bound)
    b_ih = jax.random.uniform(k_bih, (3 * H,), jnp.float32, -bound, bound)
    b_hh = jax.random.uniform(k_bhh, (3 * H,), jnp.float32, -bound, bound)

    tokens = jax.random.randint(k_tok, (S,), 0, V, dtype=jnp.int32)
    hidden0 = jnp.zeros((1, 1, H), dtype=jnp.float32)   # EncoderRNN.initHidden()

    params = prepare_encoder_params(emb, w_ih, w_hh, b_ih, b_hh)

    # --- n_layers = 1 (module default): uses the precomputed input projection ---
    outs, hid = encoder_rnn_forward(tokens, hidden0, params, n_layers=1)
    outs = jax.block_until_ready(outs)
    hid = jax.block_until_ready(hid)
    ref_outs, ref_hid = _reference_forward(tokens, hidden0, emb, w_ih, w_hh,
                                           b_ih, b_hh, n_layers=1)
    assert outs.shape == (S, 1, H) and hid.shape == (1, 1, H)
    assert jnp.allclose(outs, ref_outs, atol=1e-2, rtol=1e-2)
    assert jnp.allclose(hid, ref_hid, atol=1e-2, rtol=1e-2)

    # --- n_layers = 2: guarded path (precompute only for the first application) ---
    S2 = 4
    tokens2 = tokens[:S2]
    outs2, hid2 = encoder_rnn_forward(tokens2, hidden0, params, n_layers=2)
    outs2 = jax.block_until_ready(outs2)
    hid2 = jax.block_until_ready(hid2)
    ref_outs2, ref_hid2 = _reference_forward(tokens2, hidden0, emb, w_ih, w_hh,
                                             b_ih, b_hh, n_layers=2)
    assert jnp.allclose(outs2, ref_outs2, atol=1e-2, rtol=1e-2)
    assert jnp.allclose(hid2, ref_hid2, atol=1e-2, rtol=1e-2)

    print("KERNEL_OK")
</pallas_src>

<mosaic_0001>
module attributes {stable_mosaic.version = 11 : i64} {
  func.func @encoder_gru_kernel(%arg0: i32, %arg1: memref<8x768xf32, #tpu.memory_space<vmem>>, %arg2: memref<1x256xf32, #tpu.memory_space<vmem>>, %arg3: memref<256x768xbf16, #tpu.memory_space<vmem>>, %arg4: memref<2x768xf32, #tpu.memory_space<vmem>>, %arg5: memref<8x256xf32, #tpu.memory_space<vmem>>) attributes {dimension_semantics = [#tpu.dimension_semantics<arbitrary>], iteration_bounds = array<i64: 1>, scalar_prefetch = 0 : i64, scratch_operands = 0 : i64, tpu.core_type = #tpu.core_type<tc>, window_params = [{pipeline_mode = #tpu.pipeline_mode<synchronous>, transform_indices = @transform_0, window_bounds = array<i64: 8, 768>}, {pipeline_mode = #tpu.pipeline_mode<synchronous>, transform_indices = @transform_1, window_bounds = array<i64: 1, 256>}, {pipeline_mode = #tpu.pipeline_mode<synchronous>, transform_indices = @transform_2, window_bounds = array<i64: 256, 768>}, {pipeline_mode = #tpu.pipeline_mode<synchronous>, transform_indices = @transform_3, window_bounds = array<i64: 2, 768>}, {pipeline_mode = #tpu.pipeline_mode<synchronous>, transform_indices = @transform_4, window_bounds = array<i64: 8, 256>}]} {
    %c0 = arith.constant 0 : index
    %c0_0 = arith.constant 0 : index
    %0 = vector.load %arg4[%c0, %c0_0] : memref<2x768xf32, #tpu.memory_space<vmem>>, vector<1x768xf32>
    %1 = vector.extract_strided_slice %0 {offsets = [0, 0], sizes = [1, 512], strides = [1, 1]} : vector<1x768xf32> to vector<1x512xf32>
    %2 = vector.extract_strided_slice %0 {offsets = [0, 512], sizes = [1, 256], strides = [1, 1]} : vector<1x768xf32> to vector<1x256xf32>
    %c0_1 = arith.constant 0 : index
    %c0_2 = arith.constant 0 : index
    %3 = vector.load %arg2[%c0_1, %c0_2] : memref<1x256xf32, #tpu.memory_space<vmem>>, vector<1x256xf32>
    %c0_i32 = arith.constant 0 : i32
    %4 = arith.index_cast %c0_i32 : i32 to index
    %c0_3 = arith.constant 0 : index
    %5 = vector.load %arg1[%4, %c0_3] : memref<8x768xf32, #tpu.memory_space<vmem>>, vector<1x768xf32>
    %6 = arith.truncf %3 : vector<1x256xf32> to vector<1x256xbf16>
    %c0_4 = arith.constant 0 : index
    %c0_5 = arith.constant 0 : index
    %7 = vector.load %arg3[%c0_4, %c0_5] : memref<256x768xbf16, #tpu.memory_space<vmem>>, vector<256x768xbf16>
    %cst = arith.constant dense<0.000000e+00> : vector<1x768xf32>
    %8 = tpu.matmul %6, %7, %cst {dimension_numbers = #tpu.dot_dimension_numbers<[1], [0], [0], [1], [0, 0, 1, 1], [], []>} : vector<1x256xbf16>, vector<256x768xbf16>, vector<1x768xf32> -> vector<1x768xf32>
    %9 = vector.extract_strided_slice %5 {offsets = [0, 0], sizes = [1, 512], strides = [1, 1]} : vector<1x768xf32> to vector<1x512xf32>
    %10 = vector.extract_strided_slice %8 {offsets = [0, 0], sizes = [1, 512], strides = [1, 1]} : vector<1x768xf32> to vector<1x512xf32>
    %11 = arith.addf %9, %10 : vector<1x512xf32>
    %12 = arith.addf %11, %1 : vector<1x512xf32>
    %13 = arith.negf %12 : vector<1x512xf32>
    %14 = math.exp %13 : vector<1x512xf32>
    %cst_6 = arith.constant 1.000000e+00 : f32
    %15 = vector.broadcast %cst_6 : f32 to vector<1x512xf32>
    %16 = arith.addf %15, %14 : vector<1x512xf32>
    %17 = arith.divf %15, %16 : vector<1x512xf32>
    %18 = vector.extract_strided_slice %17 {offsets = [0, 0], sizes = [1, 256], strides = [1, 1]} : vector<1x512xf32> to vector<1x256xf32>
    %19 = vector.extract_strided_slice %17 {offsets = [0, 256], sizes = [1, 256], strides = [1, 1]} : vector<1x512xf32> to vector<1x256xf32>
    %20 = vector.extract_strided_slice %5 {offsets = [0, 512], sizes = [1, 256], strides = [1, 1]} : vector<1x768xf32> to vector<1x256xf32>
    %21 = vector.extract_strided_slice %8 {offsets = [0, 512], sizes = [1, 256], strides = [1, 1]} : vector<1x768xf32> to vector<1x256xf32>
    %22 = arith.addf %21, %2 : vector<1x256xf32>
    %23 = arith.mulf %18, %22 : vector<1x256xf32>
    %24 = arith.addf %20, %23 : vector<1x256xf32>
    %25 = math.tanh %24 : vector<1x256xf32>
    %cst_7 = arith.constant 1.000000e+00 : f32
    %26 = vector.broadcast %cst_7 : f32 to vector<1x256xf32>
    %27 = arith.subf %26, %19 : vector<1x256xf32>
    %28 = arith.mulf %27, %25 : vector<1x256xf32>
    %29 = arith.mulf %19, %3 : vector<1x256xf32>
    %30 = arith.addf %28, %29 : vector<1x256xf32>
    %31 = arith.index_cast %c0_i32 : i32 to index
    %c0_8 = arith.constant 0 : index
    %32 = vector.load %arg5[%31, %c0_8] : memref<8x256xf32, #tpu.memory_space<vmem>>, vector<1x256xf32>
    tpu.vector_store %arg5[%31, %c0_8], %30 {strides = array<i32>} : memref<8x256xf32, #tpu.memory_space<vmem>>, vector<1x256xf32>,
    %c1_i32 = arith.constant 1 : i32
    %33 = arith.index_cast %c1_i32 : i32 to index
    %c0_9 = arith.constant 0 : index
    %34 = vector.load %arg1[%33, %c0_9] : memref<8x768xf32, #tpu.memory_space<vmem>>, vector<1x768xf32>
    %35 = arith.truncf %30 : vector<1x256xf32> to vector<1x256xbf16>
    %c0_10 = arith.constant 0 : index
    %c0_11 = arith.constant 0 : index
    %36 = vector.load %arg3[%c0_10, %c0_11] : memref<256x768xbf16, #tpu.memory_space<vmem>>, vector<256x768xbf16>
    %cst_12 = arith.constant dense<0.000000e+00> : vector<1x768xf32>
    %37 = tpu.matmul %35, %36, %cst_12 {dimension_numbers = #tpu.dot_dimension_numbers<[1], [0], [0], [1], [0, 0, 1, 1], [], []>} : vector<1x256xbf16>, vector<256x768xbf16>, vector<1x768xf32> -> vector<1x768xf32>
    %38 = vector.extract_strided_slice %34 {offsets = [0, 0], sizes = [1, 512], strides = [1, 1]} : vector<1x768xf32> to vector<1x512xf32>
    %39 = vector.extract_strided_slice %37 {offsets = [0, 0], sizes = [1, 512], strides = [1, 1]} : vector<1x768xf32> to vector<1x512xf32>
    %40 = arith.addf %38, %39 : vector<1x512xf32>
    %41 = arith.addf %40, %1 : vector<1x512xf32>
    %42 = arith.negf %41 : vector<1x512xf32>
    %43 = math.exp %42 : vector<1x512xf32>
    %cst_13 = arith.constant 1.000000e+00 : f32
    %44 = vector.broadcast %cst_13 : f32 to vector<1x512xf32>
    %45 = arith.addf %44, %43 : vector<1x512xf32>
    %46 = arith.divf %44, %45 : vector<1x512xf32>
    %47 = vector.extract_strided_slice %46 {offsets = [0, 0], sizes = [1, 256], strides = [1, 1]} : vector<1x512xf32> to vector<1x256xf32>
    %48 = vector.extract_strided_slice %46 {offsets = [0, 256], sizes = [1, 256], strides = [1, 1]} : vector<1x512xf32> to vector<1x256xf32>
    %49 = vector.extract_strided_slice %34 {offsets = [0, 512], sizes = [1, 256], strides = [1, 1]} : vector<1x768xf32> to vector<1x256xf32>
    %50 = vector.extract_strided_slice %37 {offsets = [0, 512], sizes = [1, 256], strides = [1, 1]} : vector<1x768xf32> to vector<1x256xf32>
    %51 = arith.addf %50, %2 : vector<1x256xf32>
    %52 = arith.mulf %47, %51 : vector<1x256xf32>
    %53 = arith.addf %49, %52 : vector<1x256xf32>
    %54 = math.tanh %53 : vector<1x256xf32>
    %cst_14 = arith.constant 1.000000e+00 : f32
    %55 = vector.broadcast %cst_14 : f32 to vector<1x256xf32>
    %56 = arith.subf %55, %48 : vector<1x256xf32>
    %57 = arith.mulf %56, %54 : vector<1x256xf32>
    %58 = arith.mulf %48, %30 : vector<1x256xf32>
    %59 = arith.addf %57, %58 : vector<1x256xf32>
    %60 = arith.index_cast %c1_i32 : i32 to index
    %c0_15 = arith.constant 0 : index
    %61 = vector.load %arg5[%60, %c0_15] : memref<8x256xf32, #tpu.memory_space<vmem>>, vector<1x256xf32>
    tpu.vector_store %arg5[%60, %c0_15], %59 {strides = array<i32>} : memref<8x256xf32, #tpu.memory_space<vmem>>, vector<1x256xf32>,
    %c2_i32 = arith.constant 2 : i32
    %62 = arith.index_cast %c2_i32 : i32 to index
    %c0_16 = arith.constant 0 : index
    %63 = vector.load %arg1[%62, %c0_16] : memref<8x768xf32, #tpu.memory_space<vmem>>, vector<1x768xf32>
    %64 = arith.truncf %59 : vector<1x256xf32> to vector<1x256xbf16>
    %c0_17 = arith.constant 0 : index
    %c0_18 = arith.constant 0 : index
    %65 = vector.load %arg3[%c0_17, %c0_18] : memref<256x768xbf16, #tpu.memory_space<vmem>>, vector<256x768xbf16>
    %cst_19 = arith.constant dense<0.000000e+00> : vector<1x768xf32>
    %66 = tpu.matmul %64, %65, %cst_19 {dimension_numbers = #tpu.dot_dimension_numbers<[1], [0], [0], [1], [0, 0, 1, 1], [], []>} : vector<1x256xbf16>, vector<256x768xbf16>, vector<1x768xf32> -> vector<1x768xf32>
    %67 = vector.extract_strided_slice %63 {offsets = [0, 0], sizes = [1, 512], strides = [1, 1]} : vector<1x768xf32> to vector<1x512xf32>
    %68 = vector.extract_strided_slice %66 {offsets = [0, 0], sizes = [1, 512], strides = [1, 1]} : vector<1x768xf32> to vector<1x512xf32>
    %69 = arith.addf %67, %68 : vector<1x512xf32>
    %70 = arith.addf %69, %1 : vector<1x512xf32>
    %71 = arith.negf %70 : vector<1x512xf32>
    %72 = math.exp %71 : vector<1x512xf32>
    %cst_20 = arith.constant 1.000000e+00 : f32
    %73 = vector.broadcast %cst_20 : f32 to vector<1x512xf32>
    %74 = arith.addf %73, %72 : vector<1x512xf32>
    %75 = arith.divf %73, %74 : vector<1x512xf32>
    %76 = vector.extract_strided_slice %75 {offsets = [0, 0], sizes = [1, 256], strides = [1, 1]} : vector<1x512xf32> to vector<1x256xf32>
    %77 = vector.extract_strided_slice %75 {offsets = [0, 256], sizes = [1, 256], strides = [1, 1]} : vector<1x512xf32> to vector<1x256xf32>
    %78 = vector.extract_strided_slice %63 {offsets = [0, 512], sizes = [1, 256], strides = [1, 1]} : vector<1x768xf32> to vector<1x256xf32>
    %79 = vector.extract_strided_slice %66 {offsets = [0, 512], sizes = [1, 256], strides = [1, 1]} : vector<1x768xf32> to vector<1x256xf32>
    %80 = arith.addf %79, %2 : vector<1x256xf32>
    %81 = arith.mulf %76, %80 : vector<1x256xf32>
    %82 = arith.addf %78, %81 : vector<1x256xf32>
    %83 = math.tanh %82 : vector<1x256xf32>
    %cst_21 = arith.constant 1.000000e+00 : f32
    %84 = vector.broadcast %cst_21 : f32 to vector<1x256xf32>
    %85 = arith.subf %84, %77 : vector<1x256xf32>
    %86 = arith.mulf %85, %83 : vector<1x256xf32>
    %87 = arith.mulf %77, %59 : vector<1x256xf32>
    %88 = arith.addf %86, %87 : vector<1x256xf32>
    %89 = arith.index_cast %c2_i32 : i32 to index
    %c0_22 = arith.constant 0 : index
    %90 = vector.load %arg5[%89, %c0_22] : memref<8x256xf32, #tpu.memory_space<vmem>>, vector<1x256xf32>
    tpu.vector_store %arg5[%89, %c0_22], %88 {strides = array<i32>} : memref<8x256xf32, #tpu.memory_space<vmem>>, vector<1x256xf32>,
    %c3_i32 = arith.constant 3 : i32
    %91 = arith.index_cast %c3_i32 : i32 to index
    %c0_23 = arith.constant 0 : index
    %92 = vector.load %arg1[%91, %c0_23] : memref<8x768xf32, #tpu.memory_space<vmem>>, vector<1x768xf32>
    %93 = arith.truncf %88 : vector<1x256xf32> to vector<1x256xbf16>
    %c0_24 = arith.constant 0 : index
    %c0_25 = arith.constant 0 : index
    %94 = vector.load %arg3[%c0_24, %c0_25] : memref<256x768xbf16, #tpu.memory_space<vmem>>, vector<256x768xbf16>
    %cst_26 = arith.constant dense<0.000000e+00> : vector<1x768xf32>
    %95 = tpu.matmul %93, %94, %cst_26 {dimension_numbers = #tpu.dot_dimension_numbers<[1], [0], [0], [1], [0, 0, 1, 1], [], []>} : vector<1x256xbf16>, vector<256x768xbf16>, vector<1x768xf32> -> vector<1x768xf32>
    %96 = vector.extract_strided_slice %92 {offsets = [0, 0], sizes = [1, 512], strides = [1, 1]} : vector<1x768xf32> to vector<1x512xf32>
    %97 = vector.extract_strided_slice %95 {offsets = [0, 0], sizes = [1, 512], strides = [1, 1]} : vector<1x768xf32> to vector<1x512xf32>
    %98 = arith.addf %96, %97 : vector<1x512xf32>
    %99 = arith.addf %98, %1 : vector<1x512xf32>
    %100 = arith.negf %99 : vector<1x512xf32>
    %101 = math.exp %100 : vector<1x512xf32>
    %cst_27 = arith.constant 1.000000e+00 : f32
    %102 = vector.broadcast %cst_27 : f32 to vector<1x512xf32>
    %103 = arith.addf %102, %101 : vector<1x512xf32>
    %104 = arith.divf %102, %103 : vector<1x512xf32>
    %105 = vector.extract_strided_slice %104 {offsets = [0, 0], sizes = [1, 256], strides = [1, 1]} : vector<1x512xf32> to vector<1x256xf32>
    %106 = vector.extract_strided_slice %104 {offsets = [0, 256], sizes = [1, 256], strides = [1, 1]} : vector<1x512xf32> to vector<1x256xf32>
    %107 = vector.extract_strided_slice %92 {offsets = [0, 512], sizes = [1, 256], strides = [1, 1]} : vector<1x768xf32> to vector<1x256xf32>
    %108 = vector.extract_strided_slice %95 {offsets = [0, 512], sizes = [1, 256], strides = [1, 1]} : vector<1x768xf32> to vector<1x256xf32>
    %109 = arith.addf %108, %2 : vector<1x256xf32>
    %110 = arith.mulf %105, %109 : vector<1x256xf32>
    %111 = arith.addf %107, %110 : vector<1x256xf32>
    %112 = math.tanh %111 : vector<1x256xf32>
    %cst_28 = arith.constant 1.000000e+00 : f32
    %113 = vector.broadcast %cst_28 : f32 to vector<1x256xf32>
    %114 = arith.subf %113, %106 : vector<1x256xf32>
    %115 = arith.mulf %114, %112 : vector<1x256xf32>
    %116 = arith.mulf %106, %88 : vector<1x256xf32>
    %117 = arith.addf %115, %116 : vector<1x256xf32>
    %118 = arith.index_cast %c3_i32 : i32 to index
    %c0_29 = arith.constant 0 : index
    %119 = vector.load %arg5[%118, %c0_29] : memref<8x256xf32, #tpu.memory_space<vmem>>, vector<1x256xf32>
    tpu.vector_store %arg5[%118, %c0_29], %117 {strides = array<i32>} : memref<8x256xf32, #tpu.memory_space<vmem>>, vector<1x256xf32>,
    %c4_i32 = arith.constant 4 : i32
    %120 = arith.index_cast %c4_i32 : i32 to index
    %c0_30 = arith.constant 0 : index
    %121 = vector.load %arg1[%120, %c0_30] : memref<8x768xf32, #tpu.memory_space<vmem>>, vector<1x768xf32>
    %122 = arith.truncf %117 : vector<1x256xf32> to vector<1x256xbf16>
    %c0_31 = arith.constant 0 : index
    %c0_32 = arith.constant 0 : index
    %123 = vector.load %arg3[%c0_31, %c0_32] : memref<256x768xbf16, #tpu.memory_space<vmem>>, vector<256x768xbf16>
    %cst_33 = arith.constant dense<0.000000e+00> : vector<1x768xf32>
    %124 = tpu.matmul %122, %123, %cst_33 {dimension_numbers = #tpu.dot_dimension_numbers<[1], [0], [0], [1], [0, 0, 1, 1], [], []>} : vector<1x256xbf16>, vector<256x768xbf16>, vector<1x768xf32> -> vector<1x768xf32>
    %125 = vector.extract_strided_slice %121 {offsets = [0, 0], sizes = [1, 512], strides = [1, 1]} : vector<1x768xf32> to vector<1x512xf32>
    %126 = vector.extract_strided_slice %124 {offsets = [0, 0], sizes = [1, 512], strides = [1, 1]} : vector<1x768xf32> to vector<1x512xf32>
    %127 = arith.addf %125, %126 : vector<1x512xf32>
    %128 = arith.addf %127, %1 : vector<1x512xf32>
    %129 = arith.negf %128 : vector<1x512xf32>
    %130 = math.exp %129 : vector<1x512xf32>
    %cst_34 = arith.constant 1.000000e+00 : f32
    %131 = vector.broadcast %cst_34 : f32 to vector<1x512xf32>
    %132 = arith.addf %131, %130 : vector<1x512xf32>
    %133 = arith.divf %131, %132 : vector<1x512xf32>
    %134 = vector.extract_strided_slice %133 {offsets = [0, 0], sizes = [1, 256], strides = [1, 1]} : vector<1x512xf32> to vector<1x256xf32>
    %135 = vector.extract_strided_slice %133 {offsets = [0, 256], sizes = [1, 256], strides = [1, 1]} : vector<1x512xf32> to vector<1x256xf32>
    %136 = vector.extract_strided_slice %121 {offsets = [0, 512], sizes = [1, 256], strides = [1, 1]} : vector<1x768xf32> to vector<1x256xf32>
    %137 = vector.extract_strided_slice %124 {offsets = [0, 512], sizes = [1, 256], strides = [1, 1]} : vector<1x768xf32> to vector<1x256xf32>
    %138 = arith.addf %137, %2 : vector<1x256xf32>
    %139 = arith.mulf %134, %138 : vector<1x256xf32>
    %140 = arith.addf %136, %139 : vector<1x256xf32>
    %141 = math.tanh %140 : vector<1x256xf32>
    %cst_35 = arith.constant 1.000000e+00 : f32
    %142 = vector.broadcast %cst_35 : f32 to vector<1x256xf32>
    %143 = arith.subf %142, %135 : vector<1x256xf32>
    %144 = arith.mulf %143, %141 : vector<1x256xf32>
    %145 = arith.mulf %135, %117 : vector<1x256xf32>
    %146 = arith.addf %144, %145 : vector<1x256xf32>
    %147 = arith.index_cast %c4_i32 : i32 to index
    %c0_36 = arith.constant 0 : index
    %148 = vector.load %arg5[%147, %c0_36] : memref<8x256xf32, #tpu.memory_space<vmem>>, vector<1x256xf32>
    tpu.vector_store %arg5[%147, %c0_36], %146 {strides = array<i32>} : memref<8x256xf32, #tpu.memory_space<vmem>>, vector<1x256xf32>,
    %c5_i32 = arith.constant 5 : i32
    %149 = arith.index_cast %c5_i32 : i32 to index
    %c0_37 = arith.constant 0 : index
    %150 = vector.load %arg1[%149, %c0_37] : memref<8x768xf32, #tpu.memory_space<vmem>>, vector<1x768xf32>
    %151 = arith.truncf %146 : vector<1x256xf32> to vector<1x256xbf16>
    %c0_38 = arith.constant 0 : index
    %c0_39 = arith.constant 0 : index
    %152 = vector.load %arg3[%c0_38, %c0_39] : memref<256x768xbf16, #tpu.memory_space<vmem>>, vector<256x768xbf16>
    %cst_40 = arith.constant dense<0.000000e+00> : vector<1x768xf32>
    %153 = tpu.matmul %151, %152, %cst_40 {dimension_numbers = #tpu.dot_dimension_numbers<[1], [0], [0], [1], [0, 0, 1, 1], [], []>} : vector<1x256xbf16>, vector<256x768xbf16>, vector<1x768xf32> -> vector<1x768xf32>
    %154 = vector.extract_strided_slice %150 {offsets = [0, 0], sizes = [1, 512], strides = [1, 1]} : vector<1x768xf32> to vector<1x512xf32>
    %155 = vector.extract_strided_slice %153 {offsets = [0, 0], sizes = [1, 512], strides = [1, 1]} : vector<1x768xf32> to vector<1x512xf32>
    %156 = arith.addf %154, %155 : vector<1x512xf32>
    %157 = arith.addf %156, %1 : vector<1x512xf32>
    %158 = arith.negf %157 : vector<1x512xf32>
    %159 = math.exp %158 : vector<1x512xf32>
    %cst_41 = arith.constant 1.000000e+00 : f32
    %160 = vector.broadcast %cst_41 : f32 to vector<1x512xf32>
    %161 = arith.addf %160, %159 : vector<1x512xf32>
    %162 = arith.divf %160, %161 : vector<1x512xf32>
    %163 = vector.extract_strided_slice %162 {offsets = [0, 0], sizes = [1, 256], strides = [1, 1]} : vector<1x512xf32> to vector<1x256xf32>
    %164 = vector.extract_strided_slice %162 {offsets = [0, 256], sizes = [1, 256], strides = [1, 1]} : vector<1x512xf32> to vector<1x256xf32>
    %165 = vector.extract_strided_slice %150 {offsets = [0, 512], sizes = [1, 256], strides = [1, 1]} : vector<1x768xf32> to vector<1x256xf32>
    %166 = vector.extract_strided_slice %153 {offsets = [0, 512], sizes = [1, 256], strides = [1, 1]} : vector<1x768xf32> to vector<1x256xf32>
    %167 = arith.addf %166, %2 : vector<1x256xf32>
    %168 = arith.mulf %163, %167 : vector<1x256xf32>
    %169 = arith.addf %165, %168 : vector<1x256xf32>
    %170 = math.tanh %169 : vector<1x256xf32>
    %cst_42 = arith.constant 1.000000e+00 : f32
    %171 = vector.broadcast %cst_42 : f32 to vector<1x256xf32>
    %172 = arith.subf %171, %164 : vector<1x256xf32>
    %173 = arith.mulf %172, %170 : vector<1x256xf32>
    %174 = arith.mulf %164, %146 : vector<1x256xf32>
    %175 = arith.addf %173, %174 : vector<1x256xf32>
    %176 = arith.index_cast %c5_i32 : i32 to index
    %c0_43 = arith.constant 0 : index
    %177 = vector.load %arg5[%176, %c0_43] : memref<8x256xf32, #tpu.memory_space<vmem>>, vector<1x256xf32>
    tpu.vector_store %arg5[%176, %c0_43], %175 {strides = array<i32>} : memref<8x256xf32, #tpu.memory_space<vmem>>, vector<1x256xf32>,
    %c6_i32 = arith.constant 6 : i32
    %178 = arith.index_cast %c6_i32 : i32 to index
    %c0_44 = arith.constant 0 : index
    %179 = vector.load %arg1[%178, %c0_44] : memref<8x768xf32, #tpu.memory_space<vmem>>, vector<1x768xf32>
    %180 = arith.truncf %175 : vector<1x256xf32> to vector<1x256xbf16>
    %c0_45 = arith.constant 0 : index
    %c0_46 = arith.constant 0 : index
    %181 = vector.load %arg3[%c0_45, %c0_46] : memref<256x768xbf16, #tpu.memory_space<vmem>>, vector<256x768xbf16>
    %cst_47 = arith.constant dense<0.000000e+00> : vector<1x768xf32>
    %182 = tpu.matmul %180, %181, %cst_47 {dimension_numbers = #tpu.dot_dimension_numbers<[1], [0], [0], [1], [0, 0, 1, 1], [], []>} : vector<1x256xbf16>, vector<256x768xbf16>, vector<1x768xf32> -> vector<1x768xf32>
    %183 = vector.extract_strided_slice %179 {offsets = [0, 0], sizes = [1, 512], strides = [1, 1]} : vector<1x768xf32> to vector<1x512xf32>
    %184 = vector.extract_strided_slice %182 {offsets = [0, 0], sizes = [1, 512], strides = [1, 1]} : vector<1x768xf32> to vector<1x512xf32>
    %185 = arith.addf %183, %184 : vector<1x512xf32>
    %186 = arith.addf %185, %1 : vector<1x512xf32>
    %187 = arith.negf %186 : vector<1x512xf32>
    %188 = math.exp %187 : vector<1x512xf32>
    %cst_48 = arith.constant 1.000000e+00 : f32
    %189 = vector.broadcast %cst_48 : f32 to vector<1x512xf32>
    %190 = arith.addf %189, %188 : vector<1x512xf32>
    %191 = arith.divf %189, %190 : vector<1x512xf32>
    %192 = vector.extract_strided_slice %191 {offsets = [0, 0], sizes = [1, 256], strides = [1, 1]} : vector<1x512xf32> to vector<1x256xf32>
    %193 = vector.extract_strided_slice %191 {offsets = [0, 256], sizes = [1, 256], strides = [1, 1]} : vector<1x512xf32> to vector<1x256xf32>
    %194 = vector.extract_strided_slice %179 {offsets = [0, 512], sizes = [1, 256], strides = [1, 1]} : vector<1x768xf32> to vector<1x256xf32>
    %195 = vector.extract_strided_slice %182 {offsets = [0, 512], sizes = [1, 256], strides = [1, 1]} : vector<1x768xf32> to vector<1x256xf32>
    %196 = arith.addf %195, %2 : vector<1x256xf32>
    %197 = arith.mulf %192, %196 : vector<1x256xf32>
    %198 = arith.addf %194, %197 : vector<1x256xf32>
    %199 = math.tanh %198 : vector<1x256xf32>
    %cst_49 = arith.constant 1.000000e+00 : f32
    %200 = vector.broadcast %cst_49 : f32 to vector<1x256xf32>
    %201 = arith.subf %200, %193 : vector<1x256xf32>
    %202 = arith.mulf %201, %199 : vector<1x256xf32>
    %203 = arith.mulf %193, %175 : vector<1x256xf32>
    %204 = arith.addf %202, %203 : vector<1x256xf32>
    %205 = arith.index_cast %c6_i32 : i32 to index
    %c0_50 = arith.constant 0 : index
    %206 = vector.load %arg5[%205, %c0_50] : memref<8x256xf32, #tpu.memory_space<vmem>>, vector<1x256xf32>
    tpu.vector_store %arg5[%205, %c0_50], %204 {strides = array<i32>} : memref<8x256xf32, #tpu.memory_space<vmem>>, vector<1x256xf32>,
    %c7_i32 = arith.constant 7 : i32
    %207 = arith.index_cast %c7_i32 : i32 to index
    %c0_51 = arith.constant 0 : index
    %208 = vector.load %arg1[%207, %c0_51] : memref<8x768xf32, #tpu.memory_space<vmem>>, vector<1x768xf32>
    %209 = arith.truncf %204 : vector<1x256xf32> to vector<1x256xbf16>
    %c0_52 = arith.constant 0 : index
    %c0_53 = arith.constant 0 : index
    %210 = vector.load %arg3[%c0_52, %c0_53] : memref<256x768xbf16, #tpu.memory_space<vmem>>, vector<256x768xbf16>
    %cst_54 = arith.constant dense<0.000000e+00> : vector<1x768xf32>
    %211 = tpu.matmul %209, %210, %cst_54 {dimension_numbers = #tpu.dot_dimension_numbers<[1], [0], [0], [1], [0, 0, 1, 1], [], []>} : vector<1x256xbf16>, vector<256x768xbf16>, vector<1x768xf32> -> vector<1x768xf32>
    %212 = vector.extract_strided_slice %208 {offsets = [0, 0], sizes = [1, 512], strides = [1, 1]} : vector<1x768xf32> to vector<1x512xf32>
    %213 = vector.extract_strided_slice %211 {offsets = [0, 0], sizes = [1, 512], strides = [1, 1]} : vector<1x768xf32> to vector<1x512xf32>
    %214 = arith.addf %212, %213 : vector<1x512xf32>
    %215 = arith.addf %214, %1 : vector<1x512xf32>
    %216 = arith.negf %215 : vector<1x512xf32>
    %217 = math.exp %216 : vector<1x512xf32>
    %cst_55 = arith.constant 1.000000e+00 : f32
    %218 = vector.broadcast %cst_55 : f32 to vector<1x512xf32>
    %219 = arith.addf %218, %217 : vector<1x512xf32>
    %220 = arith.divf %218, %219 : vector<1x512xf32>
    %221 = vector.extract_strided_slice %220 {offsets = [0, 0], sizes = [1, 256], strides = [1, 1]} : vector<1x512xf32> to vector<1x256xf32>
    %222 = vector.extract_strided_slice %220 {offsets = [0, 256], sizes = [1, 256], strides = [1, 1]} : vector<1x512xf32> to vector<1x256xf32>
    %223 = vector.extract_strided_slice %208 {offsets = [0, 512], sizes = [1, 256], strides = [1, 1]} : vector<1x768xf32> to vector<1x256xf32>
    %224 = vector.extract_strided_slice %211 {offsets = [0, 512], sizes = [1, 256], strides = [1, 1]} : vector<1x768xf32> to vector<1x256xf32>
    %225 = arith.addf %224, %2 : vector<1x256xf32>
    %226 = arith.mulf %221, %225 : vector<1x256xf32>
    %227 = arith.addf %223, %226 : vector<1x256xf32>
    %228 = math.tanh %227 : vector<1x256xf32>
    %cst_56 = arith.constant 1.000000e+00 : f32
    %229 = vector.broadcast %cst_56 : f32 to vector<1x256xf32>
    %230 = arith.subf %229, %222 : vector<1x256xf32>
    %231 = arith.mulf %230, %228 : vector<1x256xf32>
    %232 = arith.mulf %222, %204 : vector<1x256xf32>
    %233 = arith.addf %231, %232 : vector<1x256xf32>
    %234 = arith.index_cast %c7_i32 : i32 to index
    %c0_57 = arith.constant 0 : index
    %235 = vector.load %arg5[%234, %c0_57] : memref<8x256xf32, #tpu.memory_space<vmem>>, vector<1x256xf32>
    tpu.vector_store %arg5[%234, %c0_57], %233 {strides = array<i32>} : memref<8x256xf32, #tpu.memory_space<vmem>>, vector<1x256xf32>,
    %c8_i32 = arith.constant 8 : i32
    return
  }
  func.func @transform_0(%arg0: i32) -> (i32, i32) {
    %c0_i32 = arith.constant 0 : i32
    %c0_i32_0 = arith.constant 0 : i32
    %c0_i32_1 = arith.constant 0 : i32
    return %c0_i32, %c0_i32_0 : i32, i32
  }
  func.func @transform_1(%arg0: i32) -> (i32, i32) {
    %c0_i32 = arith.constant 0 : i32
    %c0_i32_0 = arith.constant 0 : i32
    %c0_i32_1 = arith.constant 0 : i32
    return %c0_i32, %c0_i32_0 : i32, i32
  }
  func.func @transform_2(%arg0: i32) -> (i32, i32) {
    %c0_i32 = arith.constant 0 : i32
    %c0_i32_0 = arith.constant 0 : i32
    %c0_i32_1 = arith.constant 0 : i32
    return %c0_i32, %c0_i32_0 : i32, i32
  }
  func.func @transform_3(%arg0: i32) -> (i32, i32) {
    %c0_i32 = arith.constant 0 : i32
    %c0_i32_0 = arith.constant 0 : i32
    %c0_i32_1 = arith.constant 0 : i32
    return %c0_i32, %c0_i32_0 : i32, i32
  }
  func.func @transform_4(%arg0: i32) -> (i32, i32) {
    %c0_i32 = arith.constant 0 : i32
    %c0_i32_0 = arith.constant 0 : i32
    %c0_i32_1 = arith.constant 0 : i32
    return %c0_i32, %c0_i32_0 : i32, i32
  }
}

</mosaic_0001>

<bundles_post_ra>
// kernel: tpu_custom_call.1
= control target key start
LH: loop header
LB: loop body
LE: loop exit
PB: predicated region body
PF: predicated region fallthrough
CT: control target
= control target key end

     0   :  { %9 = vsyncpa [#allocation3], 0  ;;  %s9656_s0 = inlined_call_operand.hbm [shape: f32[8,768], index: 0, kind: input, shape index: {}]   ;;  %s9657_s1 = inlined_call_operand.vmem [shape: f32[1,256], index: 1, kind: input, shape index: {}]   ;;  %s9658_s2 = inlined_call_operand.hbm [shape: bf16[256,768], index: 2, kind: input, shape index: {}]   ;;  %s9659_s3 = inlined_call_operand.hbm [shape: f32[2,768], index: 3, kind: input, shape index: {}]   ;;  %s9660_s4 = inlined_call_operand.hbm [shape: f32[8,256], index: 4, kind: output, shape index: {}]  }
   0x1   :  { %10 = vsyncpa [#allocation6], 0 }
   0x2   :  { %11 = vsyncpa [#allocation4], 0  ;;  %s7921_s15 = smov [#allocation5]   ;;  %s7827_s19 = scalar_lea.hbm %s9658_s2, 12288 }
   0x3   :  { %s29_s16 = sshll.u32 %s7921_s15, 4  ;;  %p7828_p0 = scmp.ne.s32.totalorder %s9658_s2, %s7827_s19  ;;  %s30_s16 = int_to_ptr.vmem [resolvable:$true] %s29_s16 }
   0x4   :  { %p7831_p1 = scmp.lt.u32.totalorder %s7827_s19, %s9658_s2 }
   0x6   :  { %p7833_p2 = pnand %p7831_p1, %p7828_p0 }
   0x8   :  { %7836 = shalt.err (!%p7833_p2)
}
   0x9   :  { %s7837_s24 = scalar_lea.vmem %s30_s16, 12288  ;;  %p7842_p4 = scmp.lt.s32.totalorder %s30_s16, %s30_s16 }
   0xa   :  { %p7838_p3 = scmp.ne.s32.totalorder %s30_s16, %s7837_s24  ;;  %p7843_p5 = scmp.lt.s32.totalorder %s7837_s24, %s7837_s24 }
   0xc   :  { %p7844_p6 = por %p7843_p5, %p7842_p4 }
   0xe   :  { %p7845_p7 = pnand %p7844_p6, %p7838_p3 }
  0x10   :  { %7848 = shalt.err (!%p7845_p7)
}
  0x11   :  { %s7922_s25 = smov 384   ;;  %s7923_s26 = smov 24  }
  0x12   :  { %35 = dma.hbm_to_vmem [thread:$0]  %s9658_s2, 12288, %s30_s16, [#allocation6], %s7922_s25, %s7922_s25, %s7923_s26  }
  0x13   :  { %s7924_s29 = smov [#allocation2]   ;;  %s7925_s5 = smov [#allocation7]  }
  0x14   :  { %s18_s30 = sshll.u32 %s7924_s29, 4  ;;  %s42_s6 = sshll.u32 %s7925_s5, 4  ;;  %s19_s30 = int_to_ptr.vmem [resolvable:$true] %s18_s30  ;;  %s43_s6 = int_to_ptr.vmem [resolvable:$true] %s42_s6 }
  0x15   :  { %s7849_s9 = scalar_lea.hbm %s9656_s0, 768 }
  0x16   :  { %p7850_p8 = scmp.ne.s32.totalorder %s9656_s0, %s7849_s9  ;;  %p7853_p9 = scmp.lt.u32.totalorder %s7849_s9, %s9656_s0 }
  0x18   :  { %p7855_p10 = pnand %p7853_p9, %p7850_p8 }
  0x1a   :  { %7858 = shalt.err (!%p7855_p10)
}
  0x1b   :  { %s7859_s2 = scalar_lea.vmem %s19_s30, 768  ;;  %p7864_p12 = scmp.lt.s32.totalorder %s19_s30, %s19_s30 }
  0x1c   :  { %p7860_p11 = scmp.ne.s32.totalorder %s19_s30, %s7859_s2  ;;  %p7865_p13 = scmp.lt.s32.totalorder %s7859_s2, %s7859_s2 }
  0x1e   :  { %p7866_p0 = por %p7865_p13, %p7864_p12 }
  0x20   :  { %p7867_p1 = pnand %p7866_p0, %p7860_p11 }
  0x22   :  { %7870 = shalt.err (!%p7867_p1)
}
  0x23   :  { %21 = dma.hbm_to_vmem [thread:$0]  %s9656_s0, 768, %s19_s30, [#allocation3]  }
  0x24   :  { %s7871_s18 = scalar_lea.hbm %s9659_s3, 192 }
  0x25   :  { %p7872_p2 = scmp.ne.s32.totalorder %s9659_s3, %s7871_s18  ;;  %p7875_p3 = scmp.lt.u32.totalorder %s7871_s18, %s9659_s3 }
  0x27   :  { %p7877_p4 = pnand %p7875_p3, %p7872_p2 }
  0x29   :  { %7880 = shalt.err (!%p7877_p4)
}
  0x2a   :  { %s7881_s23 = scalar_lea.vmem %s43_s6, 192  ;;  %p7886_p6 = scmp.lt.s32.totalorder %s43_s6, %s43_s6 }
  0x2b   :  { %p7882_p5 = scmp.ne.s32.totalorder %s43_s6, %s7881_s23  ;;  %p7887_p7 = scmp.lt.s32.totalorder %s7881_s23, %s7881_s23 }
  0x2d   :  { %p7888_p8 = por %p7887_p7, %p7886_p6 }
  0x2f   :  { %p7889_p9 = pnand %p7888_p8, %p7882_p5 }
  0x31   :  { %7892 = shalt.err (!%p7889_p9)
}
  0x32   :  { %45 = dma.hbm_to_vmem [thread:$0]  %s9659_s3, 192, %s43_s6, [#allocation6]  }
  0x33   :  { %7915 = dma.done.wait [#allocation3], 768  }
  0x34   :  { %7916 = vsyncadd [#allocation3], 4294966528 }
  0x35   :  { %7917 = dma.done.wait [#allocation6], 12480  }
  0x36   :  { %7918 = vsyncadd [#allocation6], 4294954816  ;;  %v7989_v0 = vld [vmem:[#allocation5 + $0x4] ss:$24 sps:$4 sm:$0xff]   ;;  %v7992_v2 = vld [vmem:[#allocation5] ss:$24 sps:$4 sm:$0xff]   ;;  %v61_v36 = vlaneseq }
  0x37   :  { %v7183_v1 = vld [vmem:[#allocation5 + $0xc] ss:$24 sps:$4 sm:$0xff]   ;;  %649 = vmatprep.subr.bf16.mxu0 %v7989_v0  ;;  %v7186_v3 = vld [vmem:[#allocation5 + $0x8] ss:$24 sps:$4 sm:$0xff]   ;;  %v7189_v5 = vld [vmem:[#allocation5 + $0x3c] ss:$24 sps:$4 sm:$0xff]  }
  0x38   :  { %690 = vmatprep.subr.bf16.mxu1 %v7183_v1  ;;  %v7994_v4 = vld [vmem:[#allocation5 + $0x34] ss:$24 sps:$4 sm:$0xff]   ;;  %650 = vmatpush1.bf16.msra.mxu0 %v7992_v2  ;;  %v7997_v6 = vld [vmem:[#allocation5 + $0x30] ss:$24 sps:$4 sm:$0xff]   ;;  %v8000_v8 = vld [vmem:[#allocation5 + $0x64] ss:$24 sps:$4 sm:$0xff]  }
  0x39   :  { %691 = vmatpush1.bf16.msra.mxu1 %v7186_v3  ;;  %651 = vmatprep.subr.bf16.mxu0 %v7994_v4  ;;  %v7192_v7 = vld [vmem:[#allocation5 + $0x38] ss:$24 sps:$4 sm:$0xff]   ;;  %v7195_v9 = vld [vmem:[#allocation5 + $0x6c] ss:$24 sps:$4 sm:$0xff]   ;;  %v7198_v11 = vld [vmem:[#allocation5 + $0x68] ss:$24 sps:$4 sm:$0xff]  }
  0x3a   :  { %692 = vmatprep.subr.bf16.mxu1 %v7189_v5  ;;  %v8002_v10 = vld [vmem:[#allocation5 + $0x60] ss:$24 sps:$4 sm:$0xff]   ;;  %v8005_v12 = vld [vmem:[#allocation5 + $0x94] ss:$24 sps:$4 sm:$0xff]   ;;  %v8008_v14 = vld [vmem:[#allocation5 + $0x90] ss:$24 sps:$4 sm:$0xff]  }
  0x3b   :  { %v7201_v13 = vld [vmem:[#allocation5 + $0x9c] ss:$24 sps:$4 sm:$0xff]   ;;  %v7204_v15 = vld [vmem:[#allocation5 + $0x98] ss:$24 sps:$4 sm:$0xff]   ;;  %v7207_v17 = vld [vmem:[#allocation5 + $0xcc] ss:$24 sps:$4 sm:$0xff]  }
  0x3c   :  { %652 = vmatpush1.bf16.msra.mxu0 %v7997_v6  ;;  %v8011_v16 = vld [vmem:[#allocation5 + $0xc4] ss:$24 sps:$4 sm:$0xff]   ;;  %v8014_v18 = vld [vmem:[#allocation5 + $0xc0] ss:$24 sps:$4 sm:$0xff]   ;;  %v8017_v20 = vld [vmem:[#allocation5 + $0xf4] ss:$24 sps:$4 sm:$0xff]  }
  0x3d   :  { %693 = vmatpush1.bf16.msra.mxu1 %v7192_v7  ;;  %653 = vmatprep.subr.bf16.mxu0 %v8000_v8  ;;  %v7210_v19 = vld [vmem:[#allocation5 + $0xc8] ss:$24 sps:$4 sm:$0xff]   ;;  %v7213_v21 = vld [vmem:[#allocation5 + $0xfc] ss:$24 sps:$4 sm:$0xff]   ;;  %v7216_v23 = vld [vmem:[#allocation5 + $0xf8] ss:$24 sps:$4 sm:$0xff]  }
  0x3e   :  { %694 = vmatprep.subr.bf16.mxu1 %v7195_v9  ;;  %v8020_v22 = vld [vmem:[#allocation5 + $0xf0] ss:$24 sps:$4 sm:$0xff]   ;;  %v8023_v24 = vld [vmem:[#allocation5 + $0x124] ss:$24 sps:$4 sm:$0xff]   ;;  %v8026_v26 = vld [vmem:[#allocation5 + $0x120] ss:$24 sps:$4 sm:$0xff]  }
  0x3f   :  { %v7219_v25 = vld [vmem:[#allocation5 + $0x12c] ss:$24 sps:$4 sm:$0xff]   ;;  %v7222_v27 = vld [vmem:[#allocation5 + $0x128] ss:$24 sps:$4 sm:$0xff]   ;;  %v7225_v29 = vld [vmem:[#allocation5 + $0x15c] ss:$24 sps:$4 sm:$0xff]  }
  0x40   :  { %654 = vmatpush1.bf16.msra.mxu0 %v8002_v10  ;;  %v8029_v28 = vld [vmem:[#allocation5 + $0x154] ss:$24 sps:$4 sm:$0xff]   ;;  %v8032_v30 = vld [vmem:[#allocation5 + $0x150] ss:$24 sps:$4 sm:$0xff]   ;;  %v8035_v32 = vld [vmem:[#allocation5 + $0x184] ss:$24 sps:$4 sm:$0xff]  }
  0x41   :  { %695 = vmatpush1.bf16.msra.mxu1 %v7198_v11  ;;  %655 = vmatprep.subr.bf16.mxu0 %v8005_v12  ;;  %v7228_v31 = vld [vmem:[#allocation5 + $0x158] ss:$24 sps:$4 sm:$0xff]   ;;  %v7231_v33 = vld [vmem:[#allocation5 + $0x18c] ss:$24 sps:$4 sm:$0xff]   ;;  %v7234_v35 = vld [vmem:[#allocation5 + $0x188] ss:$24 sps:$4 sm:$0xff]  }
  0x42   :  { %696 = vmatprep.subr.bf16.mxu1 %v7201_v13  ;;  %v8038_v34 = vld [vmem:[#allocation5 + $0x180] ss:$24 sps:$4 sm:$0xff]   ;;  %v8041_v37 = vld [vmem:[#allocation5 + $0x1b4] ss:$24 sps:$4 sm:$0xff]   ;;  %v8044_v39 = vld [vmem:[#allocation5 + $0x1b0] ss:$24 sps:$4 sm:$0xff]  }
  0x43   :  { %v7237_v38 = vld [vmem:[#allocation5 + $0x1bc] ss:$24 sps:$4 sm:$0xff]   ;;  %v8047_v40 = vshrl.u32 %v61_v36, 7  ;;  %v8050_v41 = vld [vmem:[#allocation5 + $0x1b8] ss:$24 sps:$4 sm:$0xff]   ;;  %vm8310_vm0 = vcmp.lt.s32.totalorder %v61_v36, 256 }
  0x44   :  { %656 = vmatpush1.bf16.msra.mxu0 %v8008_v14  ;;  %v8052_v42 = vld [vmem:[#allocation5 + $0x1e4] ss:$24 sps:$4 sm:$0xff]   ;;  %v8057_v44 = vld [vmem:[#allocation5 + $0x1e0] ss:$24 sps:$4 sm:$0xff]   ;;  %v8066_v47 = vld [vmem:[#allocation5 + $0x214] ss:$24 sps:$4 sm:$0xff]  }
  0x45   :  { %697 = vmatpush1.bf16.msra.mxu1 %v7204_v15  ;;  %657 = vmatprep.subr.bf16.mxu0 %v8011_v16  ;;  %v8055_v43 = vld [vmem:[#allocation5 + $0x1ec] ss:$24 sps:$4 sm:$0xff]   ;;  %v8059_v45 = vld [vmem:[#allocation5 + $0x1e8] ss:$24 sps:$4 sm:$0xff]   ;;  %v8062_v46 = vsub.s32 1, %v8047_v40  ;;  %v8115_v3 = vsub.s32 0, %v8047_v40 }
  0x46   :  { %698 = vmatprep.subr.bf16.mxu1 %v7207_v17  ;;  %v8070_v48 = vld [vmem:[#allocation5 + $0x21c] ss:$24 sps:$4 sm:$0xff]   ;;  %v56_v49 = vld [vmem:[%s9657_s1] sm:$0x3]  ;;  %v8086_v54 = vld [vmem:[#allocation5 + $0x24c] ss:$24 sps:$4 sm:$0xff]  }
  0x47   :  { %v8075_v50 = vld [vmem:[#allocation5 + $0x210] ss:$24 sps:$4 sm:$0xff]   ;;  %v68_v51 = vrot.slane %v56_v49, %v8062_v46  ;;  %v8084_v53 = vld [vmem:[#allocation5 + $0x244] ss:$24 sps:$4 sm:$0xff]   ;;  %v8088_v56 = vld [vmem:[#allocation5 + $0x240] ss:$24 sps:$4 sm:$0xff]   ;;  %v64_v13 = vrot.slane %v56_v49, %v8115_v3 }
  0x48   :  { %658 = vmatpush1.bf16.msra.mxu0 %v8014_v18  ;;  %v8080_v52 = vld [vmem:[#allocation5 + $0x218] ss:$24 sps:$4 sm:$0xff]   ;;  %v8092_v57 = vld [vmem:[#allocation5 + $0x248] ss:$24 sps:$4 sm:$0xff]   ;;  %v8096_v58 = vld [vmem:[#allocation5 + $0x274] ss:$24 sps:$4 sm:$0xff]  }
  0x49   :  { %699 = vmatpush1.bf16.msra.mxu1 %v7210_v19  ;;  %659 = vmatprep.subr.bf16.mxu0 %v8017_v20  ;;  %v72_v55 = vpack.c.bf16 %v68_v51, %v68_v51  ;;  %v8098_v59 = vld [vmem:[#allocation5 + $0x27c] ss:$24 sps:$4 sm:$0xff]   ;;  %v8100_v60 = vld [vmem:[#allocation5 + $0x270] ss:$24 sps:$4 sm:$0xff]   ;;  %v8110_v63 = vld [vmem:[#allocation5 + $0x2ac] ss:$24 sps:$4 sm:$0xff]   ;;  %v8138_v19 = vpack.c.bf16 %v64_v13, %v64_v13 }
  0x4a   :  { %700 = vmatprep.subr.bf16.mxu1 %v7213_v21  ;;  %v8104_v61 = vld [vmem:[#allocation5 + $0x278] ss:$24 sps:$4 sm:$0xff]   ;;  %v8108_v62 = vld [vmem:[#allocation5 + $0x2a4] ss:$24 sps:$4 sm:$0xff]   ;;  %v8119_v5 = vld [vmem:[#allocation5 + $0x2a8] ss:$24 sps:$4 sm:$0xff]  }
  0x4b   :  { %681 = vmatprep.mubr.bf16.mxu0 %v72_v55  ;;  %722 = vmatprep.mubr.bf16.mxu1 %v72_v55  ;;  %v8112_v1 = vld [vmem:[#allocation5 + $0x2a0] ss:$24 sps:$4 sm:$0xff]   ;;  %v8123_v7 = vld [vmem:[#allocation5 + $0x2d4] ss:$24 sps:$4 sm:$0xff]   ;;  %v8127_v11 = vld [vmem:[#allocation5 + $0x2d0] ss:$24 sps:$4 sm:$0xff]  }
  0x4c   :  { %660 = vmatpush1.bf16.msra.mxu0 %v8020_v22  ;;  %v8125_v9 = vld [vmem:[#allocation5 + $0x2dc] ss:$24 sps:$4 sm:$0xff]   ;;  %v8132_v15 = vld [vmem:[#allocation5 + $0x2d8] ss:$24 sps:$4 sm:$0xff]   ;;  %v7806_v49 = vld [vmem:[#allocation5 + $0x8] ss:$24 sps:$4 sm:$0xff]  }
  0x4d   :  { %701 = vmatpush1.bf16.msra.mxu1 %v7216_v23  ;;  %661 = vmatprep.subr.bf16.mxu0 %v8023_v24  ;;  %v8136_v17 = vld [vmem:[#allocation5 + $0x14] ss:$24 sps:$4 sm:$0xff]   ;;  %v8140_v21 = vld [vmem:[#allocation5 + $0x10] ss:$24 sps:$4 sm:$0xff]   ;;  %v8144_v23 = vld [vmem:[#allocation5 + $0x44] ss:$24 sps:$4 sm:$0xff]  }
  0x4e   :  { %702 = vmatprep.subr.bf16.mxu1 %v7219_v25  ;;  %v8148_v25 = vld [vmem:[#allocation5 + $0x40] ss:$24 sps:$4 sm:$0xff]  }
  0x4f   :  { %v7808_v51 = vld [vmem:[#allocation5 + $0x38] ss:$24 sps:$4 sm:$0xff]   ;;  %v7818_v13 = vld [vmem:[#allocation5 + $0x128] ss:$24 sps:$4 sm:$0xff]  }
  0x50   :  { %662 = vmatpush1.bf16.msra.mxu0 %v8026_v26  ;;  %v8354_v36 = vld [vmem:[#allocation5] ss:$24 sps:$4 sm:$0xff]  }
  0x51   :  { %703 = vmatpush1.bf16.msra.mxu1 %v7222_v27  ;;  %663 = vmatprep.subr.bf16.mxu0 %v8029_v28  ;;  %v8152_v27 = vld [vmem:[#allocation5 + $0x74] ss:$24 sps:$4 sm:$0xff]  }
  0x52   :  { %704 = vmatprep.subr.bf16.mxu1 %v7225_v29  ;;  %v8157_v29 = vld [vmem:[#allocation5 + $0x70] ss:$24 sps:$4 sm:$0xff]  }
  0x54   :  { %664 = vmatpush1.bf16.msra.mxu0 %v8032_v30 }
  0x55   :  { %705 = vmatpush1.bf16.msra.mxu1 %v7228_v31  ;;  %665 = vmatprep.subr.bf16.mxu0 %v8035_v32  ;;  %v8165_v31 = vld [vmem:[#allocation5 + $0xa0] ss:$24 sps:$4 sm:$0xff]  }
  0x56   :  { %706 = vmatprep.subr.bf16.mxu1 %v7231_v33  ;;  %v8168_v33 = vld [vmem:[#allocation5 + $0xd4] ss:$24 sps:$4 sm:$0xff]  }
  0x58   :  { %666 = vmatpush1.bf16.msra.mxu0 %v8038_v34 }
  0x59   :  { %707 = vmatpush1.bf16.msra.mxu1 %v7234_v35  ;;  %667 = vmatprep.subr.bf16.mxu0 %v8041_v37  ;;  %v8240_v35 = vld [vmem:[#allocation5 + $0x284] ss:$24 sps:$4 sm:$0xff]  }
  0x5a   :  { %708 = vmatprep.subr.bf16.mxu1 %v7237_v38  ;;  %v8248_v38 = vld [vmem:[#allocation5 + $0x2b4] ss:$24 sps:$4 sm:$0xff]  }
  0x5c   :  { %668 = vmatpush1.bf16.msra.mxu0 %v8044_v39 }
  0x5d   :  { %709 = vmatpush1.bf16.msra.mxu1 %v8050_v41  ;;  %669 = vmatprep.subr.bf16.mxu0 %v8052_v42 }
  0x5e   :  { %710 = vmatprep.subr.bf16.mxu1 %v8055_v43 }
  0x60   :  { %670 = vmatpush1.bf16.msra.mxu0 %v8057_v44 }
  0x61   :  { %711 = vmatpush1.bf16.msra.mxu1 %v8059_v45  ;;  %671 = vmatprep.subr.bf16.mxu0 %v8066_v47 }
  0x62   :  { %712 = vmatprep.subr.bf16.mxu1 %v8070_v48 }
  0x64   :  { %672 = vmatpush1.bf16.msra.mxu0 %v8075_v50 }
  0x65   :  { %713 = vmatpush1.bf16.msra.mxu1 %v8080_v52  ;;  %673 = vmatprep.subr.bf16.mxu0 %v8084_v53 }
  0x66   :  { %714 = vmatprep.subr.bf16.mxu1 %v8086_v54 }
  0x68   :  { %674 = vmatpush1.bf16.msra.mxu0 %v8088_v56 }
  0x69   :  { %715 = vmatpush1.bf16.msra.mxu1 %v8092_v57  ;;  %675 = vmatprep.subr.bf16.mxu0 %v8096_v58 }
  0x6a   :  { %716 = vmatprep.subr.bf16.mxu1 %v8098_v59 }
  0x6c   :  { %676 = vmatpush1.bf16.msra.mxu0 %v8100_v60 }
  0x6d   :  { %717 = vmatpush1.bf16.msra.mxu1 %v8104_v61  ;;  %677 = vmatprep.subr.bf16.mxu0 %v8108_v62 }
  0x6e   :  { %718 = vmatprep.subr.bf16.mxu1 %v8110_v63 }
  0x70   :  { %678 = vmatpush1.bf16.msra.mxu0 %v8112_v1 }
  0x71   :  { %719 = vmatpush1.bf16.msra.mxu1 %v8119_v5  ;;  %679 = vmatprep.subr.bf16.mxu0 %v8123_v7 }
  0x72   :  { %720 = vmatprep.subr.bf16.mxu1 %v8125_v9 }
  0x74   :  { %680 = vmatpush1.bf16.msra.mxu0 %v8127_v11 }
  0x75   :  { %721 = vmatpush1.bf16.msra.mxu1 %v8132_v15  ;;  %731 = vmatprep.subr.bf16.mxu0 %v8136_v17 }
  0x76   :  { %1452 = vmatprep.subr.bf16.mxu1 %v7989_v0  ;;  %v8160_v0 = vld [vmem:[#allocation5 + $0xa4] ss:$24 sps:$4 sm:$0xff]  }
  0x77   :  { %682 = vmatmul.mubr.bf16.vlgmr.msra.gmra.mrb[0].mxu0 %v8138_v19 }
  0x78   :  { %723 = vmatmul.mubr.bf16.vlgmr.msra.gmra.mrb[0].mxu1 %v8138_v19  ;;  %732 = vmatpush1.bf16.msra.mxu0 %v8140_v21 }
  0x79   :  { %763 = vmatprep.mubr.bf16.mxu0 %v72_v55  ;;  %733 = vmatprep.subr.bf16.mxu0 %v8144_v23  ;;  %v7810_v55 = vld [vmem:[#allocation5 + $0x68] ss:$24 sps:$4 sm:$0xff]  }
  0x7a   :  { %1453 = vmatpush1.bf16.msra.mxu1 %v7992_v2  ;;  %v8173_v2 = vld [vmem:[#allocation5 + $0xd0] ss:$24 sps:$4 sm:$0xff]  }
  0x7b   :  { %1454 = vmatprep.subr.bf16.mxu1 %v7994_v4  ;;  %v8176_v4 = vld [vmem:[#allocation5 + $0x104] ss:$24 sps:$4 sm:$0xff]  }
  0x7c   :  { %734 = vmatpush1.bf16.msra.mxu0 %v8148_v25 }
  0x7d   :  { %735 = vmatprep.subr.bf16.mxu0 %v8152_v27 }
  0x7e   :  { %1455 = vmatpush1.bf16.msra.mxu1 %v7997_v6  ;;  %v8181_v6 = vld [vmem:[#allocation5 + $0x100] ss:$24 sps:$4 sm:$0xff]  }
  0x7f   :  { %1456 = vmatprep.subr.bf16.mxu1 %v8000_v8  ;;  %v8184_v8 = vld [vmem:[#allocation5 + $0x134] ss:$24 sps:$4 sm:$0xff]  }
  0x80   :  { %736 = vmatpush1.bf16.msra.mxu0 %v8157_v29 }
  0x81   :  { %737 = vmatprep.subr.bf16.mxu0 %v8160_v0 }
  0x82   :  { %1457 = vmatpush1.bf16.msra.mxu1 %v8002_v10  ;;  %v8189_v10 = vld [vmem:[#allocation5 + $0x130] ss:$24 sps:$4 sm:$0xff]  }
  0x83   :  { %1458 = vmatprep.subr.bf16.mxu1 %v8005_v12  ;;  %v8192_v12 = vld [vmem:[#allocation5 + $0x164] ss:$24 sps:$4 sm:$0xff]  }
  0x84   :  { %738 = vmatpush1.bf16.msra.mxu0 %v8165_v31 }
  0x85   :  { %739 = vmatprep.subr.bf16.mxu0 %v8168_v33 }
  0x86   :  { %1459 = vmatpush1.bf16.msra.mxu1 %v8008_v14  ;;  %v8197_v14 = vld [vmem:[#allocation5 + $0x160] ss:$24 sps:$4 sm:$0xff]  }
  0x87   :  { %1460 = vmatprep.subr.bf16.mxu1 %v8011_v16  ;;  %v8200_v16 = vld [vmem:[#allocation5 + $0x194] ss:$24 sps:$4 sm:$0xff]  }
  0x88   :  { %740 = vmatpush1.bf16.msra.mxu0 %v8173_v2 }
  0x89   :  { %741 = vmatprep.subr.bf16.mxu0 %v8176_v4 }
  0x8a   :  { %1461 = vmatpush1.bf16.msra.mxu1 %v8014_v18  ;;  %v8205_v18 = vld [vmem:[#allocation5 + $0x190] ss:$24 sps:$4 sm:$0xff]  }
  0x8b   :  { %1462 = vmatprep.subr.bf16.mxu1 %v8017_v20  ;;  %v8208_v20 = vld [vmem:[#allocation5 + $0x1c4] ss:$24 sps:$4 sm:$0xff]  }
  0x8c   :  { %742 = vmatpush1.bf16.msra.mxu0 %v8181_v6 }
  0x8d   :  { %743 = vmatprep.subr.bf16.mxu0 %v8184_v8 }
  0x8e   :  { %1463 = vmatpush1.bf16.msra.mxu1 %v8020_v22  ;;  %v8213_v22 = vld [vmem:[#allocation5 + $0x1c0] ss:$24 sps:$4 sm:$0xff]  }
  0x8f   :  { %1464 = vmatprep.subr.bf16.mxu1 %v8023_v24  ;;  %v8216_v24 = vld [vmem:[#allocation5 + $0x1f4] ss:$24 sps:$4 sm:$0xff]  }
  0x90   :  { %744 = vmatpush1.bf16.msra.mxu0 %v8189_v10 }
  0x91   :  { %745 = vmatprep.subr.bf16.mxu0 %v8192_v12 }
  0x92   :  { %1465 = vmatpush1.bf16.msra.mxu1 %v8026_v26  ;;  %v8221_v26 = vld [vmem:[#allocation5 + $0x1f0] ss:$24 sps:$4 sm:$0xff]  }
  0x93   :  { %1466 = vmatprep.subr.bf16.mxu1 %v8029_v28  ;;  %v8224_v28 = vld [vmem:[#allocation5 + $0x224] ss:$24 sps:$4 sm:$0xff]  }
  0x94   :  { %746 = vmatpush1.bf16.msra.mxu0 %v8197_v14 }
  0x95   :  { %747 = vmatprep.subr.bf16.mxu0 %v8200_v16 }
  0x96   :  { %1467 = vmatpush1.bf16.msra.mxu1 %v8032_v30  ;;  %v8229_v30 = vld [vmem:[#allocation5 + $0x220] ss:$24 sps:$4 sm:$0xff]  }
  0x97   :  { %1468 = vmatprep.subr.bf16.mxu1 %v8035_v32  ;;  %v8232_v32 = vld [vmem:[#allocation5 + $0x254] ss:$24 sps:$4 sm:$0xff]  }
  0x98   :  { %748 = vmatpush1.bf16.msra.mxu0 %v8205_v18 }
  0x99   :  { %749 = vmatprep.subr.bf16.mxu0 %v8208_v20 }
  0x9a   :  { %1469 = vmatpush1.bf16.msra.mxu1 %v8038_v34  ;;  %v8237_v34 = vld [vmem:[#allocation5 + $0x250] ss:$24 sps:$4 sm:$0xff]  }
  0x9b   :  { %1470 = vmatprep.subr.bf16.mxu1 %v8041_v37  ;;  %v8245_v37 = vld [vmem:[#allocation5 + $0x280] ss:$24 sps:$4 sm:$0xff]  }
  0x9c   :  { %750 = vmatpush1.bf16.msra.mxu0 %v8213_v22 }
  0x9d   :  { %751 = vmatprep.subr.bf16.mxu0 %v8216_v24 }
  0x9e   :  { %1471 = vmatpush1.bf16.msra.mxu1 %v8044_v39  ;;  %v8253_v39 = vld [vmem:[#allocation5 + $0x2b0] ss:$24 sps:$4 sm:$0xff]  }
  0x9f   :  { %1472 = vmatprep.subr.bf16.mxu1 %v8052_v42  ;;  %v8256_v42 = vld [vmem:[#allocation5 + $0x2e4] ss:$24 sps:$4 sm:$0xff]  }
  0xa0   :  { %752 = vmatpush1.bf16.msra.mxu0 %v8221_v26 }
  0xa1   :  { %753 = vmatprep.subr.bf16.mxu0 %v8224_v28 }
  0xa2   :  { %1473 = vmatpush1.bf16.msra.mxu1 %v8057_v44  ;;  %v8261_v44 = vld [vmem:[#allocation5 + $0x2e0] ss:$24 sps:$4 sm:$0xff]  }
  0xa3   :  { %1474 = vmatprep.subr.bf16.mxu1 %v8066_v47  ;;  %v7805_v47 = vld [vmem:[#allocation5 + $0xc] ss:$24 sps:$4 sm:$0xff]  }
  0xa4   :  { %754 = vmatpush1.bf16.msra.mxu0 %v8229_v30 }
  0xa5   :  { %755 = vmatprep.subr.bf16.mxu0 %v8232_v32 }
  0xa6   :  { %1475 = vmatpush1.bf16.msra.mxu1 %v8075_v50  ;;  %v7807_v50 = vld [vmem:[#allocation5 + $0x3c] ss:$24 sps:$4 sm:$0xff]  }
  0xa7   :  { %1476 = vmatprep.subr.bf16.mxu1 %v8084_v53  ;;  %v7809_v53 = vld [vmem:[#allocation5 + $0x6c] ss:$24 sps:$4 sm:$0xff]  }
  0xa8   :  { %756 = vmatpush1.bf16.msra.mxu0 %v8237_v34 }
  0xa9   :  { %757 = vmatprep.subr.bf16.mxu0 %v8240_v35 }
  0xaa   :  { %1477 = vmatpush1.bf16.msra.mxu1 %v8088_v56  ;;  %v7811_v56 = vld [vmem:[#allocation5 + $0x9c] ss:$24 sps:$4 sm:$0xff]  }
  0xab   :  { %1478 = vmatprep.subr.bf16.mxu1 %v8096_v58  ;;  %v7812_v58 = vld [vmem:[#allocation5 + $0x98] ss:$24 sps:$4 sm:$0xff]  }
  0xac   :  { %758 = vmatpush1.bf16.msra.mxu0 %v8245_v37 }
  0xad   :  { %759 = vmatprep.subr.bf16.mxu0 %v8248_v38 }
  0xae   :  { %1479 = vmatpush1.bf16.msra.mxu1 %v8100_v60  ;;  %v7813_v60 = vld [vmem:[#allocation5 + $0xcc] ss:$24 sps:$4 sm:$0xff]  }
  0xaf   :  { %1480 = vmatprep.subr.bf16.mxu1 %v8108_v62  ;;  %v7814_v62 = vld [vmem:[#allocation5 + $0xc8] ss:$24 sps:$4 sm:$0xff]  }
  0xb0   :  { %760 = vmatpush1.bf16.msra.mxu0 %v8253_v39 }
  0xb1   :  { %761 = vmatprep.subr.bf16.mxu0 %v8256_v42 }
  0xb2   :  { %1481 = vmatpush1.bf16.msra.mxu1 %v8112_v1  ;;  %v7815_v1 = vld [vmem:[#allocation5 + $0xfc] ss:$24 sps:$4 sm:$0xff]  }
  0xb3   :  { %1482 = vmatprep.subr.bf16.mxu1 %v8123_v7  ;;  %v7816_v7 = vld [vmem:[#allocation5 + $0xf8] ss:$24 sps:$4 sm:$0xff]  }
  0xb4   :  { %762 = vmatpush1.bf16.msra.mxu0 %v8261_v44 }
  0xb5   :  { %1493 = vmatprep.subr.bf16.mxu0 %v7805_v47  ;;  %v7821_v47 = vld [vmem:[#allocation5 + $0x18c] ss:$24 sps:$4 sm:$0xff]  }
  0xb6   :  { %1483 = vmatpush1.bf16.msra.mxu1 %v8127_v11  ;;  %v7817_v11 = vld [vmem:[#allocation5 + $0x12c] ss:$24 sps:$4 sm:$0xff]  }
  0xb7   :  { %1534 = vmatprep.subr.bf16.mxu1 %v8136_v17  ;;  %764 = vmatmul.mubr.bf16.vlgmr.msra.gmra.mrb[4].mxu0 %v8138_v19  ;;  %v7819_v17 = vld [vmem:[#allocation5 + $0x15c] ss:$24 sps:$4 sm:$0xff]   ;;  %v7820_v19 = vld [vmem:[#allocation5 + $0x158] ss:$24 sps:$4 sm:$0xff]  }
  0xb8   :  { %1494 = vmatpush1.bf16.msra.mxu0 %v7806_v49  ;;  %v7822_v49 = vld [vmem:[#allocation5 + $0x188] ss:$24 sps:$4 sm:$0xff]  }
  0xb9   :  { %1495 = vmatprep.subr.bf16.mxu0 %v7807_v50  ;;  %v7823_v50 = vld [vmem:[#allocation5 + $0x1bc] ss:$24 sps:$4 sm:$0xff]  }
  0xbc   :  { %1496 = vmatpush1.bf16.msra.mxu0 %v7808_v51 }
  0xbd   :  { %1497 = vmatprep.subr.bf16.mxu0 %v7809_v53 }
  0xc0   :  { %1498 = vmatpush1.bf16.msra.mxu0 %v7810_v55 }
  0xc1   :  { %1499 = vmatprep.subr.bf16.mxu0 %v7811_v56 }
  0xc4   :  { %1500 = vmatpush1.bf16.msra.mxu0 %v7812_v58  ;;  %v57_v58 = vld [vmem:[#allocation2] ss:$8 sm:$0xf] }
  0xc5   :  { %1501 = vmatprep.subr.bf16.mxu0 %v7813_v60  ;;  %v58_v60 = vld [vmem:[#allocation2] ss:$8 sm:$0x30] }
  0xc8   :  { %1502 = vmatpush1.bf16.msra.mxu0 %v7814_v62  ;;  %v59_v62 = vor.u32 %v58_v60, %v57_v58 }
  0xc9   :  { %1503 = vmatprep.subr.bf16.mxu0 %v7815_v1 }
  0xcc   :  { %1504 = vmatpush1.bf16.msra.mxu0 %v7816_v7 }
  0xcd   :  { %1505 = vmatprep.subr.bf16.mxu0 %v7817_v11  ;;  %v8291_v11 = vld [vmem:[#allocation7] ss:$2 sm:$0x3f] }
  0xd0   :  { %1506 = vmatpush1.bf16.msra.mxu0 %v7818_v13 }
  0xd1   :  { %1507 = vmatprep.subr.bf16.mxu0 %v7819_v17 }
  0xd4   :  { %1508 = vmatpush1.bf16.msra.mxu0 %v7820_v19 }
  0xd5   :  { %1509 = vmatprep.subr.bf16.mxu0 %v7821_v47  ;;  %v812_v47 = vsub.s32 4, %v8047_v40 }
  0xd8   :  { %1510 = vmatpush1.bf16.msra.mxu0 %v7822_v49  ;;  %v816_v49 = vsub.s32 5, %v8047_v40 }
  0xd9   :  { %1511 = vmatprep.subr.bf16.mxu0 %v7823_v50 }
  0xdc   :  { %1512 = vmatpush1.bf16.msra.mxu0 %v8050_v41  ;;  %v7926_v41 = vmov 1966171168  }
  0xdd   :  { %1513 = vmatprep.subr.bf16.mxu0 %v8055_v43  ;;  %v779_v43 = vunpack.c.l.s4 %v7926_v41  ;;  %v8297_v41 = vrot.slane %v8291_v11, %v812_v47 }
  0xdf   :  { %9745 = vst [vmem:[#allocation12_spill] sm:$0xff] %v8297_v41 }
  0xe0   :  { %1514 = vmatpush1.bf16.msra.mxu0 %v8059_v45  ;;  %v780_v45 = vunpack.c.0.s8 %v779_v43  ;;  %v8300_v43 = vrot.slane %v8291_v11, %v816_v49 }
  0xe1   :  { %1515 = vmatprep.subr.bf16.mxu0 %v8070_v48 }
  0xe2   :  { %v8286_v48 = vsub.s32 %v780_v45, %v8047_v40 }
  0xe4   :  { %1516 = vmatpush1.bf16.msra.mxu0 %v8080_v52 }
  0xe5   :  { %1517 = vmatprep.subr.bf16.mxu0 %v8086_v54 }
  0xe8   :  { %1518 = vmatpush1.bf16.msra.mxu0 %v8092_v57 }
  0xe9   :  { %1519 = vmatprep.subr.bf16.mxu0 %v8098_v59 }
  0xec   :  { %1520 = vmatpush1.bf16.msra.mxu0 %v8104_v61 }
  0xed   :  { %1521 = vmatprep.subr.bf16.mxu0 %v8110_v63 }
  0xf0   :  { %1522 = vmatpush1.bf16.msra.mxu0 %v8119_v5 }
  0xf1   :  { %1523 = vmatprep.subr.bf16.mxu0 %v8125_v9 }
  0xf4   :  { %1524 = vmatpush1.bf16.msra.mxu0 %v8132_v15 }
 0x14a   :  { %v683_v52 = vpop.f32.mrb[0].mxu0 }
 0x14b   :  { %v724_v54 = vpop.f32.mrb[0].mxu1  ;;  %v685_v57 = vpop.f32.mrb[1].mxu0 }
 0x14c   :  { %v726_v59 = vpop.f32.mrb[1].mxu1  ;;  %v776_v51 = vcombine.low %v683_v52, %v685_v57  ;;  %v687_v53 = vpop.f32.mrb[2].mxu0 }
 0x14d   :  { %v777_v61 = vcombine.low %v724_v54, %v726_v59  ;;  %v728_v63 = vpop.f32.mrb[2].mxu1  ;;  %v688_v55 = vpop.f32.mrb[3].mxu0 }
 0x14e   :  { %v729_v5 = vpop.f32.mrb[3].mxu1  ;;  %v784_v9 = vrot.slane %v776_v51, %v8286_v48  ;;  %v842_v63 = vrot.slane %v59_v62, 4 }
 0x14f   :  { %v791_v15 = vrot.slane %v777_v61, %v8286_v48 }
 0x151   :  { %v792_v56 = vcombine.low %v784_v9, %v791_v15 }
 0x153   :  { %v799_v1 = vrot.slane %v792_v56, %v8286_v48 }
 0x155   :  { %v801_v7 = vadd.f32 %v799_v1, %v59_v62  ;;  %v7824_v1 = vld [vmem:[%s9657_s1] sm:$0x3]  ;;  %s7927_s1 = smov [#allocation8]  }
 0x156   :  { %s6388_s28 = sshll.u32 %s7927_s1, 4  ;;  %s6389_s28 = int_to_ptr.vmem [resolvable:$true] %s6388_s28 }
 0x157   :  { %v802_v13 = vadd.f32 %v801_v7, %v8291_v11  ;;  %s7893_s29 = scalar_lea.vmem %s6389_s28, 256  ;;  %p7898_p11 = scmp.lt.s32.totalorder %s6389_s28, %s6389_s28 }
 0x158   :  { %p7894_p10 = scmp.ne.s32.totalorder %s6389_s28, %s7893_s29  ;;  %p7899_p12 = scmp.lt.s32.totalorder %s7893_s29, %s7893_s29 }
 0x159   :  { %v6494_v17 = vmul.f32 -1.442695, %v802_v13 }
 0x15a   :  { %p7900_p13 = por %p7899_p12, %p7898_p11 }
 0x15b   :  { %7757 = vpow2.f32 %v6494_v17 }
 0x15c   :  { %p7901_p0 = pnand %p7900_p13, %p7894_p10 }
 0x165   :  { %v7758_v19 = vpop.eup %7757 }
 0x166   :  { %v806_v50 = vadd.f32 1.0, %v7758_v19 }
 0x168   :  { %7759 = vrcp.f32 %v806_v50  ;;  %v8450_v50 = vld [vmem:[#allocation5 + $0x184] ss:$24 sps:$4 sm:$0xff]  }
 0x172   :  { %v7760_v55 = vpop.eup %7759 }
 0x173   :  { %v847_v15 = vrot.slane %v7760_v55, 2 }
 0x175   :  { %v849_v56 = vsub.f32 1.0, %v847_v15  ;;  %v851_v7 = vmul.f32 %v7824_v1, %v847_v15  ;;  %v8490_v15 = vld [vmem:[#allocation5 + $0x21c] ss:$24 sps:$4 sm:$0xff]   ;;  %v8502_v1 = vld [vmem:[#allocation5 + $0x248] ss:$24 sps:$4 sm:$0xff]  }
 0x176   :  { %9766 = vst [vmem:[#allocation31_spill] sm:$0xff] %v8490_v15  ;;  %9768 = vst [vmem:[#allocation33_spill] sm:$0xff] %v8502_v1 }
 0x18a   :  { %v765_v45 = vpop.f32.mrb[4].mxu0 }
 0x18b   :  { %v820_v52 = vadd.f32 %v8297_v41, %v765_v45  ;;  %v767_v54 = vpop.f32.mrb[5].mxu0  ;;  %v8452_v45 = vld [vmem:[#allocation5 + $0x180] ss:$24 sps:$4 sm:$0xff]  }
 0x18c   :  { %v821_v57 = vadd.f32 %v8300_v43, %v767_v54  ;;  %v769_v59 = vpop.f32.mrb[6].mxu0  ;;  %v8457_v54 = vld [vmem:[#allocation5 + $0x188] ss:$24 sps:$4 sm:$0xff]  }
 0x18d   :  { %v770_v51 = vpop.f32.mrb[7].mxu0  ;;  %9761 = vst [vmem:[#allocation26_spill] sm:$0xff] %v8457_v54  ;;  %v8464_v59 = vld [vmem:[#allocation5 + $0x1b0] ss:$24 sps:$4 sm:$0xff]  }
 0x18e   :  { %v824_v61 = vcombine.low %v820_v52, %v821_v57  ;;  %v8454_v52 = vld [vmem:[#allocation5 + $0x18c] ss:$24 sps:$4 sm:$0xff]   ;;  %v8466_v51 = vld [vmem:[#allocation5 + $0x1bc] ss:$24 sps:$4 sm:$0xff]  }
 0x18f   :  { %9760 = vst [vmem:[#allocation25_spill] sm:$0xff] %v8454_v52  ;;  %v8462_v57 = vld [vmem:[#allocation5 + $0x1b4] ss:$24 sps:$4 sm:$0xff]   ;;  %9762 = vst [vmem:[#allocation27_spill] sm:$0xff] %v8466_v51 }
 0x190   :  { %v831_v53 = vrot.slane %v824_v61, %v8286_v48  ;;  %v8469_v61 = vld [vmem:[#allocation5 + $0x1b8] ss:$24 sps:$4 sm:$0xff]  }
 0x191   :  { %9763 = vst [vmem:[#allocation28_spill] sm:$0xff] %v8469_v61 }
 0x192   :  { %v838_v40 = vrot.slane %v831_v53, %v8286_v48  ;;  %v8474_v53 = vld [vmem:[#allocation5 + $0x1e4] ss:$24 sps:$4 sm:$0xff]  }
 0x194   :  { %v840_v5 = vmul.f32 %v7760_v55, %v838_v40  ;;  %v8476_v40 = vld [vmem:[#allocation5 + $0x1e0] ss:$24 sps:$4 sm:$0xff]  }
 0x195   :  { %v8481_v55 = vld [vmem:[#allocation5 + $0x1e8] ss:$24 sps:$4 sm:$0xff]  }
 0x196   :  { %v844_v9 = vadd.f32 %v842_v63, %v840_v5  ;;  %v8478_v63 = vld [vmem:[#allocation5 + $0x1ec] ss:$24 sps:$4 sm:$0xff]   ;;  %9765 = vst [vmem:[#allocation30_spill] sm:$0xff] %v8481_v55 }
 0x197   :  { %9764 = vst [vmem:[#allocation29_spill] sm:$0xff] %v8478_v63  ;;  %v8486_v5 = vld [vmem:[#allocation5 + $0x214] ss:$24 sps:$4 sm:$0xff]  }
 0x198   :  { %7761 = vtanh.f32 %v844_v9  ;;  %v8488_v9 = vld [vmem:[#allocation5 + $0x210] ss:$24 sps:$4 sm:$0xff]  }
 0x1a2   :  { %v7762_v58 = vpop.eup %7761 }
 0x1a3   :  { %v850_v60 = vmul.f32 %v7762_v58, %v849_v56  ;;  %v8493_v56 = vld [vmem:[#allocation5 + $0x218] ss:$24 sps:$4 sm:$0xff]  }
 0x1a4   :  { %9767 = vst [vmem:[#allocation32_spill] sm:$0xff] %v8493_v56  ;;  %v8497_v58 = vld [vmem:[#allocation5 + $0x240] ss:$24 sps:$4 sm:$0xff]  }
 0x1a5   :  { %v8314_v17 = vadd.f32 %v851_v7, %v850_v60  ;;  %v8499_v60 = vld [vmem:[#allocation5 + $0x244] ss:$24 sps:$4 sm:$0xff]  }
 0x1a6   :  { %v8504_v7 = vld [vmem:[#allocation5 + $0x24c] ss:$24 sps:$4 sm:$0xff]  }
 0x1a7   :  { %857 = vst.msk [vmem:[#allocation8] ss:$8 sm:$0x3] %vm8310_vm0, %v8314_v17  ;;  %v871_v62 = vrot.slane %v8314_v17, %v8062_v46  ;;  %v867_v19 = vrot.slane %v8314_v17, %v8115_v3  ;;  %9769 = vst [vmem:[#allocation34_spill] sm:$0xff] %v8504_v7 }
 0x1a9   :  { %v875_v47 = vpack.c.bf16 %v871_v62, %v871_v62  ;;  %v874_v49 = vpack.c.bf16 %v867_v19, %v867_v19  ;;  %v8506_v62 = vld [vmem:[#allocation5 + $0x274] ss:$24 sps:$4 sm:$0xff]  }
 0x1aa   :  { %v8509_v19 = vld [vmem:[#allocation5 + $0x27c] ss:$24 sps:$4 sm:$0xff]  }
 0x1ab   :  { %1484 = vmatprep.mubr.bf16.mxu1 %v875_v47  ;;  %1525 = vmatprep.mubr.bf16.mxu0 %v875_v47  ;;  %9770 = vst [vmem:[#allocation35_spill] sm:$0xff] %v8509_v19 }
 0x1ac   :  { %1485 = vmatmul.mubr.bf16.vlgmr.msra.gmra.mrb[4].mxu1 %v874_v49  ;;  %1526 = vmatmul.mubr.bf16.vlgmr.msra.gmra.mrb[8].mxu0 %v874_v49 }
 0x1ad   :  { %1535 = vmatpush1.bf16.msra.mxu1 %v8140_v21  ;;  %1566 = vmatprep.mubr.bf16.mxu1 %v875_v47  ;;  %v8356_v21 = vld [vmem:[#allocation5 + $0x4] ss:$24 sps:$4 sm:$0xff]   ;;  %v8513_v47 = vld [vmem:[#allocation5 + $0x270] ss:$24 sps:$4 sm:$0xff]  }
 0x1ae   :  { %1536 = vmatprep.subr.bf16.mxu1 %v8144_v23  ;;  %v8358_v23 = vld [vmem:[#allocation5 + $0x8] ss:$24 sps:$4 sm:$0xff]   ;;  %2241 = vmatprep.subr.bf16.mxu0 %v8356_v21 }
 0x1af   :  { %2242 = vmatpush1.bf16.msra.mxu0 %v8354_v36 }
 0x1b1   :  { %1537 = vmatpush1.bf16.msra.mxu1 %v8148_v25  ;;  %v8360_v25 = vld [vmem:[#allocation5 + $0xc] ss:$24 sps:$4 sm:$0xff]  }
 0x1b2   :  { %1538 = vmatprep.subr.bf16.mxu1 %v8152_v27  ;;  %v8362_v27 = vld [vmem:[#allocation5 + $0x34] ss:$24 sps:$4 sm:$0xff]  }
 0x1b3   :  { %2243 = vmatprep.subr.bf16.mxu0 %v8362_v27 }
 0x1b5   :  { %1539 = vmatpush1.bf16.msra.mxu1 %v8157_v29  ;;  %v8365_v29 = vld [vmem:[#allocation5 + $0x3c] ss:$24 sps:$4 sm:$0xff]  }
 0x1b6   :  { %1540 = vmatprep.subr.bf16.mxu1 %v8160_v0  ;;  %v8369_v0 = vld [vmem:[#allocation5 + $0x30] ss:$24 sps:$4 sm:$0xff]  }
 0x1b7   :  { %2244 = vmatpush1.bf16.msra.mxu0 %v8369_v0 }
 0x1b9   :  { %1541 = vmatpush1.bf16.msra.mxu1 %v8165_v31  ;;  %v8373_v31 = vld [vmem:[#allocation5 + $0x38] ss:$24 sps:$4 sm:$0xff]  }
 0x1ba   :  { %1542 = vmatprep.subr.bf16.mxu1 %v8168_v33  ;;  %v8375_v33 = vld [vmem:[#allocation5 + $0x64] ss:$24 sps:$4 sm:$0xff]  }
 0x1bb   :  { %2245 = vmatprep.subr.bf16.mxu0 %v8375_v33 }
 0x1bd   :  { %1543 = vmatpush1.bf16.msra.mxu1 %v8173_v2  ;;  %v8378_v2 = vld [vmem:[#allocation5 + $0x6c] ss:$24 sps:$4 sm:$0xff]  }
 0x1be   :  { %1544 = vmatprep.subr.bf16.mxu1 %v8176_v4  ;;  %9748 = vst [vmem:[#allocation13_spill] sm:$0xff] %v8378_v2  ;;  %v8381_v4 = vld [vmem:[#allocation5 + $0x60] ss:$24 sps:$4 sm:$0xff]  }
 0x1bf   :  { %2246 = vmatpush1.bf16.msra.mxu0 %v8381_v4 }
 0x1c1   :  { %1545 = vmatpush1.bf16.msra.mxu1 %v8181_v6  ;;  %v8385_v6 = vld [vmem:[#allocation5 + $0x68] ss:$24 sps:$4 sm:$0xff]  }
 0x1c2   :  { %1546 = vmatprep.subr.bf16.mxu1 %v8184_v8  ;;  %9749 = vst [vmem:[#allocation14_spill] sm:$0xff] %v8385_v6  ;;  %v8387_v8 = vld [vmem:[#allocation5 + $0x94] ss:$24 sps:$4 sm:$0xff]  }
 0x1c3   :  { %2247 = vmatprep.subr.bf16.mxu0 %v8387_v8 }
 0x1c5   :  { %1547 = vmatpush1.bf16.msra.mxu1 %v8189_v10  ;;  %v8390_v10 = vld [vmem:[#allocation5 + $0x9c] ss:$24 sps:$4 sm:$0xff]  }
 0x1c6   :  { %1548 = vmatprep.subr.bf16.mxu1 %v8192_v12  ;;  %9750 = vst [vmem:[#allocation15_spill] sm:$0xff] %v8390_v10  ;;  %v8393_v12 = vld [vmem:[#allocation5 + $0x90] ss:$24 sps:$4 sm:$0xff]  }
 0x1c7   :  { %2248 = vmatpush1.bf16.msra.mxu0 %v8393_v12 }
 0x1c9   :  { %1549 = vmatpush1.bf16.msra.mxu1 %v8197_v14  ;;  %v8397_v14 = vld [vmem:[#allocation5 + $0x98] ss:$24 sps:$4 sm:$0xff]  }
 0x1ca   :  { %1550 = vmatprep.subr.bf16.mxu1 %v8200_v16  ;;  %9751 = vst [vmem:[#allocation16_spill] sm:$0xff] %v8397_v14  ;;  %v8399_v16 = vld [vmem:[#allocation5 + $0xc4] ss:$24 sps:$4 sm:$0xff]  }
 0x1cb   :  { %2249 = vmatprep.subr.bf16.mxu0 %v8399_v16 }
 0x1cd   :  { %1551 = vmatpush1.bf16.msra.mxu1 %v8205_v18  ;;  %v8402_v18 = vld [vmem:[#allocation5 + $0xcc] ss:$24 sps:$4 sm:$0xff]  }
 0x1ce   :  { %1552 = vmatprep.subr.bf16.mxu1 %v8208_v20  ;;  %9752 = vst [vmem:[#allocation17_spill] sm:$0xff] %v8402_v18  ;;  %v8405_v20 = vld [vmem:[#allocation5 + $0xc0] ss:$24 sps:$4 sm:$0xff]  }
 0x1cf   :  { %2250 = vmatpush1.bf16.msra.mxu0 %v8405_v20 }
 0x1d1   :  { %1553 = vmatpush1.bf16.msra.mxu1 %v8213_v22  ;;  %v8409_v22 = vld [vmem:[#allocation5 + $0xc8] ss:$24 sps:$4 sm:$0xff]  }
 0x1d2   :  { %1554 = vmatprep.subr.bf16.mxu1 %v8216_v24  ;;  %9753 = vst [vmem:[#allocation18_spill] sm:$0xff] %v8409_v22  ;;  %v8411_v24 = vld [vmem:[#allocation5 + $0xf4] ss:$24 sps:$4 sm:$0xff]  }
 0x1d3   :  { %2251 = vmatprep.subr.bf16.mxu0 %v8411_v24 }
 0x1d5   :  { %1555 = vmatpush1.bf16.msra.mxu1 %v8221_v26  ;;  %v8414_v26 = vld [vmem:[#allocation5 + $0xfc] ss:$24 sps:$4 sm:$0xff]  }
 0x1d6   :  { %1556 = vmatprep.subr.bf16.mxu1 %v8224_v28  ;;  %9754 = vst [vmem:[#allocation19_spill] sm:$0xff] %v8414_v26  ;;  %v8417_v28 = vld [vmem:[#allocation5 + $0xf0] ss:$24 sps:$4 sm:$0xff]  }
 0x1d7   :  { %2252 = vmatpush1.bf16.msra.mxu0 %v8417_v28 }
 0x1d9   :  { %1557 = vmatpush1.bf16.msra.mxu1 %v8229_v30  ;;  %v8421_v30 = vld [vmem:[#allocation5 + $0xf8] ss:$24 sps:$4 sm:$0xff]  }
 0x1da   :  { %1558 = vmatprep.subr.bf16.mxu1 %v8232_v32  ;;  %9755 = vst [vmem:[#allocation20_spill] sm:$0xff] %v8421_v30  ;;  %v8423_v32 = vld [vmem:[#allocation5 + $0x124] ss:$24 sps:$4 sm:$0xff]  }
 0x1db   :  { %2253 = vmatprep.subr.bf16.mxu0 %v8423_v32 }
 0x1dd   :  { %1559 = vmatpush1.bf16.msra.mxu1 %v8237_v34  ;;  %v8426_v34 = vld [vmem:[#allocation5 + $0x12c] ss:$24 sps:$4 sm:$0xff]  }
 0x1de   :  { %1560 = vmatprep.subr.bf16.mxu1 %v8240_v35  ;;  %9756 = vst [vmem:[#allocation21_spill] sm:$0xff] %v8426_v34  ;;  %v8429_v35 = vld [vmem:[#allocation5 + $0x120] ss:$24 sps:$4 sm:$0xff]  }
 0x1df   :  { %2254 = vmatpush1.bf16.msra.mxu0 %v8429_v35 }
 0x1e1   :  { %1561 = vmatpush1.bf16.msra.mxu1 %v8245_v37  ;;  %v8433_v37 = vld [vmem:[#allocation5 + $0x128] ss:$24 sps:$4 sm:$0xff]  }
 0x1e2   :  { %1562 = vmatprep.subr.bf16.mxu1 %v8248_v38  ;;  %9757 = vst [vmem:[#allocation22_spill] sm:$0xff] %v8433_v37  ;;  %v8435_v38 = vld [vmem:[#allocation5 + $0x154] ss:$24 sps:$4 sm:$0xff]  }
 0x1e3   :  { %2255 = vmatprep.subr.bf16.mxu0 %v8435_v38 }
 0x1e5   :  { %1563 = vmatpush1.bf16.msra.mxu1 %v8253_v39  ;;  %v8438_v39 = vld [vmem:[#allocation5 + $0x15c] ss:$24 sps:$4 sm:$0xff]  }
 0x1e6   :  { %1564 = vmatprep.subr.bf16.mxu1 %v8256_v42  ;;  %9758 = vst [vmem:[#allocation23_spill] sm:$0xff] %v8438_v39  ;;  %v8441_v42 = vld [vmem:[#allocation5 + $0x150] ss:$24 sps:$4 sm:$0xff]  }
 0x1e7   :  { %2256 = vmatpush1.bf16.msra.mxu0 %v8441_v42 }
 0x1e8   :  { %2257 = vmatprep.subr.bf16.mxu0 %v8450_v50 }
 0x1e9   :  { %1565 = vmatpush1.bf16.msra.mxu1 %v8261_v44  ;;  %v8445_v44 = vld [vmem:[#allocation5 + $0x158] ss:$24 sps:$4 sm:$0xff]  }
 0x1ea   :  { %2282 = vmatprep.subr.bf16.mxu1 %v8360_v25  ;;  %9759 = vst [vmem:[#allocation24_spill] sm:$0xff] %v8445_v44 }
 0x1eb   :  { %2258 = vmatpush1.bf16.msra.mxu0 %v8452_v45 }
 0x1ec   :  { %1567 = vmatmul.mubr.bf16.vlgmr.msra.gmra.mrb[8].mxu1 %v874_v49  ;;  %2259 = vmatprep.subr.bf16.mxu0 %v8462_v57  ;;  %v8517_v49 = vld [vmem:[#allocation5 + $0x278] ss:$24 sps:$4 sm:$0xff]  }
 0x1ed   :  { %2283 = vmatpush1.bf16.msra.mxu1 %v8358_v23  ;;  %9771 = vst [vmem:[#allocation36_spill] sm:$0xff] %v8517_v49 }
 0x1ee   :  { %2284 = vmatprep.subr.bf16.mxu1 %v8365_v29 }
 0x1ef   :  { %2260 = vmatpush1.bf16.msra.mxu0 %v8464_v59 }
 0x1f0   :  { %2261 = vmatprep.subr.bf16.mxu0 %v8474_v53 }
 0x1f1   :  { %2285 = vmatpush1.bf16.msra.mxu1 %v8373_v31 }
 0x1f2   :  { %2286 = vmatprep.subr.bf16.mxu1 %v8378_v2 }
 0x1f3   :  { %2262 = vmatpush1.bf16.msra.mxu0 %v8476_v40 }
 0x1f4   :  { %2263 = vmatprep.subr.bf16.mxu0 %v8486_v5 }
 0x1f5   :  { %2287 = vmatpush1.bf16.msra.mxu1 %v8385_v6 }
 0x1f6   :  { %2288 = vmatprep.subr.bf16.mxu1 %v8390_v10 }
 0x1f7   :  { %2264 = vmatpush1.bf16.msra.mxu0 %v8488_v9 }
 0x1f8   :  { %2265 = vmatprep.subr.bf16.mxu0 %v8499_v60 }
 0x1f9   :  { %2289 = vmatpush1.bf16.msra.mxu1 %v8397_v14 }
 0x1fa   :  { %2290 = vmatprep.subr.bf16.mxu1 %v8402_v18  ;;  %v861_v18 = vld [vmem:[#allocation2 + $0x1] ss:$8 sm:$0x30] }
 0x1fb   :  { %2266 = vmatpush1.bf16.msra.mxu0 %v8497_v58 }
 0x1fc   :  { %2267 = vmatprep.subr.bf16.mxu0 %v8506_v62 }
 0x1fd   :  { %2291 = vmatpush1.bf16.msra.mxu1 %v8409_v22  ;;  %v860_v22 = vld [vmem:[#allocation2 + $0x1] ss:$8 sm:$0xf] }
 0x1fe   :  { %2292 = vmatprep.subr.bf16.mxu1 %v8414_v26 }
 0x1ff   :  { %2268 = vmatpush1.bf16.msra.mxu0 %v8513_v47 }
 0x201   :  { %2293 = vmatpush1.bf16.msra.mxu1 %v8421_v30 }
 0x202   :  { %2294 = vmatprep.subr.bf16.mxu1 %v8426_v34 }
 0x205   :  { %2295 = vmatpush1.bf16.msra.mxu1 %v8433_v37 }
 0x206   :  { %2296 = vmatprep.subr.bf16.mxu1 %v8438_v39 }
 0x209   :  { %2297 = vmatpush1.bf16.msra.mxu1 %v8445_v44 }
 0x20a   :  { %2298 = vmatprep.subr.bf16.mxu1 %v8454_v52 }
 0x20d   :  { %2299 = vmatpush1.bf16.msra.mxu1 %v8457_v54 }
 0x20e   :  { %2300 = vmatprep.subr.bf16.mxu1 %v8466_v51 }
 0x211   :  { %2301 = vmatpush1.bf16.msra.mxu1 %v8469_v61  ;;  %v8541_v61 = vld [vmem:[#allocation5 + $0x2d8] ss:$24 sps:$4 sm:$0xff]  }
 0x212   :  { %2302 = vmatprep.subr.bf16.mxu1 %v8478_v63  ;;  %v8534_v63 = vld [vmem:[#allocation5 + $0x2dc] ss:$24 sps:$4 sm:$0xff]   ;;  %9775 = vst [vmem:[#allocation40_spill] sm:$0xff] %v8541_v61 }
 0x213   :  { %9774 = vst [vmem:[#allocation39_spill] sm:$0xff] %v8534_v63 }
 0x215   :  { %2303 = vmatpush1.bf16.msra.mxu1 %v8481_v55  ;;  %v8525_v55 = vld [vmem:[#allocation5 + $0x2a0] ss:$24 sps:$4 sm:$0xff]  }
 0x216   :  { %2304 = vmatprep.subr.bf16.mxu1 %v8490_v15  ;;  %v8522_v15 = vld [vmem:[#allocation5 + $0x2ac] ss:$24 sps:$4 sm:$0xff]  }
 0x217   :  { %9772 = vst [vmem:[#allocation37_spill] sm:$0xff] %v8522_v15 }
 0x219   :  { %2305 = vmatpush1.bf16.msra.mxu1 %v8493_v56  ;;  %v8519_v56 = vld [vmem:[#allocation5 + $0x2a4] ss:$24 sps:$4 sm:$0xff]  }
 0x21a   :  { %2306 = vmatprep.subr.bf16.mxu1 %v8504_v7  ;;  %2269 = vmatprep.subr.bf16.mxu0 %v8519_v56  ;;  %v8529_v7 = vld [vmem:[#allocation5 + $0x2a8] ss:$24 sps:$4 sm:$0xff]  }
 0x21b   :  { %9773 = vst [vmem:[#allocation38_spill] sm:$0xff] %v8529_v7  ;;  %2270 = vmatpush1.bf16.msra.mxu0 %v8525_v55 }
 0x21d   :  { %2307 = vmatpush1.bf16.msra.mxu1 %v8502_v1  ;;  %v8531_v1 = vld [vmem:[#allocation5 + $0x2d4] ss:$24 sps:$4 sm:$0xff]  }
 0x21e   :  { %2308 = vmatprep.subr.bf16.mxu1 %v8509_v19  ;;  %v8537_v19 = vld [vmem:[#allocation5 + $0x2d0] ss:$24 sps:$4 sm:$0xff]   ;;  %2271 = vmatprep.subr.bf16.mxu0 %v8531_v1 }
 0x21f   :  { %2272 = vmatpush1.bf16.msra.mxu0 %v8537_v19 }
 0x221   :  { %2309 = vmatpush1.bf16.msra.mxu1 %v8517_v49  ;;  %v8546_v49 = vld [vmem:[#allocation5 + $0x14] ss:$24 sps:$4 sm:$0xff]  }
 0x222   :  { %2310 = vmatprep.subr.bf16.mxu1 %v8522_v15  ;;  %2323 = vmatprep.subr.bf16.mxu0 %v8546_v49 }
 0x225   :  { %2311 = vmatpush1.bf16.msra.mxu1 %v8529_v7 }
 0x226   :  { %2312 = vmatprep.subr.bf16.mxu1 %v8534_v63 }
 0x229   :  { %2313 = vmatpush1.bf16.msra.mxu1 %v8541_v61 }
 0x22a   :  { %3030 = vmatprep.subr.bf16.mxu1 %v8356_v21  ;;  %v862_v21 = vor.u32 %v861_v18, %v860_v22 }
 0x22c   :  { %v1634_v22 = vrot.slane %v862_v21, 4 }
 0x27f   :  { %v1486_v15 = vpop.f32.mrb[4].mxu1  ;;  %v1527_v51 = vpop.f32.mrb[8].mxu0 }
 0x280   :  { %v1488_v54 = vpop.f32.mrb[5].mxu1  ;;  %v1529_v7 = vpop.f32.mrb[9].mxu0 }
 0x281   :  { %v1579_v52 = vcombine.low %v1486_v15, %v1488_v54  ;;  %v1580_v44 = vcombine.low %v1527_v51, %v1529_v7  ;;  %v1490_v39 = vpop.f32.mrb[6].mxu1  ;;  %v1531_v37 = vpop.f32.mrb[10].mxu0 }
 0x282   :  { %v1491_v34 = vpop.f32.mrb[7].mxu1  ;;  %v1532_v63 = vpop.f32.mrb[11].mxu0 }
 0x283   :  { %v1587_v30 = vrot.slane %v1579_v52, %v8286_v48  ;;  %v1594_v61 = vrot.slane %v1580_v44, %v8286_v48 }
 0x285   :  { %v1595_v26 = vcombine.low %v1587_v30, %v1594_v61 }
 0x287   :  { %v1602_v14 = vrot.slane %v1595_v26, %v8286_v48 }
 0x289   :  { %v1604_v10 = vadd.f32 %v1602_v14, %v862_v21 }
 0x28b   :  { %v1605_v6 = vadd.f32 %v1604_v10, %v8291_v11 }
 0x28d   :  { %v6591_v2 = vmul.f32 -1.442695, %v1605_v6 }
 0x28f   :  { %7763 = vpow2.f32 %v6591_v2 }
 0x299   :  { %v7764_v54 = vpop.eup %7763 }
 0x29a   :  { %v1609_v39 = vadd.f32 1.0, %v7764_v54 }
 0x29c   :  { %7765 = vrcp.f32 %v1609_v39 }
 0x2a6   :  { %v7766_v10 = vpop.eup %7765 }
 0x2a7   :  { %v1639_v26 = vrot.slane %v7766_v10, 2 }
 0x2a9   :  { %v1641_v63 = vsub.f32 1.0, %v1639_v26  ;;  %v1643_v54 = vmul.f32 %v1639_v26, %v8314_v17  ;;  %v8577_v17 = vld [vmem:[#allocation5 + $0x40] ss:$24 sps:$4 sm:$0xff]   ;;  %v9792_v26 = vld [vmem:[#allocation29_spill] sm:$0xff] }
 0x2bf   :  { %v1568_v34 = vpop.f32.mrb[8].mxu1 }
 0x2c0   :  { %v1612_v37 = vadd.f32 %v1568_v34, %v8297_v41  ;;  %v1570_v52 = vpop.f32.mrb[9].mxu1 }
 0x2c1   :  { %v1613_v44 = vadd.f32 %v1570_v52, %v8300_v43  ;;  %v1572_v30 = vpop.f32.mrb[10].mxu1  ;;  %v8568_v52 = vld [vmem:[#allocation5 + $0x10] ss:$24 sps:$4 sm:$0xff]  }
 0x2c2   :  { %v1573_v51 = vpop.f32.mrb[11].mxu1  ;;  %v8572_v30 = vld [vmem:[#allocation5 + $0x44] ss:$24 sps:$4 sm:$0xff]  }
 0x2c3   :  { %v1616_v61 = vcombine.low %v1612_v37, %v1613_v44  ;;  %v8580_v51 = vld [vmem:[#allocation5 + $0x74] ss:$24 sps:$4 sm:$0xff]  }
 0x2c5   :  { %v1623_v18 = vrot.slane %v1616_v61, %v8286_v48  ;;  %v8585_v61 = vld [vmem:[#allocation5 + $0x70] ss:$24 sps:$4 sm:$0xff]  }
 0x2c7   :  { %v1630_v14 = vrot.slane %v1623_v18, %v8286_v48  ;;  %v8588_v18 = vld [vmem:[#allocation5 + $0xa4] ss:$24 sps:$4 sm:$0xff]  }
 0x2c9   :  { %v1632_v6 = vmul.f32 %v7766_v10, %v1630_v14  ;;  %v8593_v14 = vld [vmem:[#allocation5 + $0xa0] ss:$24 sps:$4 sm:$0xff]   ;;  %v9789_v10 = vld [vmem:[#allocation26_spill] sm:$0xff] }
 0x2cb   :  { %v1636_v2 = vadd.f32 %v1634_v22, %v1632_v6  ;;  %v9788_v22 = vld [vmem:[#allocation25_spill] sm:$0xff]  ;;  %v9790_v6 = vld [vmem:[#allocation27_spill] sm:$0xff] }
 0x2cd   :  { %7767 = vtanh.f32 %v1636_v2  ;;  %v9791_v2 = vld [vmem:[#allocation28_spill] sm:$0xff] }
 0x2d7   :  { %v7768_v15 = vpop.eup %7767 }
 0x2d8   :  { %v1642_v7 = vmul.f32 %v7768_v15, %v1641_v63  ;;  %v9793_v63 = vld [vmem:[#allocation30_spill] sm:$0xff]  ;;  %v9794_v15 = vld [vmem:[#allocation31_spill] sm:$0xff] }
 0x2da   :  { %v8559_v39 = vadd.f32 %v1643_v54, %v1642_v7  ;;  %v9795_v7 = vld [vmem:[#allocation32_spill] sm:$0xff]  ;;  %v9796_v54 = vld [vmem:[#allocation34_spill] sm:$0xff] }
 0x2dc   :  { %1646 = vst.msk [vmem:[#allocation8 + $0x1] ss:$8 sm:$0x3] %vm8310_vm0, %v8559_v39  ;;  %v1660_v34 = vrot.slane %v8559_v39, %v8062_v46  ;;  %v1656_v21 = vrot.slane %v8559_v39, %v8115_v3 }
 0x2de   :  { %v1664_v37 = vpack.c.bf16 %v1660_v34, %v1660_v34  ;;  %v8570_v44 = vpack.c.bf16 %v1656_v21, %v1656_v21  ;;  %v9797_v34 = vld [vmem:[#allocation33_spill] sm:$0xff]  ;;  %v9798_v21 = vld [vmem:[#allocation35_spill] sm:$0xff] }
 0x2e0   :  { %2273 = vmatprep.mubr.bf16.mxu0 %v1664_v37  ;;  %2314 = vmatprep.mubr.bf16.mxu1 %v1664_v37 }
 0x2e1   :  { %2274 = vmatmul.mubr.bf16.vlgmr.msra.gmra.mrb[12].mxu0 %v8570_v44  ;;  %2315 = vmatmul.mubr.bf16.vlgmr.msra.gmra.mrb[12].mxu1 %v8570_v44 }
 0x2e2   :  { %2324 = vmatpush1.bf16.msra.mxu0 %v8568_v52  ;;  %2355 = vmatprep.mubr.bf16.mxu0 %v1664_v37  ;;  %v9799_v37 = vld [vmem:[#allocation36_spill] sm:$0xff] }
 0x2e3   :  { %2325 = vmatprep.subr.bf16.mxu0 %v8572_v30  ;;  %3031 = vmatpush1.bf16.msra.mxu1 %v8354_v36  ;;  %v8596_v36 = vld [vmem:[#allocation5 + $0xd4] ss:$24 sps:$4 sm:$0xff]  }
 0x2e4   :  { %3032 = vmatprep.subr.bf16.mxu1 %v8362_v27  ;;  %v8601_v27 = vld [vmem:[#allocation5 + $0xd0] ss:$24 sps:$4 sm:$0xff]  }
 0x2e6   :  { %2326 = vmatpush1.bf16.msra.mxu0 %v8577_v17 }
 0x2e7   :  { %2327 = vmatprep.subr.bf16.mxu0 %v8580_v51  ;;  %3033 = vmatpush1.bf16.msra.mxu1 %v8369_v0  ;;  %v8604_v0 = vld [vmem:[#allocation5 + $0x104] ss:$24 sps:$4 sm:$0xff]  }
 0x2e8   :  { %3034 = vmatprep.subr.bf16.mxu1 %v8375_v33  ;;  %v8609_v33 = vld [vmem:[#allocation5 + $0x100] ss:$24 sps:$4 sm:$0xff]  }
 0x2ea   :  { %2328 = vmatpush1.bf16.msra.mxu0 %v8585_v61 }
 0x2eb   :  { %2329 = vmatprep.subr.bf16.mxu0 %v8588_v18  ;;  %3035 = vmatpush1.bf16.msra.mxu1 %v8381_v4  ;;  %v8612_v4 = vld [vmem:[#allocation5 + $0x134] ss:$24 sps:$4 sm:$0xff]  }
 0x2ec   :  { %3036 = vmatprep.subr.bf16.mxu1 %v8387_v8  ;;  %v8617_v8 = vld [vmem:[#allocation5 + $0x130] ss:$24 sps:$4 sm:$0xff]  }
 0x2ee   :  { %2330 = vmatpush1.bf16.msra.mxu0 %v8593_v14 }
 0x2ef   :  { %2331 = vmatprep.subr.bf16.mxu0 %v8596_v36  ;;  %3037 = vmatpush1.bf16.msra.mxu1 %v8393_v12  ;;  %v8620_v12 = vld [vmem:[#allocation5 + $0x164] ss:$24 sps:$4 sm:$0xff]  }
 0x2f0   :  { %3038 = vmatprep.subr.bf16.mxu1 %v8399_v16  ;;  %v8625_v16 = vld [vmem:[#allocation5 + $0x160] ss:$24 sps:$4 sm:$0xff]  }
 0x2f2   :  { %2332 = vmatpush1.bf16.msra.mxu0 %v8601_v27 }
 0x2f3   :  { %2333 = vmatprep.subr.bf16.mxu0 %v8604_v0  ;;  %3039 = vmatpush1.bf16.msra.mxu1 %v8405_v20  ;;  %v8628_v20 = vld [vmem:[#allocation5 + $0x194] ss:$24 sps:$4 sm:$0xff]  }
 0x2f4   :  { %3040 = vmatprep.subr.bf16.mxu1 %v8411_v24  ;;  %v8633_v24 = vld [vmem:[#allocation5 + $0x190] ss:$24 sps:$4 sm:$0xff]  }
 0x2f6   :  { %2334 = vmatpush1.bf16.msra.mxu0 %v8609_v33 }
 0x2f7   :  { %2335 = vmatprep.subr.bf16.mxu0 %v8612_v4  ;;  %3041 = vmatpush1.bf16.msra.mxu1 %v8417_v28  ;;  %v8636_v28 = vld [vmem:[#allocation5 + $0x1c4] ss:$24 sps:$4 sm:$0xff]  }
 0x2f8   :  { %3042 = vmatprep.subr.bf16.mxu1 %v8423_v32  ;;  %v8641_v32 = vld [vmem:[#allocation5 + $0x1c0] ss:$24 sps:$4 sm:$0xff]  }
 0x2fa   :  { %2336 = vmatpush1.bf16.msra.mxu0 %v8617_v8 }
 0x2fb   :  { %2337 = vmatprep.subr.bf16.mxu0 %v8620_v12  ;;  %3043 = vmatpush1.bf16.msra.mxu1 %v8429_v35  ;;  %v8644_v35 = vld [vmem:[#allocation5 + $0x1f4] ss:$24 sps:$4 sm:$0xff]  }
 0x2fc   :  { %3044 = vmatprep.subr.bf16.mxu1 %v8435_v38  ;;  %v8649_v38 = vld [vmem:[#allocation5 + $0x1f0] ss:$24 sps:$4 sm:$0xff]  }
 0x2fe   :  { %2338 = vmatpush1.bf16.msra.mxu0 %v8625_v16 }
 0x2ff   :  { %2339 = vmatprep.subr.bf16.mxu0 %v8628_v20  ;;  %3045 = vmatpush1.bf16.msra.mxu1 %v8441_v42  ;;  %v8652_v42 = vld [vmem:[#allocation5 + $0x224] ss:$24 sps:$4 sm:$0xff]  }
 0x300   :  { %3046 = vmatprep.subr.bf16.mxu1 %v8450_v50  ;;  %v8657_v50 = vld [vmem:[#allocation5 + $0x220] ss:$24 sps:$4 sm:$0xff]  }
 0x302   :  { %2340 = vmatpush1.bf16.msra.mxu0 %v8633_v24 }
 0x303   :  { %2341 = vmatprep.subr.bf16.mxu0 %v8636_v28  ;;  %3047 = vmatpush1.bf16.msra.mxu1 %v8452_v45  ;;  %v8660_v45 = vld [vmem:[#allocation5 + $0x254] ss:$24 sps:$4 sm:$0xff]  }
 0x304   :  { %3048 = vmatprep.subr.bf16.mxu1 %v8462_v57  ;;  %v8665_v57 = vld [vmem:[#allocation5 + $0x250] ss:$24 sps:$4 sm:$0xff]  }
 0x306   :  { %2342 = vmatpush1.bf16.msra.mxu0 %v8641_v32 }
 0x307   :  { %2343 = vmatprep.subr.bf16.mxu0 %v8644_v35  ;;  %3049 = vmatpush1.bf16.msra.mxu1 %v8464_v59  ;;  %v8668_v59 = vld [vmem:[#allocation5 + $0x284] ss:$24 sps:$4 sm:$0xff]  }
 0x308   :  { %3050 = vmatprep.subr.bf16.mxu1 %v8474_v53  ;;  %v8673_v53 = vld [vmem:[#allocation5 + $0x280] ss:$24 sps:$4 sm:$0xff]  }
 0x30a   :  { %2344 = vmatpush1.bf16.msra.mxu0 %v8649_v38 }
 0x30b   :  { %2345 = vmatprep.subr.bf16.mxu0 %v8652_v42  ;;  %3051 = vmatpush1.bf16.msra.mxu1 %v8476_v40  ;;  %v8676_v40 = vld [vmem:[#allocation5 + $0x2b4] ss:$24 sps:$4 sm:$0xff]  }
 0x30c   :  { %3052 = vmatprep.subr.bf16.mxu1 %v8486_v5  ;;  %v8681_v5 = vld [vmem:[#allocation5 + $0x2b0] ss:$24 sps:$4 sm:$0xff]  }
 0x30e   :  { %2346 = vmatpush1.bf16.msra.mxu0 %v8657_v50 }
 0x30f   :  { %2347 = vmatprep.subr.bf16.mxu0 %v8660_v45  ;;  %3053 = vmatpush1.bf16.msra.mxu1 %v8488_v9  ;;  %v8684_v9 = vld [vmem:[#allocation5 + $0x2e4] ss:$24 sps:$4 sm:$0xff]  }
 0x310   :  { %3054 = vmatprep.subr.bf16.mxu1 %v8499_v60  ;;  %v8689_v60 = vld [vmem:[#allocation5 + $0x2e0] ss:$24 sps:$4 sm:$0xff]  }
 0x312   :  { %2348 = vmatpush1.bf16.msra.mxu0 %v8665_v57 }
 0x313   :  { %2349 = vmatprep.subr.bf16.mxu0 %v8668_v59  ;;  %3055 = vmatpush1.bf16.msra.mxu1 %v8497_v58  ;;  %v9778_v58 = vld [vmem:[#allocation15_spill] sm:$0xff] }
 0x314   :  { %3056 = vmatprep.subr.bf16.mxu1 %v8506_v62  ;;  %v9781_v62 = vld [vmem:[#allocation18_spill] sm:$0xff] }
 0x316   :  { %2350 = vmatpush1.bf16.msra.mxu0 %v8673_v53 }
 0x317   :  { %2351 = vmatprep.subr.bf16.mxu0 %v8676_v40  ;;  %3057 = vmatpush1.bf16.msra.mxu1 %v8513_v47  ;;  %v9783_v47 = vld [vmem:[#allocation20_spill] sm:$0xff] }
 0x318   :  { %3058 = vmatprep.subr.bf16.mxu1 %v8519_v56  ;;  %v9776_v56 = vld [vmem:[#allocation13_spill] sm:$0xff] }
 0x31a   :  { %2352 = vmatpush1.bf16.msra.mxu0 %v8681_v5 }
 0x31b   :  { %2353 = vmatprep.subr.bf16.mxu0 %v8684_v9  ;;  %3059 = vmatpush1.bf16.msra.mxu1 %v8525_v55  ;;  %v9777_v55 = vld [vmem:[#allocation14_spill] sm:$0xff] }
 0x31c   :  { %3060 = vmatprep.subr.bf16.mxu1 %v8531_v1  ;;  %v9779_v1 = vld [vmem:[#allocation16_spill] sm:$0xff] }
 0x31e   :  { %2354 = vmatpush1.bf16.msra.mxu0 %v8689_v60 }
 0x31f   :  { %3071 = vmatprep.subr.bf16.mxu0 %v8360_v25  ;;  %3061 = vmatpush1.bf16.msra.mxu1 %v8537_v19  ;;  %v9780_v25 = vld [vmem:[#allocation17_spill] sm:$0xff]  ;;  %v9782_v19 = vld [vmem:[#allocation19_spill] sm:$0xff] }
 0x320   :  { %3112 = vmatprep.subr.bf16.mxu1 %v8546_v49  ;;  %v9787_v49 = vld [vmem:[#allocation24_spill] sm:$0xff] }
 0x321   :  { %2356 = vmatmul.mubr.bf16.vlgmr.msra.gmra.mrb[16].mxu0 %v8570_v44  ;;  %v9800_v44 = vld [vmem:[#allocation37_spill] sm:$0xff] }
 0x322   :  { %3072 = vmatpush1.bf16.msra.mxu0 %v8358_v23  ;;  %v9784_v23 = vld [vmem:[#allocation21_spill] sm:$0xff] }
 0x323   :  { %3073 = vmatprep.subr.bf16.mxu0 %v8365_v29  ;;  %v9785_v29 = vld [vmem:[#allocation22_spill] sm:$0xff] }
 0x326   :  { %3074 = vmatpush1.bf16.msra.mxu0 %v8373_v31  ;;  %v9786_v31 = vld [vmem:[#allocation23_spill] sm:$0xff] }
 0x327   :  { %3075 = vmatprep.subr.bf16.mxu0 %v9776_v56  ;;  %v9801_v56 = vld [vmem:[#allocation38_spill] sm:$0xff] }
 0x32a   :  { %3076 = vmatpush1.bf16.msra.mxu0 %v9777_v55  ;;  %v9802_v55 = vld [vmem:[#allocation39_spill] sm:$0xff] }
 0x32b   :  { %3077 = vmatprep.subr.bf16.mxu0 %v9778_v58  ;;  %v9803_v58 = vld [vmem:[#allocation40_spill] sm:$0xff] }
 0x32e   :  { %3078 = vmatpush1.bf16.msra.mxu0 %v9779_v1 }
 0x32f   :  { %3079 = vmatprep.subr.bf16.mxu0 %v9780_v25 }
 0x332   :  { %3080 = vmatpush1.bf16.msra.mxu0 %v9781_v62 }
 0x333   :  { %3081 = vmatprep.subr.bf16.mxu0 %v9782_v19 }
 0x336   :  { %3082 = vmatpush1.bf16.msra.mxu0 %v9783_v47 }
 0x337   :  { %3083 = vmatprep.subr.bf16.mxu0 %v9784_v23 }
 0x33a   :  { %3084 = vmatpush1.bf16.msra.mxu0 %v9785_v29 }
 0x33b   :  { %3085 = vmatprep.subr.bf16.mxu0 %v9786_v31 }
 0x33e   :  { %3086 = vmatpush1.bf16.msra.mxu0 %v9787_v49 }
 0x33f   :  { %3087 = vmatprep.subr.bf16.mxu0 %v9788_v22 }
 0x342   :  { %3088 = vmatpush1.bf16.msra.mxu0 %v9789_v10 }
 0x343   :  { %3089 = vmatprep.subr.bf16.mxu0 %v9790_v6 }
 0x346   :  { %3090 = vmatpush1.bf16.msra.mxu0 %v9791_v2 }
 0x347   :  { %3091 = vmatprep.subr.bf16.mxu0 %v9792_v26  ;;  %v1649_v26 = vld [vmem:[#allocation2 + $0x2] ss:$8 sm:$0xf] }
 0x34a   :  { %3092 = vmatpush1.bf16.msra.mxu0 %v9793_v63  ;;  %v1650_v63 = vld [vmem:[#allocation2 + $0x2] ss:$8 sm:$0x30] }
 0x34b   :  { %3093 = vmatprep.subr.bf16.mxu0 %v9794_v15  ;;  %v1651_v15 = vor.u32 %v1650_v63, %v1649_v26 }
 0x34e   :  { %3094 = vmatpush1.bf16.msra.mxu0 %v9795_v7 }
 0x34f   :  { %3095 = vmatprep.subr.bf16.mxu0 %v9796_v54 }
 0x352   :  { %3096 = vmatpush1.bf16.msra.mxu0 %v9797_v34 }
 0x353   :  { %3097 = vmatprep.subr.bf16.mxu0 %v9798_v21 }
 0x356   :  { %3098 = vmatpush1.bf16.msra.mxu0 %v9799_v37 }
 0x357   :  { %3099 = vmatprep.subr.bf16.mxu0 %v9800_v44 }
 0x35a   :  { %3100 = vmatpush1.bf16.msra.mxu0 %v9801_v56 }
 0x35b   :  { %3101 = vmatprep.subr.bf16.mxu0 %v9802_v55 }
 0x35e   :  { %3102 = vmatpush1.bf16.msra.mxu0 %v9803_v58 }
 0x3b4   :  { %v2275_v1 = vpop.f32.mrb[12].mxu0  ;;  %v2316_v25 = vpop.f32.mrb[12].mxu1 }
 0x3b5   :  { %v2277_v62 = vpop.f32.mrb[13].mxu0  ;;  %v2318_v19 = vpop.f32.mrb[13].mxu1 }
 0x3b6   :  { %v2368_v47 = vcombine.low %v2275_v1, %v2277_v62  ;;  %v2369_v23 = vcombine.low %v2316_v25, %v2318_v19  ;;  %v2279_v29 = vpop.f32.mrb[14].mxu0  ;;  %v2320_v31 = vpop.f32.mrb[14].mxu1 }
 0x3b7   :  { %v2280_v49 = vpop.f32.mrb[15].mxu0  ;;  %v2321_v22 = vpop.f32.mrb[15].mxu1  ;;  %v2423_v29 = vrot.slane %v1651_v15, 4 }
 0x3b8   :  { %v2376_v10 = vrot.slane %v2368_v47, %v8286_v48  ;;  %v2383_v6 = vrot.slane %v2369_v23, %v8286_v48 }
 0x3ba   :  { %v2384_v2 = vcombine.low %v2376_v10, %v2383_v6 }
 0x3bc   :  { %v2391_v7 = vrot.slane %v2384_v2, %v8286_v48 }
 0x3be   :  { %v2393_v54 = vadd.f32 %v2391_v7, %v1651_v15 }
 0x3c0   :  { %v2394_v34 = vadd.f32 %v2393_v54, %v8291_v11 }
 0x3c2   :  { %v6688_v21 = vmul.f32 -1.442695, %v2394_v34 }
 0x3c4   :  { %7769 = vpow2.f32 %v6688_v21  ;;  %v8875_v21 = vld [vmem:[#allocation5 + $0x184] ss:$24 sps:$4 sm:$0xff]  }
 0x3ce   :  { %v7770_v37 = vpop.eup %7769 }
 0x3cf   :  { %v2398_v44 = vadd.f32 1.0, %v7770_v37  ;;  %v8877_v37 = vld [vmem:[#allocation5 + $0x180] ss:$24 sps:$4 sm:$0xff]  }
 0x3d1   :  { %7771 = vrcp.f32 %v2398_v44  ;;  %v8879_v44 = vld [vmem:[#allocation5 + $0x18c] ss:$24 sps:$4 sm:$0xff]  }
 0x3d2   :  { %9814 = vst [vmem:[#allocation23_spill] sm:$0xff] %v8879_v44 }
 0x3db   :  { %v7772_v11 = vpop.eup %7771 }
 0x3dc   :  { %v2428_v22 = vrot.slane %v7772_v11, 2 }
 0x3de   :  { %v2430_v10 = vsub.f32 1.0, %v2428_v22  ;;  %v2432_v26 = vmul.f32 %v2428_v22, %v8559_v39  ;;  %v8779_v39 = vld [vmem:[#allocation5] ss:$24 sps:$4 sm:$0xff]  }
 0x3df   :  { %v8922_v22 = vld [vmem:[#allocation5 + $0x240] ss:$24 sps:$4 sm:$0xff]  }
 0x3f4   :  { %v2357_v56 = vpop.f32.mrb[16].mxu0 }
 0x3f5   :  { %v2401_v55 = vadd.f32 %v2357_v56, %v8297_v41  ;;  %v2359_v58 = vpop.f32.mrb[17].mxu0  ;;  %v8882_v56 = vld [vmem:[#allocation5 + $0x188] ss:$24 sps:$4 sm:$0xff]  }
 0x3f6   :  { %v2402_v1 = vadd.f32 %v2359_v58, %v8300_v43  ;;  %v2361_v25 = vpop.f32.mrb[18].mxu0  ;;  %9815 = vst [vmem:[#allocation24_spill] sm:$0xff] %v8882_v56  ;;  %v8889_v58 = vld [vmem:[#allocation5 + $0x1b0] ss:$24 sps:$4 sm:$0xff]  }
 0x3f7   :  { %v2362_v62 = vpop.f32.mrb[19].mxu0  ;;  %v8894_v25 = vld [vmem:[#allocation5 + $0x1b8] ss:$24 sps:$4 sm:$0xff]  }
 0x3f8   :  { %v2405_v19 = vcombine.low %v2401_v55, %v2402_v1  ;;  %v8887_v55 = vld [vmem:[#allocation5 + $0x1b4] ss:$24 sps:$4 sm:$0xff]   ;;  %9817 = vst [vmem:[#allocation26_spill] sm:$0xff] %v8894_v25  ;;  %v8899_v62 = vld [vmem:[#allocation5 + $0x1e4] ss:$24 sps:$4 sm:$0xff]  }
 0x3f9   :  { %v8891_v1 = vld [vmem:[#allocation5 + $0x1bc] ss:$24 sps:$4 sm:$0xff]  }
 0x3fa   :  { %v2412_v47 = vrot.slane %v2405_v19, %v8286_v48  ;;  %9816 = vst [vmem:[#allocation25_spill] sm:$0xff] %v8891_v1  ;;  %v8901_v19 = vld [vmem:[#allocation5 + $0x1e0] ss:$24 sps:$4 sm:$0xff]  }
 0x3fc   :  { %v2419_v23 = vrot.slane %v2412_v47, %v8286_v48  ;;  %v8903_v47 = vld [vmem:[#allocation5 + $0x1ec] ss:$24 sps:$4 sm:$0xff]  }
 0x3fd   :  { %9818 = vst [vmem:[#allocation27_spill] sm:$0xff] %v8903_v47 }
 0x3fe   :  { %v2421_v31 = vmul.f32 %v7772_v11, %v2419_v23  ;;  %v8906_v23 = vld [vmem:[#allocation5 + $0x1e8] ss:$24 sps:$4 sm:$0xff]  }
 0x3ff   :  { %9819 = vst [vmem:[#allocation28_spill] sm:$0xff] %v8906_v23  ;;  %v8913_v11 = vld [vmem:[#allocation5 + $0x210] ss:$24 sps:$4 sm:$0xff]  }
 0x400   :  { %v2425_v49 = vadd.f32 %v2423_v29, %v2421_v31  ;;  %v8911_v29 = vld [vmem:[#allocation5 + $0x214] ss:$24 sps:$4 sm:$0xff]  }
 0x401   :  { %v8915_v31 = vld [vmem:[#allocation5 + $0x21c] ss:$24 sps:$4 sm:$0xff]  }
 0x402   :  { %7773 = vtanh.f32 %v2425_v49  ;;  %9820 = vst [vmem:[#allocation29_spill] sm:$0xff] %v8915_v31  ;;  %v8918_v49 = vld [vmem:[#allocation5 + $0x218] ss:$24 sps:$4 sm:$0xff]  }
 0x403   :  { %9821 = vst [vmem:[#allocation30_spill] sm:$0xff] %v8918_v49 }
 0x40c   :  { %v7774_v6 = vpop.eup %7773 }
 0x40d   :  { %v2431_v2 = vmul.f32 %v7774_v6, %v2430_v10  ;;  %v8924_v10 = vld [vmem:[#allocation5 + $0x244] ss:$24 sps:$4 sm:$0xff]   ;;  %v8927_v6 = vld [vmem:[#allocation5 + $0x248] ss:$24 sps:$4 sm:$0xff]  }
 0x40e   :  { %9822 = vst [vmem:[#allocation31_spill] sm:$0xff] %v8927_v6 }
 0x40f   :  { %v8739_v63 = vadd.f32 %v2432_v26, %v2431_v2  ;;  %v8929_v2 = vld [vmem:[#allocation5 + $0x24c] ss:$24 sps:$4 sm:$0xff]  }
 0x410   :  { %9823 = vst [vmem:[#allocation32_spill] sm:$0xff] %v8929_v2  ;;  %v8931_v26 = vld [vmem:[#allocation5 + $0x274] ss:$24 sps:$4 sm:$0xff]  }
 0x411   :  { %2435 = vst.msk [vmem:[#allocation8 + $0x2] ss:$8 sm:$0x3] %vm8310_vm0, %v8739_v63  ;;  %v2449_v7 = vrot.slane %v8739_v63, %v8062_v46  ;;  %v2445_v15 = vrot.slane %v8739_v63, %v8115_v3 }
 0x413   :  { %v2453_v54 = vpack.c.bf16 %v2449_v7, %v2449_v7  ;;  %v2452_v34 = vpack.c.bf16 %v2445_v15, %v2445_v15  ;;  %v8934_v7 = vld [vmem:[#allocation5 + $0x27c] ss:$24 sps:$4 sm:$0xff]   ;;  %v8938_v15 = vld [vmem:[#allocation5 + $0x270] ss:$24 sps:$4 sm:$0xff]  }
 0x414   :  { %9824 = vst [vmem:[#allocation34_spill] sm:$0xff] %v8934_v7 }
 0x415   :  { %3062 = vmatprep.mubr.bf16.mxu1 %v2453_v54  ;;  %3103 = vmatprep.mubr.bf16.mxu0 %v2453_v54 }
 0x416   :  { %3063 = vmatmul.mubr.bf16.vlgmr.msra.gmra.mrb[16].mxu1 %v2452_v34  ;;  %3104 = vmatmul.mubr.bf16.vlgmr.msra.gmra.mrb[20].mxu0 %v2452_v34 }
 0x417   :  { %3113 = vmatpush1.bf16.msra.mxu1 %v8568_v52  ;;  %3144 = vmatprep.mubr.bf16.mxu1 %v2453_v54  ;;  %v8781_v52 = vld [vmem:[#allocation5 + $0x4] ss:$24 sps:$4 sm:$0xff]   ;;  %v8942_v54 = vld [vmem:[#allocation5 + $0x278] ss:$24 sps:$4 sm:$0xff]  }
 0x418   :  { %3114 = vmatprep.subr.bf16.mxu1 %v8572_v30  ;;  %v8783_v30 = vld [vmem:[#allocation5 + $0x8] ss:$24 sps:$4 sm:$0xff]   ;;  %3819 = vmatprep.subr.bf16.mxu0 %v8781_v52  ;;  %9825 = vst [vmem:[#allocation33_spill] sm:$0xff] %v8942_v54 }
 0x419   :  { %3820 = vmatpush1.bf16.msra.mxu0 %v8779_v39 }
 0x41b   :  { %3115 = vmatpush1.bf16.msra.mxu1 %v8577_v17  ;;  %v8785_v17 = vld [vmem:[#allocation5 + $0xc] ss:$24 sps:$4 sm:$0xff]  }
 0x41c   :  { %3116 = vmatprep.subr.bf16.mxu1 %v8580_v51  ;;  %v8787_v51 = vld [vmem:[#allocation5 + $0x34] ss:$24 sps:$4 sm:$0xff]  }
 0x41d   :  { %3821 = vmatprep.subr.bf16.mxu0 %v8787_v51 }
 0x41f   :  { %3117 = vmatpush1.bf16.msra.mxu1 %v8585_v61  ;;  %v8790_v61 = vld [vmem:[#allocation5 + $0x3c] ss:$24 sps:$4 sm:$0xff]  }
 0x420   :  { %3118 = vmatprep.subr.bf16.mxu1 %v8588_v18  ;;  %v8794_v18 = vld [vmem:[#allocation5 + $0x30] ss:$24 sps:$4 sm:$0xff]  }
 0x421   :  { %3822 = vmatpush1.bf16.msra.mxu0 %v8794_v18 }
 0x423   :  { %3119 = vmatpush1.bf16.msra.mxu1 %v8593_v14  ;;  %v8798_v14 = vld [vmem:[#allocation5 + $0x38] ss:$24 sps:$4 sm:$0xff]  }
 0x424   :  { %3120 = vmatprep.subr.bf16.mxu1 %v8596_v36  ;;  %v8800_v36 = vld [vmem:[#allocation5 + $0x64] ss:$24 sps:$4 sm:$0xff]  }
 0x425   :  { %3823 = vmatprep.subr.bf16.mxu0 %v8800_v36 }
 0x427   :  { %3121 = vmatpush1.bf16.msra.mxu1 %v8601_v27  ;;  %v8803_v27 = vld [vmem:[#allocation5 + $0x6c] ss:$24 sps:$4 sm:$0xff]  }
 0x428   :  { %3122 = vmatprep.subr.bf16.mxu1 %v8604_v0  ;;  %v8806_v0 = vld [vmem:[#allocation5 + $0x60] ss:$24 sps:$4 sm:$0xff]  }
 0x429   :  { %3824 = vmatpush1.bf16.msra.mxu0 %v8806_v0 }
 0x42b   :  { %3123 = vmatpush1.bf16.msra.mxu1 %v8609_v33  ;;  %v8810_v33 = vld [vmem:[#allocation5 + $0x68] ss:$24 sps:$4 sm:$0xff]  }
 0x42c   :  { %3124 = vmatprep.subr.bf16.mxu1 %v8612_v4  ;;  %v8812_v4 = vld [vmem:[#allocation5 + $0x94] ss:$24 sps:$4 sm:$0xff]  }
 0x42d   :  { %3825 = vmatprep.subr.bf16.mxu0 %v8812_v4 }
 0x42f   :  { %3125 = vmatpush1.bf16.msra.mxu1 %v8617_v8  ;;  %v8815_v8 = vld [vmem:[#allocation5 + $0x9c] ss:$24 sps:$4 sm:$0xff]  }
 0x430   :  { %3126 = vmatprep.subr.bf16.mxu1 %v8620_v12  ;;  %9804 = vst [vmem:[#allocation13_spill] sm:$0xff] %v8815_v8  ;;  %v8818_v12 = vld [vmem:[#allocation5 + $0x90] ss:$24 sps:$4 sm:$0xff]  }
 0x431   :  { %3826 = vmatpush1.bf16.msra.mxu0 %v8818_v12 }
 0x433   :  { %3127 = vmatpush1.bf16.msra.mxu1 %v8625_v16  ;;  %v8822_v16 = vld [vmem:[#allocation5 + $0x98] ss:$24 sps:$4 sm:$0xff]  }
 0x434   :  { %3128 = vmatprep.subr.bf16.mxu1 %v8628_v20  ;;  %9805 = vst [vmem:[#allocation14_spill] sm:$0xff] %v8822_v16  ;;  %v8824_v20 = vld [vmem:[#allocation5 + $0xc4] ss:$24 sps:$4 sm:$0xff]  }
 0x435   :  { %3827 = vmatprep.subr.bf16.mxu0 %v8824_v20 }
 0x437   :  { %3129 = vmatpush1.bf16.msra.mxu1 %v8633_v24  ;;  %v8827_v24 = vld [vmem:[#allocation5 + $0xcc] ss:$24 sps:$4 sm:$0xff]  }
 0x438   :  { %3130 = vmatprep.subr.bf16.mxu1 %v8636_v28  ;;  %9806 = vst [vmem:[#allocation15_spill] sm:$0xff] %v8827_v24  ;;  %v8830_v28 = vld [vmem:[#allocation5 + $0xc0] ss:$24 sps:$4 sm:$0xff]  }
 0x439   :  { %3828 = vmatpush1.bf16.msra.mxu0 %v8830_v28 }
 0x43b   :  { %3131 = vmatpush1.bf16.msra.mxu1 %v8641_v32  ;;  %v8834_v32 = vld [vmem:[#allocation5 + $0xc8] ss:$24 sps:$4 sm:$0xff]  }
 0x43c   :  { %3132 = vmatprep.subr.bf16.mxu1 %v8644_v35  ;;  %9807 = vst [vmem:[#allocation16_spill] sm:$0xff] %v8834_v32  ;;  %v8836_v35 = vld [vmem:[#allocation5 + $0xf4] ss:$24 sps:$4 sm:$0xff]  }
 0x43d   :  { %3829 = vmatprep.subr.bf16.mxu0 %v8836_v35 }
 0x43f   :  { %3133 = vmatpush1.bf16.msra.mxu1 %v8649_v38  ;;  %v8839_v38 = vld [vmem:[#allocation5 + $0xfc] ss:$24 sps:$4 sm:$0xff]  }
 0x440   :  { %3134 = vmatprep.subr.bf16.mxu1 %v8652_v42  ;;  %9808 = vst [vmem:[#allocation17_spill] sm:$0xff] %v8839_v38  ;;  %v8842_v42 = vld [vmem:[#allocation5 + $0xf0] ss:$24 sps:$4 sm:$0xff]  }
 0x441   :  { %3830 = vmatpush1.bf16.msra.mxu0 %v8842_v42 }
 0x443   :  { %3135 = vmatpush1.bf16.msra.mxu1 %v8657_v50  ;;  %v8846_v50 = vld [vmem:[#allocation5 + $0xf8] ss:$24 sps:$4 sm:$0xff]  }
 0x444   :  { %3136 = vmatprep.subr.bf16.mxu1 %v8660_v45  ;;  %9809 = vst [vmem:[#allocation18_spill] sm:$0xff] %v8846_v50  ;;  %v8848_v45 = vld [vmem:[#allocation5 + $0x124] ss:$24 sps:$4 sm:$0xff]  }
 0x445   :  { %3831 = vmatprep.subr.bf16.mxu0 %v8848_v45 }
 0x447   :  { %3137 = vmatpush1.bf16.msra.mxu1 %v8665_v57  ;;  %v8851_v57 = vld [vmem:[#allocation5 + $0x12c] ss:$24 sps:$4 sm:$0xff]  }
 0x448   :  { %3138 = vmatprep.subr.bf16.mxu1 %v8668_v59  ;;  %9810 = vst [vmem:[#allocation19_spill] sm:$0xff] %v8851_v57  ;;  %v8854_v59 = vld [vmem:[#allocation5 + $0x120] ss:$24 sps:$4 sm:$0xff]  }
 0x449   :  { %3832 = vmatpush1.bf16.msra.mxu0 %v8854_v59 }
 0x44b   :  { %3139 = vmatpush1.bf16.msra.mxu1 %v8673_v53  ;;  %v8858_v53 = vld [vmem:[#allocation5 + $0x128] ss:$24 sps:$4 sm:$0xff]  }
 0x44c   :  { %3140 = vmatprep.subr.bf16.mxu1 %v8676_v40  ;;  %9811 = vst [vmem:[#allocation20_spill] sm:$0xff] %v8858_v53  ;;  %v8860_v40 = vld [vmem:[#allocation5 + $0x154] ss:$24 sps:$4 sm:$0xff]  }
 0x44d   :  { %3833 = vmatprep.subr.bf16.mxu0 %v8860_v40 }
 0x44f   :  { %3141 = vmatpush1.bf16.msra.mxu1 %v8681_v5  ;;  %v8863_v5 = vld [vmem:[#allocation5 + $0x15c] ss:$24 sps:$4 sm:$0xff]  }
 0x450   :  { %3142 = vmatprep.subr.bf16.mxu1 %v8684_v9  ;;  %9812 = vst [vmem:[#allocation21_spill] sm:$0xff] %v8863_v5  ;;  %v8866_v9 = vld [vmem:[#allocation5 + $0x150] ss:$24 sps:$4 sm:$0xff]  }
 0x451   :  { %3834 = vmatpush1.bf16.msra.mxu0 %v8866_v9 }
 0x452   :  { %3835 = vmatprep.subr.bf16.mxu0 %v8875_v21 }
 0x453   :  { %3143 = vmatpush1.bf16.msra.mxu1 %v8689_v60  ;;  %v8870_v60 = vld [vmem:[#allocation5 + $0x158] ss:$24 sps:$4 sm:$0xff]  }
 0x454   :  { %3860 = vmatprep.subr.bf16.mxu1 %v8785_v17  ;;  %9813 = vst [vmem:[#allocation22_spill] sm:$0xff] %v8870_v60 }
 0x455   :  { %3836 = vmatpush1.bf16.msra.mxu0 %v8877_v37 }
 0x456   :  { %3145 = vmatmul.mubr.bf16.vlgmr.msra.gmra.mrb[20].mxu1 %v2452_v34  ;;  %3837 = vmatprep.subr.bf16.mxu0 %v8887_v55  ;;  %v8944_v34 = vld [vmem:[#allocation5 + $0x2a4] ss:$24 sps:$4 sm:$0xff]  }
 0x457   :  { %3861 = vmatpush1.bf16.msra.mxu1 %v8783_v30 }
 0x458   :  { %3862 = vmatprep.subr.bf16.mxu1 %v8790_v61 }
 0x459   :  { %3838 = vmatpush1.bf16.msra.mxu0 %v8889_v58 }
 0x45a   :  { %3839 = vmatprep.subr.bf16.mxu0 %v8899_v62 }
 0x45b   :  { %3863 = vmatpush1.bf16.msra.mxu1 %v8798_v14 }
 0x45c   :  { %3864 = vmatprep.subr.bf16.mxu1 %v8803_v27 }
 0x45d   :  { %3840 = vmatpush1.bf16.msra.mxu0 %v8901_v19 }
 0x45e   :  { %3841 = vmatprep.subr.bf16.mxu0 %v8911_v29 }
 0x45f   :  { %3865 = vmatpush1.bf16.msra.mxu1 %v8810_v33 }
 0x460   :  { %3866 = vmatprep.subr.bf16.mxu1 %v8815_v8  ;;  %v8978_v8 = vld [vmem:[#allocation7] ss:$2 sm:$0x3f] }
 0x461   :  { %3842 = vmatpush1.bf16.msra.mxu0 %v8913_v11 }
 0x462   :  { %3843 = vmatprep.subr.bf16.mxu0 %v8924_v10 }
 0x463   :  { %3867 = vmatpush1.bf16.msra.mxu1 %v8822_v16 }
 0x464   :  { %3868 = vmatprep.subr.bf16.mxu1 %v8827_v24 }
 0x465   :  { %3844 = vmatpush1.bf16.msra.mxu0 %v8922_v22 }
 0x466   :  { %3845 = vmatprep.subr.bf16.mxu0 %v8931_v26 }
 0x467   :  { %3869 = vmatpush1.bf16.msra.mxu1 %v8834_v32  ;;  %v2439_v32 = vld [vmem:[#allocation2 + $0x3] ss:$8 sm:$0x30] }
 0x468   :  { %3870 = vmatprep.subr.bf16.mxu1 %v8839_v38  ;;  %v2438_v38 = vld [vmem:[#allocation2 + $0x3] ss:$8 sm:$0xf] }
 0x469   :  { %3846 = vmatpush1.bf16.msra.mxu0 %v8938_v15 }
 0x46a   :  { %3847 = vmatprep.subr.bf16.mxu0 %v8944_v34 }
 0x46b   :  { %3871 = vmatpush1.bf16.msra.mxu1 %v8846_v50 }
 0x46c   :  { %3872 = vmatprep.subr.bf16.mxu1 %v8851_v57 }
 0x46f   :  { %3873 = vmatpush1.bf16.msra.mxu1 %v8858_v53 }
 0x470   :  { %3874 = vmatprep.subr.bf16.mxu1 %v8863_v5 }
 0x473   :  { %3875 = vmatpush1.bf16.msra.mxu1 %v8870_v60 }
 0x474   :  { %3876 = vmatprep.subr.bf16.mxu1 %v8879_v44 }
 0x477   :  { %3877 = vmatpush1.bf16.msra.mxu1 %v8882_v56 }
 0x478   :  { %3878 = vmatprep.subr.bf16.mxu1 %v8891_v1 }
 0x47b   :  { %3879 = vmatpush1.bf16.msra.mxu1 %v8894_v25 }
 0x47c   :  { %3880 = vmatprep.subr.bf16.mxu1 %v8903_v47  ;;  %v8966_v47 = vld [vmem:[#allocation5 + $0x2d8] ss:$24 sps:$4 sm:$0xff]  }
 0x47d   :  { %9829 = vst [vmem:[#allocation38_spill] sm:$0xff] %v8966_v47 }
 0x47f   :  { %3881 = vmatpush1.bf16.msra.mxu1 %v8906_v23  ;;  %v8959_v23 = vld [vmem:[#allocation5 + $0x2dc] ss:$24 sps:$4 sm:$0xff]  }
 0x480   :  { %3882 = vmatprep.subr.bf16.mxu1 %v8915_v31  ;;  %v8950_v31 = vld [vmem:[#allocation5 + $0x2a0] ss:$24 sps:$4 sm:$0xff]   ;;  %9828 = vst [vmem:[#allocation37_spill] sm:$0xff] %v8959_v23 }
 0x481   :  { %3848 = vmatpush1.bf16.msra.mxu0 %v8950_v31 }
 0x483   :  { %3883 = vmatpush1.bf16.msra.mxu1 %v8918_v49  ;;  %v8947_v49 = vld [vmem:[#allocation5 + $0x2ac] ss:$24 sps:$4 sm:$0xff]  }
 0x484   :  { %3884 = vmatprep.subr.bf16.mxu1 %v8929_v2  ;;  %9826 = vst [vmem:[#allocation35_spill] sm:$0xff] %v8947_v49  ;;  %v8954_v2 = vld [vmem:[#allocation5 + $0x2a8] ss:$24 sps:$4 sm:$0xff]  }
 0x485   :  { %9827 = vst [vmem:[#allocation36_spill] sm:$0xff] %v8954_v2 }
 0x487   :  { %3885 = vmatpush1.bf16.msra.mxu1 %v8927_v6  ;;  %v8956_v6 = vld [vmem:[#allocation5 + $0x2d4] ss:$24 sps:$4 sm:$0xff]  }
 0x488   :  { %3886 = vmatprep.subr.bf16.mxu1 %v8934_v7  ;;  %v8962_v7 = vld [vmem:[#allocation5 + $0x2d0] ss:$24 sps:$4 sm:$0xff]   ;;  %3849 = vmatprep.subr.bf16.mxu0 %v8956_v6 }
 0x489   :  { %3850 = vmatpush1.bf16.msra.mxu0 %v8962_v7 }
 0x48b   :  { %3887 = vmatpush1.bf16.msra.mxu1 %v8942_v54  ;;  %v8971_v54 = vld [vmem:[#allocation5 + $0x14] ss:$24 sps:$4 sm:$0xff]  }
 0x48c   :  { %3888 = vmatprep.subr.bf16.mxu1 %v8947_v49  ;;  %3901 = vmatprep.subr.bf16.mxu0 %v8971_v54 }
 0x48f   :  { %3889 = vmatpush1.bf16.msra.mxu1 %v8954_v2 }
 0x490   :  { %3890 = vmatprep.subr.bf16.mxu1 %v8959_v23 }
 0x493   :  { %3891 = vmatpush1.bf16.msra.mxu1 %v8966_v47 }
 0x494   :  { %4608 = vmatprep.subr.bf16.mxu1 %v8781_v52  ;;  %v2440_v52 = vor.u32 %v2439_v32, %v2438_v38 }
 0x4e9   :  { %v3064_v49 = vpop.f32.mrb[16].mxu1  ;;  %v3105_v25 = vpop.f32.mrb[20].mxu0 }
 0x4ea   :  { %v3066_v1 = vpop.f32.mrb[17].mxu1  ;;  %v3107_v2 = vpop.f32.mrb[21].mxu0 }
 0x4eb   :  { %v3157_v56 = vcombine.low %v3064_v49, %v3066_v1  ;;  %v3158_v44 = vcombine.low %v3105_v25, %v3107_v2  ;;  %v3068_v60 = vpop.f32.mrb[18].mxu1  ;;  %v3109_v5 = vpop.f32.mrb[22].mxu0 }
 0x4ec   :  { %v3069_v53 = vpop.f32.mrb[19].mxu1  ;;  %v3110_v23 = vpop.f32.mrb[23].mxu0 }
 0x4ed   :  { %v3165_v57 = vrot.slane %v3157_v56, %v8286_v48  ;;  %v3172_v47 = vrot.slane %v3158_v44, %v8286_v48  ;;  %v3212_v23 = vrot.slane %v2440_v52, 4 }
 0x4ef   :  { %v3173_v50 = vcombine.low %v3165_v57, %v3172_v47 }
 0x4f1   :  { %v3180_v24 = vrot.slane %v3173_v50, %v8286_v48 }
 0x4f3   :  { %v3182_v16 = vadd.f32 %v3180_v24, %v2440_v52 }
 0x4f5   :  { %v3183_v1 = vadd.f32 %v8978_v8, %v3182_v16 }
 0x4f7   :  { %v6785_v25 = vmul.f32 -1.442695, %v3183_v1 }
 0x4f9   :  { %7775 = vpow2.f32 %v6785_v25 }
 0x503   :  { %v7776_v5 = vpop.eup %7775 }
 0x504   :  { %v3187_v53 = vadd.f32 1.0, %v7776_v5 }
 0x506   :  { %7777 = vrcp.f32 %v3187_v53 }
 0x510   :  { %v7778_v16 = vpop.eup %7777 }
 0x511   :  { %v3217_v1 = vrot.slane %v7778_v16, 2 }
 0x513   :  { %v3219_v25 = vsub.f32 1.0, %v3217_v1 }
 0x529   :  { %v3146_v60 = vpop.f32.mrb[20].mxu1 }
 0x52a   :  { %v3190_v56 = vadd.f32 %v3146_v60, %v8297_v41  ;;  %v3148_v44 = vpop.f32.mrb[21].mxu1  ;;  %v3221_v60 = vmul.f32 %v3217_v1, %v8739_v63  ;;  %v9004_v63 = vld [vmem:[#allocation5 + $0x40] ss:$24 sps:$4 sm:$0xff]   ;;  %v9847_v1 = vld [vmem:[#allocation30_spill] sm:$0xff] }
 0x52b   :  { %v3191_v57 = vadd.f32 %v3148_v44, %v8300_v43  ;;  %v3150_v47 = vpop.f32.mrb[22].mxu1 }
 0x52c   :  { %v3151_v32 = vpop.f32.mrb[23].mxu1 }
 0x52d   :  { %v3194_v38 = vcombine.low %v3190_v56, %v3191_v57  ;;  %v8995_v57 = vld [vmem:[#allocation5 + $0x10] ss:$24 sps:$4 sm:$0xff]   ;;  %v8999_v32 = vld [vmem:[#allocation5 + $0x44] ss:$24 sps:$4 sm:$0xff]  }
 0x52f   :  { %v3201_v24 = vrot.slane %v3194_v38, %v8286_v48  ;;  %v9007_v38 = vld [vmem:[#allocation5 + $0x74] ss:$24 sps:$4 sm:$0xff]  }
 0x531   :  { %v3208_v50 = vrot.slane %v3201_v24, %v8286_v48  ;;  %v9012_v24 = vld [vmem:[#allocation5 + $0x70] ss:$24 sps:$4 sm:$0xff]  }
 0x533   :  { %v3210_v49 = vmul.f32 %v7778_v16, %v3208_v50  ;;  %v9015_v50 = vld [vmem:[#allocation5 + $0xa4] ss:$24 sps:$4 sm:$0xff]   ;;  %v9844_v16 = vld [vmem:[#allocation27_spill] sm:$0xff] }
 0x535   :  { %v3214_v2 = vadd.f32 %v3212_v23, %v3210_v49  ;;  %v9020_v23 = vld [vmem:[#allocation5 + $0xa0] ss:$24 sps:$4 sm:$0xff]  }
 0x536   :  { %v9845_v49 = vld [vmem:[#allocation28_spill] sm:$0xff] }
 0x537   :  { %7779 = vtanh.f32 %v3214_v2  ;;  %v9846_v2 = vld [vmem:[#allocation29_spill] sm:$0xff] }
 0x541   :  { %v7780_v5 = vpop.eup %7779 }
 0x542   :  { %v3220_v53 = vmul.f32 %v7780_v5, %v3219_v25  ;;  %v9848_v25 = vld [vmem:[#allocation32_spill] sm:$0xff]  ;;  %v9849_v5 = vld [vmem:[#allocation31_spill] sm:$0xff] }
 0x544   :  { %v8986_v41 = vadd.f32 %v3221_v60, %v3220_v53  ;;  %v9850_v53 = vld [vmem:[#allocation34_spill] sm:$0xff]  ;;  %v9851_v60 = vld [vmem:[#allocation33_spill] sm:$0xff] }
 0x546   :  { %3224 = vst.msk [vmem:[#allocation8 + $0x3] ss:$8 sm:$0x3] %vm8310_vm0, %v8986_v41  ;;  %v3238_v56 = vrot.slane %v8986_v41, %v8062_v46  ;;  %v3234_v52 = vrot.slane %v8986_v41, %v8115_v3 }
 0x548   :  { %v3242_v44 = vpack.c.bf16 %v3238_v56, %v3238_v56  ;;  %v8997_v47 = vpack.c.bf16 %v3234_v52, %v3234_v52  ;;  %v9852_v56 = vld [vmem:[#allocation35_spill] sm:$0xff]  ;;  %v9853_v52 = vld [vmem:[#allocation36_spill] sm:$0xff] }
 0x54a   :  { %3851 = vmatprep.mubr.bf16.mxu0 %v3242_v44  ;;  %3892 = vmatprep.mubr.bf16.mxu1 %v3242_v44 }
 0x54b   :  { %3852 = vmatmul.mubr.bf16.vlgmr.msra.gmra.mrb[24].mxu0 %v8997_v47  ;;  %3893 = vmatmul.mubr.bf16.vlgmr.msra.gmra.mrb[24].mxu1 %v8997_v47 }
 0x54c   :  { %3902 = vmatpush1.bf16.msra.mxu0 %v8995_v57  ;;  %3933 = vmatprep.mubr.bf16.mxu0 %v3242_v44  ;;  %v9854_v44 = vld [vmem:[#allocation37_spill] sm:$0xff] }
 0x54d   :  { %3903 = vmatprep.subr.bf16.mxu0 %v8999_v32  ;;  %4609 = vmatpush1.bf16.msra.mxu1 %v8779_v39  ;;  %v9023_v39 = vld [vmem:[#allocation5 + $0xd4] ss:$24 sps:$4 sm:$0xff]  }
 0x54e   :  { %4610 = vmatprep.subr.bf16.mxu1 %v8787_v51  ;;  %v9028_v51 = vld [vmem:[#allocation5 + $0xd0] ss:$24 sps:$4 sm:$0xff]  }
 0x550   :  { %3904 = vmatpush1.bf16.msra.mxu0 %v9004_v63 }
 0x551   :  { %3905 = vmatprep.subr.bf16.mxu0 %v9007_v38  ;;  %4611 = vmatpush1.bf16.msra.mxu1 %v8794_v18  ;;  %v9031_v18 = vld [vmem:[#allocation5 + $0x104] ss:$24 sps:$4 sm:$0xff]  }
 0x552   :  { %4612 = vmatprep.subr.bf16.mxu1 %v8800_v36  ;;  %v9036_v36 = vld [vmem:[#allocation5 + $0x100] ss:$24 sps:$4 sm:$0xff]  }
 0x554   :  { %3906 = vmatpush1.bf16.msra.mxu0 %v9012_v24 }
 0x555   :  { %3907 = vmatprep.subr.bf16.mxu0 %v9015_v50  ;;  %4613 = vmatpush1.bf16.msra.mxu1 %v8806_v0  ;;  %v9039_v0 = vld [vmem:[#allocation5 + $0x134] ss:$24 sps:$4 sm:$0xff]  }
 0x556   :  { %4614 = vmatprep.subr.bf16.mxu1 %v8812_v4  ;;  %v9044_v4 = vld [vmem:[#allocation5 + $0x130] ss:$24 sps:$4 sm:$0xff]  }
 0x558   :  { %3908 = vmatpush1.bf16.msra.mxu0 %v9020_v23 }
 0x559   :  { %3909 = vmatprep.subr.bf16.mxu0 %v9023_v39  ;;  %4615 = vmatpush1.bf16.msra.mxu1 %v8818_v12  ;;  %v9047_v12 = vld [vmem:[#allocation5 + $0x164] ss:$24 sps:$4 sm:$0xff]  }
 0x55a   :  { %4616 = vmatprep.subr.bf16.mxu1 %v8824_v20  ;;  %v9052_v20 = vld [vmem:[#allocation5 + $0x160] ss:$24 sps:$4 sm:$0xff]  }
 0x55c   :  { %3910 = vmatpush1.bf16.msra.mxu0 %v9028_v51 }
 0x55d   :  { %3911 = vmatprep.subr.bf16.mxu0 %v9031_v18  ;;  %4617 = vmatpush1.bf16.msra.mxu1 %v8830_v28  ;;  %v9055_v28 = vld [vmem:[#allocation5 + $0x194] ss:$24 sps:$4 sm:$0xff]  }
 0x55e   :  { %4618 = vmatprep.subr.bf16.mxu1 %v8836_v35  ;;  %v9060_v35 = vld [vmem:[#allocation5 + $0x190] ss:$24 sps:$4 sm:$0xff]  }
 0x560   :  { %3912 = vmatpush1.bf16.msra.mxu0 %v9036_v36 }
 0x561   :  { %3913 = vmatprep.subr.bf16.mxu0 %v9039_v0  ;;  %4619 = vmatpush1.bf16.msra.mxu1 %v8842_v42  ;;  %v9063_v42 = vld [vmem:[#allocation5 + $0x1c4] ss:$24 sps:$4 sm:$0xff]  }
 0x562   :  { %4620 = vmatprep.subr.bf16.mxu1 %v8848_v45  ;;  %v9068_v45 = vld [vmem:[#allocation5 + $0x1c0] ss:$24 sps:$4 sm:$0xff]  }
 0x564   :  { %3914 = vmatpush1.bf16.msra.mxu0 %v9044_v4 }
 0x565   :  { %3915 = vmatprep.subr.bf16.mxu0 %v9047_v12  ;;  %4621 = vmatpush1.bf16.msra.mxu1 %v8854_v59  ;;  %v9071_v59 = vld [vmem:[#allocation5 + $0x1f4] ss:$24 sps:$4 sm:$0xff]  }
 0x566   :  { %4622 = vmatprep.subr.bf16.mxu1 %v8860_v40  ;;  %v9076_v40 = vld [vmem:[#allocation5 + $0x1f0] ss:$24 sps:$4 sm:$0xff]  }
 0x568   :  { %3916 = vmatpush1.bf16.msra.mxu0 %v9052_v20 }
 0x569   :  { %3917 = vmatprep.subr.bf16.mxu0 %v9055_v28  ;;  %4623 = vmatpush1.bf16.msra.mxu1 %v8866_v9  ;;  %v9079_v9 = vld [vmem:[#allocation5 + $0x224] ss:$24 sps:$4 sm:$0xff]  }
 0x56a   :  { %4624 = vmatprep.subr.bf16.mxu1 %v8875_v21  ;;  %v9084_v21 = vld [vmem:[#allocation5 + $0x220] ss:$24 sps:$4 sm:$0xff]  }
 0x56c   :  { %3918 = vmatpush1.bf16.msra.mxu0 %v9060_v35 }
 0x56d   :  { %3919 = vmatprep.subr.bf16.mxu0 %v9063_v42  ;;  %4625 = vmatpush1.bf16.msra.mxu1 %v8877_v37  ;;  %v9087_v37 = vld [vmem:[#allocation5 + $0x254] ss:$24 sps:$4 sm:$0xff]  }
 0x56e   :  { %4626 = vmatprep.subr.bf16.mxu1 %v8887_v55  ;;  %v9092_v55 = vld [vmem:[#allocation5 + $0x250] ss:$24 sps:$4 sm:$0xff]  }
 0x570   :  { %3920 = vmatpush1.bf16.msra.mxu0 %v9068_v45 }
 0x571   :  { %3921 = vmatprep.subr.bf16.mxu0 %v9071_v59  ;;  %4627 = vmatpush1.bf16.msra.mxu1 %v8889_v58  ;;  %v9095_v58 = vld [vmem:[#allocation5 + $0x284] ss:$24 sps:$4 sm:$0xff]  }
 0x572   :  { %4628 = vmatprep.subr.bf16.mxu1 %v8899_v62  ;;  %v9100_v62 = vld [vmem:[#allocation5 + $0x280] ss:$24 sps:$4 sm:$0xff]  }
 0x574   :  { %3922 = vmatpush1.bf16.msra.mxu0 %v9076_v40 }
 0x575   :  { %3923 = vmatprep.subr.bf16.mxu0 %v9079_v9  ;;  %4629 = vmatpush1.bf16.msra.mxu1 %v8901_v19  ;;  %v9103_v19 = vld [vmem:[#allocation5 + $0x2b4] ss:$24 sps:$4 sm:$0xff]  }
 0x576   :  { %4630 = vmatprep.subr.bf16.mxu1 %v8911_v29  ;;  %v9108_v29 = vld [vmem:[#allocation5 + $0x2b0] ss:$24 sps:$4 sm:$0xff]  }
 0x578   :  { %3924 = vmatpush1.bf16.msra.mxu0 %v9084_v21 }
 0x579   :  { %3925 = vmatprep.subr.bf16.mxu0 %v9087_v37  ;;  %4631 = vmatpush1.bf16.msra.mxu1 %v8913_v11  ;;  %v9111_v11 = vld [vmem:[#allocation5 + $0x2e4] ss:$24 sps:$4 sm:$0xff]  }
 0x57a   :  { %4632 = vmatprep.subr.bf16.mxu1 %v8924_v10  ;;  %v9116_v10 = vld [vmem:[#allocation5 + $0x2e0] ss:$24 sps:$4 sm:$0xff]  }
 0x57c   :  { %3926 = vmatpush1.bf16.msra.mxu0 %v9092_v55 }
 0x57d   :  { %3927 = vmatprep.subr.bf16.mxu0 %v9095_v58  ;;  %4633 = vmatpush1.bf16.msra.mxu1 %v8922_v22  ;;  %v9831_v22 = vld [vmem:[#allocation14_spill] sm:$0xff] }
 0x57e   :  { %4634 = vmatprep.subr.bf16.mxu1 %v8931_v26  ;;  %v9834_v26 = vld [vmem:[#allocation17_spill] sm:$0xff] }
 0x580   :  { %3928 = vmatpush1.bf16.msra.mxu0 %v9100_v62 }
 0x581   :  { %3929 = vmatprep.subr.bf16.mxu0 %v9103_v19  ;;  %4635 = vmatpush1.bf16.msra.mxu1 %v8938_v15  ;;  %v9841_v15 = vld [vmem:[#allocation24_spill] sm:$0xff] }
 0x582   :  { %4636 = vmatprep.subr.bf16.mxu1 %v8944_v34  ;;  %v9843_v34 = vld [vmem:[#allocation26_spill] sm:$0xff] }
 0x584   :  { %3930 = vmatpush1.bf16.msra.mxu0 %v9108_v29 }
 0x585   :  { %3931 = vmatprep.subr.bf16.mxu0 %v9111_v11  ;;  %4637 = vmatpush1.bf16.msra.mxu1 %v8950_v31  ;;  %v9830_v31 = vld [vmem:[#allocation13_spill] sm:$0xff] }
 0x586   :  { %4638 = vmatprep.subr.bf16.mxu1 %v8956_v6  ;;  %v9833_v6 = vld [vmem:[#allocation16_spill] sm:$0xff] }
 0x588   :  { %3932 = vmatpush1.bf16.msra.mxu0 %v9116_v10 }
 0x589   :  { %4649 = vmatprep.subr.bf16.mxu0 %v8785_v17  ;;  %4639 = vmatpush1.bf16.msra.mxu1 %v8962_v7  ;;  %v9832_v17 = vld [vmem:[#allocation15_spill] sm:$0xff]  ;;  %v9835_v7 = vld [vmem:[#allocation18_spill] sm:$0xff] }
 0x58a   :  { %4690 = vmatprep.subr.bf16.mxu1 %v8971_v54  ;;  %v9842_v54 = vld [vmem:[#allocation25_spill] sm:$0xff] }
 0x58b   :  { %3934 = vmatmul.mubr.bf16.vlgmr.msra.gmra.mrb[28].mxu0 %v8997_v47  ;;  %v9855_v47 = vld [vmem:[#allocation38_spill] sm:$0xff] }
 0x58c   :  { %4650 = vmatpush1.bf16.msra.mxu0 %v8783_v30  ;;  %v9836_v30 = vld [vmem:[#allocation19_spill] sm:$0xff] }
 0x58d   :  { %4651 = vmatprep.subr.bf16.mxu0 %v8790_v61  ;;  %v9837_v61 = vld [vmem:[#allocation20_spill] sm:$0xff] }
 0x590   :  { %4652 = vmatpush1.bf16.msra.mxu0 %v8798_v14  ;;  %v9838_v14 = vld [vmem:[#allocation21_spill] sm:$0xff] }
 0x591   :  { %4653 = vmatprep.subr.bf16.mxu0 %v8803_v27  ;;  %v9839_v27 = vld [vmem:[#allocation22_spill] sm:$0xff] }
 0x594   :  { %4654 = vmatpush1.bf16.msra.mxu0 %v8810_v33  ;;  %v9840_v33 = vld [vmem:[#allocation23_spill] sm:$0xff] }
 0x595   :  { %4655 = vmatprep.subr.bf16.mxu0 %v9830_v31 }
 0x598   :  { %4656 = vmatpush1.bf16.msra.mxu0 %v9831_v22 }
 0x599   :  { %4657 = vmatprep.subr.bf16.mxu0 %v9832_v17 }
 0x59c   :  { %4658 = vmatpush1.bf16.msra.mxu0 %v9833_v6 }
 0x59d   :  { %4659 = vmatprep.subr.bf16.mxu0 %v9834_v26 }
 0x5a0   :  { %4660 = vmatpush1.bf16.msra.mxu0 %v9835_v7 }
 0x5a1   :  { %4661 = vmatprep.subr.bf16.mxu0 %v9836_v30 }
 0x5a4   :  { %4662 = vmatpush1.bf16.msra.mxu0 %v9837_v61 }
 0x5a5   :  { %4663 = vmatprep.subr.bf16.mxu0 %v9838_v14 }
 0x5a8   :  { %4664 = vmatpush1.bf16.msra.mxu0 %v9839_v27 }
 0x5a9   :  { %4665 = vmatprep.subr.bf16.mxu0 %v9840_v33 }
 0x5ac   :  { %4666 = vmatpush1.bf16.msra.mxu0 %v9841_v15 }
 0x5ad   :  { %4667 = vmatprep.subr.bf16.mxu0 %v9842_v54 }
 0x5b0   :  { %4668 = vmatpush1.bf16.msra.mxu0 %v9843_v34  ;;  %v3227_v34 = vld [vmem:[#allocation2 + $0x4] ss:$8 sm:$0xf] }
 0x5b1   :  { %4669 = vmatprep.subr.bf16.mxu0 %v9844_v16  ;;  %v3228_v16 = vld [vmem:[#allocation2 + $0x4] ss:$8 sm:$0x30] }
 0x5b4   :  { %4670 = vmatpush1.bf16.msra.mxu0 %v9845_v49  ;;  %v3229_v49 = vor.u32 %v3228_v16, %v3227_v34 }
 0x5b5   :  { %4671 = vmatprep.subr.bf16.mxu0 %v9846_v2 }
 0x5b8   :  { %4672 = vmatpush1.bf16.msra.mxu0 %v9847_v1 }
 0x5b9   :  { %4673 = vmatprep.subr.bf16.mxu0 %v9848_v25 }
 0x5bc   :  { %4674 = vmatpush1.bf16.msra.mxu0 %v9849_v5 }
 0x5bd   :  { %4675 = vmatprep.subr.bf16.mxu0 %v9850_v53 }
 0x5c0   :  { %4676 = vmatpush1.bf16.msra.mxu0 %v9851_v60 }
 0x5c1   :  { %4677 = vmatprep.subr.bf16.mxu0 %v9852_v56 }
 0x5c4   :  { %4678 = vmatpush1.bf16.msra.mxu0 %v9853_v52  ;;  %v9856_v52 = vld [vmem:[#allocation12_spill] sm:$0xff] }
 0x5c5   :  { %4679 = vmatprep.subr.bf16.mxu0 %v9854_v44 }
 0x5c8   :  { %4680 = vmatpush1.bf16.msra.mxu0 %v9855_v47 }
 0x61e   :  { %v3853_v31 = vpop.f32.mrb[24].mxu0  ;;  %v3894_v22 = vpop.f32.mrb[24].mxu1 }
 0x61f   :  { %v3855_v17 = vpop.f32.mrb[25].mxu0  ;;  %v3896_v6 = vpop.f32.mrb[25].mxu1 }
 0x620   :  { %v3946_v26 = vcombine.low %v3853_v31, %v3855_v17  ;;  %v3947_v7 = vcombine.low %v3894_v22, %v3896_v6  ;;  %v3857_v30 = vpop.f32.mrb[26].mxu0  ;;  %v3898_v61 = vpop.f32.mrb[26].mxu1 }
 0x621   :  { %v3858_v14 = vpop.f32.mrb[27].mxu0  ;;  %v3899_v27 = vpop.f32.mrb[27].mxu1  ;;  %v4001_v30 = vrot.slane %v3229_v49, 4 }
 0x622   :  { %v3954_v33 = vrot.slane %v3946_v26, %v8286_v48  ;;  %v3961_v15 = vrot.slane %v3947_v7, %v8286_v48 }
 0x624   :  { %v3962_v54 = vcombine.low %v3954_v33, %v3961_v15 }
 0x626   :  { %v3969_v2 = vrot.slane %v3962_v54, %v8286_v48 }
 0x628   :  { %v3971_v1 = vadd.f32 %v3969_v2, %v3229_v49 }
 0x62a   :  { %v3972_v25 = vadd.f32 %v8978_v8, %v3971_v1 }
 0x62c   :  { %v6882_v5 = vmul.f32 -1.442695, %v3972_v25 }
 0x62e   :  { %7781 = vpow2.f32 %v6882_v5 }
 0x638   :  { %v7782_v53 = vpop.eup %7781 }
 0x639   :  { %v3976_v60 = vadd.f32 1.0, %v7782_v53  ;;  %v9302_v53 = vld [vmem:[#allocation5 + $0x184] ss:$24 sps:$4 sm:$0xff]  }
 0x63b   :  { %7783 = vrcp.f32 %v3976_v60  ;;  %v9304_v60 = vld [vmem:[#allocation5 + $0x180] ss:$24 sps:$4 sm:$0xff]  }
 0x645   :  { %v7784_v61 = vpop.eup %7783 }
 0x646   :  { %v4006_v33 = vrot.slane %v7784_v61, 2 }
 0x648   :  { %v4008_v15 = vsub.f32 1.0, %v4006_v33  ;;  %v4010_v16 = vmul.f32 %v4006_v33, %v8986_v41  ;;  %v9206_v41 = vld [vmem:[#allocation5] ss:$24 sps:$4 sm:$0xff]  }
 0x649   :  { %v9345_v33 = vld [vmem:[#allocation5 + $0x218] ss:$24 sps:$4 sm:$0xff]  }
 0x64a   :  { %9876 = vst [vmem:[#allocation30_spill] sm:$0xff] %v9345_v33 }
 0x65e   :  { %v3935_v56 = vpop.f32.mrb[28].mxu0 }
 0x65f   :  { %v3979_v44 = vadd.f32 %v3935_v56, %v9856_v52  ;;  %v3937_v47 = vpop.f32.mrb[29].mxu0  ;;  %v9306_v56 = vld [vmem:[#allocation5 + $0x18c] ss:$24 sps:$4 sm:$0xff]  }
 0x660   :  { %v3980_v31 = vadd.f32 %v3937_v47, %v8300_v43  ;;  %v3939_v22 = vpop.f32.mrb[30].mxu0  ;;  %9869 = vst [vmem:[#allocation23_spill] sm:$0xff] %v9306_v56  ;;  %v9314_v47 = vld [vmem:[#allocation5 + $0x1b4] ss:$24 sps:$4 sm:$0xff]  }
 0x661   :  { %v3940_v17 = vpop.f32.mrb[31].mxu0  ;;  %v9318_v22 = vld [vmem:[#allocation5 + $0x1bc] ss:$24 sps:$4 sm:$0xff]  }
 0x662   :  { %v3983_v6 = vcombine.low %v3979_v44, %v3980_v31  ;;  %v9309_v44 = vld [vmem:[#allocation5 + $0x188] ss:$24 sps:$4 sm:$0xff]   ;;  %9871 = vst [vmem:[#allocation25_spill] sm:$0xff] %v9318_v22  ;;  %v9321_v17 = vld [vmem:[#allocation5 + $0x1b8] ss:$24 sps:$4 sm:$0xff]  }
 0x663   :  { %9870 = vst [vmem:[#allocation24_spill] sm:$0xff] %v9309_v44  ;;  %v9316_v31 = vld [vmem:[#allocation5 + $0x1b0] ss:$24 sps:$4 sm:$0xff]   ;;  %9872 = vst [vmem:[#allocation26_spill] sm:$0xff] %v9321_v17 }
 0x664   :  { %v3990_v26 = vrot.slane %v3983_v6, %v8286_v48  ;;  %v9326_v6 = vld [vmem:[#allocation5 + $0x1e4] ss:$24 sps:$4 sm:$0xff]  }
 0x666   :  { %v3997_v7 = vrot.slane %v3990_v26, %v8286_v48  ;;  %v9328_v26 = vld [vmem:[#allocation5 + $0x1e0] ss:$24 sps:$4 sm:$0xff]  }
 0x668   :  { %v3999_v14 = vmul.f32 %v7784_v61, %v3997_v7  ;;  %v9330_v7 = vld [vmem:[#allocation5 + $0x1ec] ss:$24 sps:$4 sm:$0xff]  }
 0x669   :  { %9873 = vst [vmem:[#allocation27_spill] sm:$0xff] %v9330_v7  ;;  %v9338_v61 = vld [vmem:[#allocation5 + $0x214] ss:$24 sps:$4 sm:$0xff]  }
 0x66a   :  { %v4003_v27 = vadd.f32 %v4001_v30, %v3999_v14  ;;  %v9333_v30 = vld [vmem:[#allocation5 + $0x1e8] ss:$24 sps:$4 sm:$0xff]  }
 0x66b   :  { %9874 = vst [vmem:[#allocation28_spill] sm:$0xff] %v9333_v30  ;;  %v9340_v14 = vld [vmem:[#allocation5 + $0x210] ss:$24 sps:$4 sm:$0xff]  }
 0x66c   :  { %7785 = vtanh.f32 %v4003_v27  ;;  %v9342_v27 = vld [vmem:[#allocation5 + $0x21c] ss:$24 sps:$4 sm:$0xff]  }
 0x66d   :  { %9875 = vst [vmem:[#allocation29_spill] sm:$0xff] %v9342_v27 }
 0x676   :  { %v7786_v54 = vpop.eup %7785 }
 0x677   :  { %v4009_v34 = vmul.f32 %v7786_v54, %v4008_v15  ;;  %v9349_v15 = vld [vmem:[#allocation5 + $0x240] ss:$24 sps:$4 sm:$0xff]   ;;  %v9351_v54 = vld [vmem:[#allocation5 + $0x244] ss:$24 sps:$4 sm:$0xff]  }
 0x679   :  { %v9166_v2 = vadd.f32 %v4010_v16, %v4009_v34  ;;  %v9354_v34 = vld [vmem:[#allocation5 + $0x248] ss:$24 sps:$4 sm:$0xff]   ;;  %v9356_v16 = vld [vmem:[#allocation5 + $0x24c] ss:$24 sps:$4 sm:$0xff]  }
 0x67a   :  { %9877 = vst [vmem:[#allocation32_spill] sm:$0xff] %v9354_v34  ;;  %9878 = vst [vmem:[#allocation31_spill] sm:$0xff] %v9356_v16 }
 0x67b   :  { %4013 = vst.msk [vmem:[#allocation8 + $0x4] ss:$8 sm:$0x3] %vm8310_vm0, %v9166_v2  ;;  %v4027_v1 = vrot.slane %v9166_v2, %v8062_v46  ;;  %v4023_v49 = vrot.slane %v9166_v2, %v8115_v3 }
 0x67d   :  { %v4031_v25 = vpack.c.bf16 %v4027_v1, %v4027_v1  ;;  %v4030_v5 = vpack.c.bf16 %v4023_v49, %v4023_v49  ;;  %v9358_v1 = vld [vmem:[#allocation5 + $0x274] ss:$24 sps:$4 sm:$0xff]  }
 0x67e   :  { %v9361_v49 = vld [vmem:[#allocation5 + $0x27c] ss:$24 sps:$4 sm:$0xff]  }
 0x67f   :  { %4640 = vmatprep.mubr.bf16.mxu1 %v4031_v25  ;;  %4681 = vmatprep.mubr.bf16.mxu0 %v4031_v25  ;;  %9879 = vst [vmem:[#allocation34_spill] sm:$0xff] %v9361_v49 }
 0x680   :  { %4641 = vmatmul.mubr.bf16.vlgmr.msra.gmra.mrb[28].mxu1 %v4030_v5  ;;  %4682 = vmatmul.mubr.bf16.vlgmr.msra.gmra.mrb[32].mxu0 %v4030_v5 }
 0x681   :  { %4691 = vmatpush1.bf16.msra.mxu1 %v8995_v57  ;;  %4722 = vmatprep.mubr.bf16.mxu1 %v4031_v25  ;;  %v9208_v57 = vld [vmem:[#allocation5 + $0x4] ss:$24 sps:$4 sm:$0xff]   ;;  %v9365_v25 = vld [vmem:[#allocation5 + $0x270] ss:$24 sps:$4 sm:$0xff]  }
 0x682   :  { %4692 = vmatprep.subr.bf16.mxu1 %v8999_v32  ;;  %v9210_v32 = vld [vmem:[#allocation5 + $0x8] ss:$24 sps:$4 sm:$0xff]   ;;  %5397 = vmatprep.subr.bf16.mxu0 %v9208_v57 }
 0x683   :  { %5398 = vmatpush1.bf16.msra.mxu0 %v9206_v41 }
 0x685   :  { %4693 = vmatpush1.bf16.msra.mxu1 %v9004_v63  ;;  %v9212_v63 = vld [vmem:[#allocation5 + $0xc] ss:$24 sps:$4 sm:$0xff]  }
 0x686   :  { %4694 = vmatprep.subr.bf16.mxu1 %v9007_v38  ;;  %v9214_v38 = vld [vmem:[#allocation5 + $0x34] ss:$24 sps:$4 sm:$0xff]  }
 0x687   :  { %5399 = vmatprep.subr.bf16.mxu0 %v9214_v38 }
 0x689   :  { %4695 = vmatpush1.bf16.msra.mxu1 %v9012_v24  ;;  %v9217_v24 = vld [vmem:[#allocation5 + $0x3c] ss:$24 sps:$4 sm:$0xff]  }
 0x68a   :  { %4696 = vmatprep.subr.bf16.mxu1 %v9015_v50  ;;  %v9221_v50 = vld [vmem:[#allocation5 + $0x30] ss:$24 sps:$4 sm:$0xff]  }
 0x68b   :  { %5400 = vmatpush1.bf16.msra.mxu0 %v9221_v50 }
 0x68d   :  { %4697 = vmatpush1.bf16.msra.mxu1 %v9020_v23  ;;  %v9225_v23 = vld [vmem:[#allocation5 + $0x38] ss:$24 sps:$4 sm:$0xff]  }
 0x68e   :  { %4698 = vmatprep.subr.bf16.mxu1 %v9023_v39  ;;  %v9227_v39 = vld [vmem:[#allocation5 + $0x64] ss:$24 sps:$4 sm:$0xff]  }
 0x68f   :  { %5401 = vmatprep.subr.bf16.mxu0 %v9227_v39 }
 0x691   :  { %4699 = vmatpush1.bf16.msra.mxu1 %v9028_v51  ;;  %v9230_v51 = vld [vmem:[#allocation5 + $0x6c] ss:$24 sps:$4 sm:$0xff]  }
 0x692   :  { %4700 = vmatprep.subr.bf16.mxu1 %v9031_v18  ;;  %9857 = vst [vmem:[#allocation39_spill] sm:$0xff] %v9230_v51  ;;  %v9233_v18 = vld [vmem:[#allocation5 + $0x60] ss:$24 sps:$4 sm:$0xff]  }
 0x693   :  { %5402 = vmatpush1.bf16.msra.mxu0 %v9233_v18 }
 0x695   :  { %4701 = vmatpush1.bf16.msra.mxu1 %v9036_v36  ;;  %v9237_v36 = vld [vmem:[#allocation5 + $0x68] ss:$24 sps:$4 sm:$0xff]  }
 0x696   :  { %4702 = vmatprep.subr.bf16.mxu1 %v9039_v0  ;;  %9858 = vst [vmem:[#allocation40_spill] sm:$0xff] %v9237_v36  ;;  %v9239_v0 = vld [vmem:[#allocation5 + $0x94] ss:$24 sps:$4 sm:$0xff]  }
 0x697   :  { %5403 = vmatprep.subr.bf16.mxu0 %v9239_v0 }
 0x699   :  { %4703 = vmatpush1.bf16.msra.mxu1 %v9044_v4  ;;  %v9242_v4 = vld [vmem:[#allocation5 + $0x9c] ss:$24 sps:$4 sm:$0xff]  }
 0x69a   :  { %4704 = vmatprep.subr.bf16.mxu1 %v9047_v12  ;;  %9859 = vst [vmem:[#allocation13_spill] sm:$0xff] %v9242_v4  ;;  %v9245_v12 = vld [vmem:[#allocation5 + $0x90] ss:$24 sps:$4 sm:$0xff]  }
 0x69b   :  { %5404 = vmatpush1.bf16.msra.mxu0 %v9245_v12 }
 0x69d   :  { %4705 = vmatpush1.bf16.msra.mxu1 %v9052_v20  ;;  %v9249_v20 = vld [vmem:[#allocation5 + $0x98] ss:$24 sps:$4 sm:$0xff]  }
 0x69e   :  { %4706 = vmatprep.subr.bf16.mxu1 %v9055_v28  ;;  %9860 = vst [vmem:[#allocation14_spill] sm:$0xff] %v9249_v20  ;;  %v9251_v28 = vld [vmem:[#allocation5 + $0xc4] ss:$24 sps:$4 sm:$0xff]  }
 0x69f   :  { %5405 = vmatprep.subr.bf16.mxu0 %v9251_v28 }
 0x6a1   :  { %4707 = vmatpush1.bf16.msra.mxu1 %v9060_v35  ;;  %v9254_v35 = vld [vmem:[#allocation5 + $0xcc] ss:$24 sps:$4 sm:$0xff]  }
 0x6a2   :  { %4708 = vmatprep.subr.bf16.mxu1 %v9063_v42  ;;  %9861 = vst [vmem:[#allocation15_spill] sm:$0xff] %v9254_v35  ;;  %v9257_v42 = vld [vmem:[#allocation5 + $0xc0] ss:$24 sps:$4 sm:$0xff]  }
 0x6a3   :  { %5406 = vmatpush1.bf16.msra.mxu0 %v9257_v42 }
 0x6a5   :  { %4709 = vmatpush1.bf16.msra.mxu1 %v9068_v45  ;;  %v9261_v45 = vld [vmem:[#allocation5 + $0xc8] ss:$24 sps:$4 sm:$0xff]  }
 0x6a6   :  { %4710 = vmatprep.subr.bf16.mxu1 %v9071_v59  ;;  %9862 = vst [vmem:[#allocation16_spill] sm:$0xff] %v9261_v45  ;;  %v9263_v59 = vld [vmem:[#allocation5 + $0xf4] ss:$24 sps:$4 sm:$0xff]  }
 0x6a7   :  { %5407 = vmatprep.subr.bf16.mxu0 %v9263_v59 }
 0x6a9   :  { %4711 = vmatpush1.bf16.msra.mxu1 %v9076_v40  ;;  %v9266_v40 = vld [vmem:[#allocation5 + $0xfc] ss:$24 sps:$4 sm:$0xff]  }
 0x6aa   :  { %4712 = vmatprep.subr.bf16.mxu1 %v9079_v9  ;;  %9863 = vst [vmem:[#allocation17_spill] sm:$0xff] %v9266_v40  ;;  %v9269_v9 = vld [vmem:[#allocation5 + $0xf0] ss:$24 sps:$4 sm:$0xff]  }
 0x6ab   :  { %5408 = vmatpush1.bf16.msra.mxu0 %v9269_v9 }
 0x6ad   :  { %4713 = vmatpush1.bf16.msra.mxu1 %v9084_v21  ;;  %v9273_v21 = vld [vmem:[#allocation5 + $0xf8] ss:$24 sps:$4 sm:$0xff]  }
 0x6ae   :  { %4714 = vmatprep.subr.bf16.mxu1 %v9087_v37  ;;  %9864 = vst [vmem:[#allocation18_spill] sm:$0xff] %v9273_v21  ;;  %v9275_v37 = vld [vmem:[#allocation5 + $0x124] ss:$24 sps:$4 sm:$0xff]  }
 0x6af   :  { %5409 = vmatprep.subr.bf16.mxu0 %v9275_v37 }
 0x6b1   :  { %4715 = vmatpush1.bf16.msra.mxu1 %v9092_v55  ;;  %v9278_v55 = vld [vmem:[#allocation5 + $0x12c] ss:$24 sps:$4 sm:$0xff]  }
 0x6b2   :  { %4716 = vmatprep.subr.bf16.mxu1 %v9095_v58  ;;  %9865 = vst [vmem:[#allocation19_spill] sm:$0xff] %v9278_v55  ;;  %v9281_v58 = vld [vmem:[#allocation5 + $0x120] ss:$24 sps:$4 sm:$0xff]  }
 0x6b3   :  { %5410 = vmatpush1.bf16.msra.mxu0 %v9281_v58 }
 0x6b5   :  { %4717 = vmatpush1.bf16.msra.mxu1 %v9100_v62  ;;  %v9285_v62 = vld [vmem:[#allocation5 + $0x128] ss:$24 sps:$4 sm:$0xff]  }
 0x6b6   :  { %4718 = vmatprep.subr.bf16.mxu1 %v9103_v19  ;;  %9866 = vst [vmem:[#allocation20_spill] sm:$0xff] %v9285_v62  ;;  %v9287_v19 = vld [vmem:[#allocation5 + $0x154] ss:$24 sps:$4 sm:$0xff]  }
 0x6b7   :  { %5411 = vmatprep.subr.bf16.mxu0 %v9287_v19 }
 0x6b9   :  { %4719 = vmatpush1.bf16.msra.mxu1 %v9108_v29  ;;  %v9290_v29 = vld [vmem:[#allocation5 + $0x15c] ss:$24 sps:$4 sm:$0xff]  }
 0x6ba   :  { %4720 = vmatprep.subr.bf16.mxu1 %v9111_v11  ;;  %9867 = vst [vmem:[#allocation21_spill] sm:$0xff] %v9290_v29  ;;  %v9293_v11 = vld [vmem:[#allocation5 + $0x150] ss:$24 sps:$4 sm:$0xff]  }
 0x6bb   :  { %5412 = vmatpush1.bf16.msra.mxu0 %v9293_v11 }
 0x6bc   :  { %5413 = vmatprep.subr.bf16.mxu0 %v9302_v53 }
 0x6bd   :  { %4721 = vmatpush1.bf16.msra.mxu1 %v9116_v10  ;;  %v9297_v10 = vld [vmem:[#allocation5 + $0x158] ss:$24 sps:$4 sm:$0xff]  }
 0x6be   :  { %5438 = vmatprep.subr.bf16.mxu1 %v9212_v63  ;;  %9868 = vst [vmem:[#allocation22_spill] sm:$0xff] %v9297_v10 }
 0x6bf   :  { %5414 = vmatpush1.bf16.msra.mxu0 %v9304_v60 }
 0x6c0   :  { %4723 = vmatmul.mubr.bf16.vlgmr.msra.gmra.mrb[32].mxu1 %v4030_v5  ;;  %5415 = vmatprep.subr.bf16.mxu0 %v9314_v47  ;;  %v9369_v5 = vld [vmem:[#allocation5 + $0x278] ss:$24 sps:$4 sm:$0xff]  }
 0x6c1   :  { %5439 = vmatpush1.bf16.msra.mxu1 %v9210_v32  ;;  %9880 = vst [vmem:[#allocation33_spill] sm:$0xff] %v9369_v5 }
 0x6c2   :  { %5440 = vmatprep.subr.bf16.mxu1 %v9217_v24 }
 0x6c3   :  { %5416 = vmatpush1.bf16.msra.mxu0 %v9316_v31 }
 0x6c4   :  { %5417 = vmatprep.subr.bf16.mxu0 %v9326_v6 }
 0x6c5   :  { %5441 = vmatpush1.bf16.msra.mxu1 %v9225_v23 }
 0x6c6   :  { %5442 = vmatprep.subr.bf16.mxu1 %v9230_v51 }
 0x6c7   :  { %5418 = vmatpush1.bf16.msra.mxu0 %v9328_v26 }
 0x6c8   :  { %5419 = vmatprep.subr.bf16.mxu0 %v9338_v61 }
 0x6c9   :  { %5443 = vmatpush1.bf16.msra.mxu1 %v9237_v36 }
 0x6ca   :  { %5444 = vmatprep.subr.bf16.mxu1 %v9242_v4 }
 0x6cb   :  { %5420 = vmatpush1.bf16.msra.mxu0 %v9340_v14 }
 0x6cc   :  { %5421 = vmatprep.subr.bf16.mxu0 %v9351_v54 }
 0x6cd   :  { %5445 = vmatpush1.bf16.msra.mxu1 %v9249_v20 }
 0x6ce   :  { %5446 = vmatprep.subr.bf16.mxu1 %v9254_v35  ;;  %v4017_v35 = vld [vmem:[#allocation2 + $0x5] ss:$8 sm:$0x30] }
 0x6cf   :  { %5422 = vmatpush1.bf16.msra.mxu0 %v9349_v15 }
 0x6d0   :  { %5423 = vmatprep.subr.bf16.mxu0 %v9358_v1 }
 0x6d1   :  { %5447 = vmatpush1.bf16.msra.mxu1 %v9261_v45  ;;  %v4016_v45 = vld [vmem:[#allocation2 + $0x5] ss:$8 sm:$0xf] }
 0x6d2   :  { %5448 = vmatprep.subr.bf16.mxu1 %v9266_v40 }
 0x6d3   :  { %5424 = vmatpush1.bf16.msra.mxu0 %v9365_v25 }
 0x6d5   :  { %5449 = vmatpush1.bf16.msra.mxu1 %v9273_v21 }
 0x6d6   :  { %5450 = vmatprep.subr.bf16.mxu1 %v9278_v55 }
 0x6d9   :  { %5451 = vmatpush1.bf16.msra.mxu1 %v9285_v62 }
 0x6da   :  { %5452 = vmatprep.subr.bf16.mxu1 %v9290_v29 }
 0x6dd   :  { %5453 = vmatpush1.bf16.msra.mxu1 %v9297_v10 }
 0x6de   :  { %5454 = vmatprep.subr.bf16.mxu1 %v9306_v56 }
 0x6e1   :  { %5455 = vmatpush1.bf16.msra.mxu1 %v9309_v44 }
 0x6e2   :  { %5456 = vmatprep.subr.bf16.mxu1 %v9318_v22 }
 0x6e5   :  { %5457 = vmatpush1.bf16.msra.mxu1 %v9321_v17  ;;  %v9393_v17 = vld [vmem:[#allocation5 + $0x2d8] ss:$24 sps:$4 sm:$0xff]  }
 0x6e6   :  { %5458 = vmatprep.subr.bf16.mxu1 %v9330_v7  ;;  %v9386_v7 = vld [vmem:[#allocation5 + $0x2dc] ss:$24 sps:$4 sm:$0xff]   ;;  %9884 = vst [vmem:[#allocation38_spill] sm:$0xff] %v9393_v17 }
 0x6e7   :  { %9883 = vst [vmem:[#allocation37_spill] sm:$0xff] %v9386_v7 }
 0x6e9   :  { %5459 = vmatpush1.bf16.msra.mxu1 %v9333_v30  ;;  %v9377_v30 = vld [vmem:[#allocation5 + $0x2a0] ss:$24 sps:$4 sm:$0xff]  }
 0x6ea   :  { %5460 = vmatprep.subr.bf16.mxu1 %v9342_v27  ;;  %v9374_v27 = vld [vmem:[#allocation5 + $0x2ac] ss:$24 sps:$4 sm:$0xff]  }
 0x6eb   :  { %9881 = vst [vmem:[#allocation35_spill] sm:$0xff] %v9374_v27 }
 0x6ed   :  { %5461 = vmatpush1.bf16.msra.mxu1 %v9345_v33  ;;  %v9371_v33 = vld [vmem:[#allocation5 + $0x2a4] ss:$24 sps:$4 sm:$0xff]  }
 0x6ee   :  { %5462 = vmatprep.subr.bf16.mxu1 %v9356_v16  ;;  %5425 = vmatprep.subr.bf16.mxu0 %v9371_v33  ;;  %v9381_v16 = vld [vmem:[#allocation5 + $0x2a8] ss:$24 sps:$4 sm:$0xff]  }
 0x6ef   :  { %9882 = vst [vmem:[#allocation36_spill] sm:$0xff] %v9381_v16  ;;  %5426 = vmatpush1.bf16.msra.mxu0 %v9377_v30 }
 0x6f1   :  { %5463 = vmatpush1.bf16.msra.mxu1 %v9354_v34  ;;  %v9383_v34 = vld [vmem:[#allocation5 + $0x2d4] ss:$24 sps:$4 sm:$0xff]  }
 0x6f2   :  { %5464 = vmatprep.subr.bf16.mxu1 %v9361_v49  ;;  %v9389_v49 = vld [vmem:[#allocation5 + $0x2d0] ss:$24 sps:$4 sm:$0xff]   ;;  %5427 = vmatprep.subr.bf16.mxu0 %v9383_v34 }
 0x6f3   :  { %5428 = vmatpush1.bf16.msra.mxu0 %v9389_v49 }
 0x6f5   :  { %5465 = vmatpush1.bf16.msra.mxu1 %v9369_v5  ;;  %v9398_v5 = vld [vmem:[#allocation5 + $0x14] ss:$24 sps:$4 sm:$0xff]  }
 0x6f6   :  { %5466 = vmatprep.subr.bf16.mxu1 %v9374_v27  ;;  %5479 = vmatprep.subr.bf16.mxu0 %v9398_v5 }
 0x6f9   :  { %5467 = vmatpush1.bf16.msra.mxu1 %v9381_v16 }
 0x6fa   :  { %5468 = vmatprep.subr.bf16.mxu1 %v9386_v7 }
 0x6fd   :  { %5469 = vmatpush1.bf16.msra.mxu1 %v9393_v17 }
 0x6fe   :  { %6186 = vmatprep.subr.bf16.mxu1 %v9208_v57  ;;  %v4018_v57 = vor.u32 %v4017_v35, %v4016_v45 }
 0x700   :  { %v4790_v45 = vrot.slane %v4018_v57, 4 }
 0x753   :  { %v4642_v27 = vpop.f32.mrb[28].mxu1  ;;  %v4683_v22 = vpop.f32.mrb[32].mxu0 }
 0x754   :  { %v4644_v44 = vpop.f32.mrb[29].mxu1  ;;  %v4685_v16 = vpop.f32.mrb[33].mxu0 }
 0x755   :  { %v4735_v56 = vcombine.low %v4642_v27, %v4644_v44  ;;  %v4736_v10 = vcombine.low %v4683_v22, %v4685_v16  ;;  %v4646_v29 = vpop.f32.mrb[30].mxu1  ;;  %v4687_v62 = vpop.f32.mrb[34].mxu0 }
 0x756   :  { %v4647_v55 = vpop.f32.mrb[31].mxu1  ;;  %v4688_v7 = vpop.f32.mrb[35].mxu0 }
 0x757   :  { %v4743_v21 = vrot.slane %v4735_v56, %v8286_v48  ;;  %v4750_v17 = vrot.slane %v4736_v10, %v8286_v48 }
 0x759   :  { %v4751_v40 = vcombine.low %v4743_v21, %v4750_v17 }
 0x75b   :  { %v4758_v20 = vrot.slane %v4751_v40, %v8286_v48 }
 0x75d   :  { %v4760_v4 = vadd.f32 %v4758_v20, %v4018_v57 }
 0x75f   :  { %v4761_v36 = vadd.f32 %v8978_v8, %v4760_v4 }
 0x761   :  { %v6979_v51 = vmul.f32 -1.442695, %v4761_v36 }
 0x763   :  { %7787 = vpow2.f32 %v6979_v51 }
 0x76d   :  { %v7788_v44 = vpop.eup %7787 }
 0x76e   :  { %v4765_v29 = vadd.f32 1.0, %v7788_v44 }
 0x770   :  { %7789 = vrcp.f32 %v4765_v29 }
 0x77a   :  { %v7790_v8 = vpop.eup %7789 }
 0x77b   :  { %v4795_v4 = vrot.slane %v7790_v8, 2 }
 0x77d   :  { %v4797_v40 = vsub.f32 1.0, %v4795_v4  ;;  %v4799_v16 = vmul.f32 %v4795_v4, %v9166_v2  ;;  %v9429_v2 = vld [vmem:[#allocation5 + $0x40] ss:$24 sps:$4 sm:$0xff]  }
 0x77e   :  { %v9902_v4 = vld [vmem:[#allocation28_spill] sm:$0xff] }
 0x793   :  { %v4724_v55 = vpop.f32.mrb[32].mxu1 }
 0x794   :  { %v4768_v62 = vadd.f32 %v4724_v55, %v9856_v52  ;;  %v4726_v56 = vpop.f32.mrb[33].mxu1 }
 0x795   :  { %v4769_v10 = vadd.f32 %v4726_v56, %v8300_v43  ;;  %v4728_v21 = vpop.f32.mrb[34].mxu1 }
 0x796   :  { %v4729_v22 = vpop.f32.mrb[35].mxu1  ;;  %v9432_v21 = vld [vmem:[#allocation5 + $0x74] ss:$24 sps:$4 sm:$0xff]  }
 0x797   :  { %v4772_v17 = vcombine.low %v4768_v62, %v4769_v10  ;;  %v9420_v62 = vld [vmem:[#allocation5 + $0x10] ss:$24 sps:$4 sm:$0xff]   ;;  %v9424_v10 = vld [vmem:[#allocation5 + $0x44] ss:$24 sps:$4 sm:$0xff]  }
 0x798   :  { %v9437_v22 = vld [vmem:[#allocation5 + $0x70] ss:$24 sps:$4 sm:$0xff]  }
 0x799   :  { %v4779_v35 = vrot.slane %v4772_v17, %v8286_v48  ;;  %v9440_v17 = vld [vmem:[#allocation5 + $0xa4] ss:$24 sps:$4 sm:$0xff]  }
 0x79b   :  { %v4786_v20 = vrot.slane %v4779_v35, %v8286_v48  ;;  %v9445_v35 = vld [vmem:[#allocation5 + $0xa0] ss:$24 sps:$4 sm:$0xff]  }
 0x79d   :  { %v4788_v36 = vmul.f32 %v7790_v8, %v4786_v20  ;;  %v9897_v20 = vld [vmem:[#allocation23_spill] sm:$0xff]  ;;  %v9899_v8 = vld [vmem:[#allocation25_spill] sm:$0xff] }
 0x79f   :  { %v4792_v51 = vadd.f32 %v4790_v45, %v4788_v36  ;;  %v9898_v45 = vld [vmem:[#allocation24_spill] sm:$0xff]  ;;  %v9900_v36 = vld [vmem:[#allocation26_spill] sm:$0xff] }
 0x7a1   :  { %7791 = vtanh.f32 %v4792_v51  ;;  %v9901_v51 = vld [vmem:[#allocation27_spill] sm:$0xff] }
 0x7ab   :  { %v7792_v7 = vpop.eup %7791 }
 0x7ac   :  { %v4798_v27 = vmul.f32 %v7792_v7, %v4797_v40  ;;  %v9903_v40 = vld [vmem:[#allocation29_spill] sm:$0xff]  ;;  %v9904_v7 = vld [vmem:[#allocation30_spill] sm:$0xff] }
 0x7ae   :  { %v9411_v44 = vadd.f32 %v4799_v16, %v4798_v27  ;;  %v9905_v27 = vld [vmem:[#allocation31_spill] sm:$0xff]  ;;  %v9906_v16 = vld [vmem:[#allocation32_spill] sm:$0xff] }
 0x7b0   :  { %4802 = vst.msk [vmem:[#allocation8 + $0x5] ss:$8 sm:$0x3] %vm8310_vm0, %v9411_v44  ;;  %v4816_v29 = vrot.slane %v9411_v44, %v8062_v46  ;;  %v4812_v57 = vrot.slane %v9411_v44, %v8115_v3 }
 0x7b2   :  { %v4820_v55 = vpack.c.bf16 %v4816_v29, %v4816_v29  ;;  %v9422_v56 = vpack.c.bf16 %v4812_v57, %v4812_v57  ;;  %v9907_v29 = vld [vmem:[#allocation34_spill] sm:$0xff]  ;;  %v9908_v57 = vld [vmem:[#allocation33_spill] sm:$0xff] }
 0x7b4   :  { %5429 = vmatprep.mubr.bf16.mxu0 %v4820_v55  ;;  %5470 = vmatprep.mubr.bf16.mxu1 %v4820_v55 }
 0x7b5   :  { %5430 = vmatmul.mubr.bf16.vlgmr.msra.gmra.mrb[36].mxu0 %v9422_v56  ;;  %5471 = vmatmul.mubr.bf16.vlgmr.msra.gmra.mrb[36].mxu1 %v9422_v56 }
 0x7b6   :  { %5480 = vmatpush1.bf16.msra.mxu0 %v9420_v62  ;;  %5511 = vmatprep.mubr.bf16.mxu0 %v4820_v55  ;;  %v9909_v55 = vld [vmem:[#allocation35_spill] sm:$0xff] }
 0x7b7   :  { %5481 = vmatprep.subr.bf16.mxu0 %v9424_v10  ;;  %6187 = vmatpush1.bf16.msra.mxu1 %v9206_v41  ;;  %v9448_v41 = vld [vmem:[#allocation5 + $0xd4] ss:$24 sps:$4 sm:$0xff]  }
 0x7b8   :  { %6188 = vmatprep.subr.bf16.mxu1 %v9214_v38  ;;  %v9453_v38 = vld [vmem:[#allocation5 + $0xd0] ss:$24 sps:$4 sm:$0xff]  }
 0x7ba   :  { %5482 = vmatpush1.bf16.msra.mxu0 %v9429_v2 }
 0x7bb   :  { %5483 = vmatprep.subr.bf16.mxu0 %v9432_v21  ;;  %6189 = vmatpush1.bf16.msra.mxu1 %v9221_v50  ;;  %v9456_v50 = vld [vmem:[#allocation5 + $0x104] ss:$24 sps:$4 sm:$0xff]  }
 0x7bc   :  { %6190 = vmatprep.subr.bf16.mxu1 %v9227_v39  ;;  %v9461_v39 = vld [vmem:[#allocation5 + $0x100] ss:$24 sps:$4 sm:$0xff]  }
 0x7be   :  { %5484 = vmatpush1.bf16.msra.mxu0 %v9437_v22 }
 0x7bf   :  { %5485 = vmatprep.subr.bf16.mxu0 %v9440_v17  ;;  %6191 = vmatpush1.bf16.msra.mxu1 %v9233_v18  ;;  %v9464_v18 = vld [vmem:[#allocation5 + $0x134] ss:$24 sps:$4 sm:$0xff]  }
 0x7c0   :  { %6192 = vmatprep.subr.bf16.mxu1 %v9239_v0  ;;  %v9469_v0 = vld [vmem:[#allocation5 + $0x130] ss:$24 sps:$4 sm:$0xff]  }
 0x7c2   :  { %5486 = vmatpush1.bf16.msra.mxu0 %v9445_v35 }
 0x7c3   :  { %5487 = vmatprep.subr.bf16.mxu0 %v9448_v41  ;;  %6193 = vmatpush1.bf16.msra.mxu1 %v9245_v12  ;;  %v9472_v12 = vld [vmem:[#allocation5 + $0x164] ss:$24 sps:$4 sm:$0xff]  }
 0x7c4   :  { %6194 = vmatprep.subr.bf16.mxu1 %v9251_v28  ;;  %v9477_v28 = vld [vmem:[#allocation5 + $0x160] ss:$24 sps:$4 sm:$0xff]  }
 0x7c6   :  { %5488 = vmatpush1.bf16.msra.mxu0 %v9453_v38 }
 0x7c7   :  { %5489 = vmatprep.subr.bf16.mxu0 %v9456_v50  ;;  %6195 = vmatpush1.bf16.msra.mxu1 %v9257_v42  ;;  %v9480_v42 = vld [vmem:[#allocation5 + $0x194] ss:$24 sps:$4 sm:$0xff]  }
 0x7c8   :  { %6196 = vmatprep.subr.bf16.mxu1 %v9263_v59  ;;  %v9485_v59 = vld [vmem:[#allocation5 + $0x190] ss:$24 sps:$4 sm:$0xff]  }
 0x7ca   :  { %5490 = vmatpush1.bf16.msra.mxu0 %v9461_v39 }
 0x7cb   :  { %5491 = vmatprep.subr.bf16.mxu0 %v9464_v18  ;;  %6197 = vmatpush1.bf16.msra.mxu1 %v9269_v9  ;;  %v9488_v9 = vld [vmem:[#allocation5 + $0x1c4] ss:$24 sps:$4 sm:$0xff]  }
 0x7cc   :  { %6198 = vmatprep.subr.bf16.mxu1 %v9275_v37  ;;  %v9493_v37 = vld [vmem:[#allocation5 + $0x1c0] ss:$24 sps:$4 sm:$0xff]  }
 0x7ce   :  { %5492 = vmatpush1.bf16.msra.mxu0 %v9469_v0 }
 0x7cf   :  { %5493 = vmatprep.subr.bf16.mxu0 %v9472_v12  ;;  %6199 = vmatpush1.bf16.msra.mxu1 %v9281_v58  ;;  %v9496_v58 = vld [vmem:[#allocation5 + $0x1f4] ss:$24 sps:$4 sm:$0xff]  }
 0x7d0   :  { %6200 = vmatprep.subr.bf16.mxu1 %v9287_v19  ;;  %v9501_v19 = vld [vmem:[#allocation5 + $0x1f0] ss:$24 sps:$4 sm:$0xff]  }
 0x7d2   :  { %5494 = vmatpush1.bf16.msra.mxu0 %v9477_v28 }
 0x7d3   :  { %5495 = vmatprep.subr.bf16.mxu0 %v9480_v42  ;;  %6201 = vmatpush1.bf16.msra.mxu1 %v9293_v11  ;;  %v9504_v11 = vld [vmem:[#allocation5 + $0x224] ss:$24 sps:$4 sm:$0xff]  }
 0x7d4   :  { %6202 = vmatprep.subr.bf16.mxu1 %v9302_v53  ;;  %v9509_v53 = vld [vmem:[#allocation5 + $0x220] ss:$24 sps:$4 sm:$0xff]  }
 0x7d6   :  { %5496 = vmatpush1.bf16.msra.mxu0 %v9485_v59 }
 0x7d7   :  { %5497 = vmatprep.subr.bf16.mxu0 %v9488_v9  ;;  %6203 = vmatpush1.bf16.msra.mxu1 %v9304_v60  ;;  %v9512_v60 = vld [vmem:[#allocation5 + $0x254] ss:$24 sps:$4 sm:$0xff]  }
 0x7d8   :  { %6204 = vmatprep.subr.bf16.mxu1 %v9314_v47  ;;  %v9517_v47 = vld [vmem:[#allocation5 + $0x250] ss:$24 sps:$4 sm:$0xff]  }
 0x7da   :  { %5498 = vmatpush1.bf16.msra.mxu0 %v9493_v37 }
 0x7db   :  { %5499 = vmatprep.subr.bf16.mxu0 %v9496_v58  ;;  %6205 = vmatpush1.bf16.msra.mxu1 %v9316_v31  ;;  %v9520_v31 = vld [vmem:[#allocation5 + $0x284] ss:$24 sps:$4 sm:$0xff]  }
 0x7dc   :  { %6206 = vmatprep.subr.bf16.mxu1 %v9326_v6  ;;  %v9525_v6 = vld [vmem:[#allocation5 + $0x280] ss:$24 sps:$4 sm:$0xff]  }
 0x7de   :  { %5500 = vmatpush1.bf16.msra.mxu0 %v9501_v19 }
 0x7df   :  { %5501 = vmatprep.subr.bf16.mxu0 %v9504_v11  ;;  %6207 = vmatpush1.bf16.msra.mxu1 %v9328_v26  ;;  %v9528_v26 = vld [vmem:[#allocation5 + $0x2b4] ss:$24 sps:$4 sm:$0xff]  }
 0x7e0   :  { %6208 = vmatprep.subr.bf16.mxu1 %v9338_v61  ;;  %v9533_v61 = vld [vmem:[#allocation5 + $0x2b0] ss:$24 sps:$4 sm:$0xff]  }
 0x7e2   :  { %5502 = vmatpush1.bf16.msra.mxu0 %v9509_v53 }
 0x7e3   :  { %5503 = vmatprep.subr.bf16.mxu0 %v9512_v60  ;;  %6209 = vmatpush1.bf16.msra.mxu1 %v9340_v14  ;;  %v9536_v14 = vld [vmem:[#allocation5 + $0x2e4] ss:$24 sps:$4 sm:$0xff]  }
 0x7e4   :  { %6210 = vmatprep.subr.bf16.mxu1 %v9351_v54  ;;  %v9541_v54 = vld [vmem:[#allocation5 + $0x2e0] ss:$24 sps:$4 sm:$0xff]  }
 0x7e6   :  { %5504 = vmatpush1.bf16.msra.mxu0 %v9517_v47 }
 0x7e7   :  { %5505 = vmatprep.subr.bf16.mxu0 %v9520_v31  ;;  %6211 = vmatpush1.bf16.msra.mxu1 %v9349_v15  ;;  %v9887_v15 = vld [vmem:[#allocation13_spill] sm:$0xff] }
 0x7e8   :  { %6212 = vmatprep.subr.bf16.mxu1 %v9358_v1  ;;  %v9890_v1 = vld [vmem:[#allocation16_spill] sm:$0xff] }
 0x7ea   :  { %5506 = vmatpush1.bf16.msra.mxu0 %v9525_v6 }
 0x7eb   :  { %5507 = vmatprep.subr.bf16.mxu0 %v9528_v26  ;;  %6213 = vmatpush1.bf16.msra.mxu1 %v9365_v25  ;;  %v9892_v25 = vld [vmem:[#allocation18_spill] sm:$0xff] }
 0x7ec   :  { %6214 = vmatprep.subr.bf16.mxu1 %v9371_v33  ;;  %v9885_v33 = vld [vmem:[#allocation39_spill] sm:$0xff] }
 0x7ee   :  { %5508 = vmatpush1.bf16.msra.mxu0 %v9533_v61 }
 0x7ef   :  { %5509 = vmatprep.subr.bf16.mxu0 %v9536_v14  ;;  %6215 = vmatpush1.bf16.msra.mxu1 %v9377_v30  ;;  %v9886_v30 = vld [vmem:[#allocation40_spill] sm:$0xff] }
 0x7f0   :  { %6216 = vmatprep.subr.bf16.mxu1 %v9383_v34  ;;  %v9888_v34 = vld [vmem:[#allocation14_spill] sm:$0xff] }
 0x7f2   :  { %5510 = vmatpush1.bf16.msra.mxu0 %v9541_v54 }
 0x7f3   :  { %6227 = vmatprep.subr.bf16.mxu0 %v9212_v63  ;;  %6217 = vmatpush1.bf16.msra.mxu1 %v9389_v49  ;;  %v9889_v63 = vld [vmem:[#allocation15_spill] sm:$0xff]  ;;  %v9891_v49 = vld [vmem:[#allocation17_spill] sm:$0xff] }
 0x7f4   :  { %6268 = vmatprep.subr.bf16.mxu1 %v9398_v5  ;;  %v9896_v5 = vld [vmem:[#allocation22_spill] sm:$0xff] }
 0x7f5   :  { %5512 = vmatmul.mubr.bf16.vlgmr.msra.gmra.mrb[40].mxu0 %v9422_v56  ;;  %v9910_v56 = vld [vmem:[#allocation36_spill] sm:$0xff] }
 0x7f6   :  { %6228 = vmatpush1.bf16.msra.mxu0 %v9210_v32  ;;  %v9893_v32 = vld [vmem:[#allocation19_spill] sm:$0xff] }
 0x7f7   :  { %6229 = vmatprep.subr.bf16.mxu0 %v9217_v24  ;;  %v9894_v24 = vld [vmem:[#allocation20_spill] sm:$0xff] }
 0x7fa   :  { %6230 = vmatpush1.bf16.msra.mxu0 %v9225_v23  ;;  %v9895_v23 = vld [vmem:[#allocation21_spill] sm:$0xff] }
 0x7fb   :  { %6231 = vmatprep.subr.bf16.mxu0 %v9885_v33  ;;  %v9911_v33 = vld [vmem:[#allocation37_spill] sm:$0xff] }
 0x7fe   :  { %6232 = vmatpush1.bf16.msra.mxu0 %v9886_v30  ;;  %v9912_v30 = vld [vmem:[#allocation38_spill] sm:$0xff] }
 0x7ff   :  { %6233 = vmatprep.subr.bf16.mxu0 %v9887_v15 }
 0x802   :  { %6234 = vmatpush1.bf16.msra.mxu0 %v9888_v34 }
 0x803   :  { %6235 = vmatprep.subr.bf16.mxu0 %v9889_v63 }
 0x806   :  { %6236 = vmatpush1.bf16.msra.mxu0 %v9890_v1 }
 0x807   :  { %6237 = vmatprep.subr.bf16.mxu0 %v9891_v49 }
 0x80a   :  { %6238 = vmatpush1.bf16.msra.mxu0 %v9892_v25 }
 0x80b   :  { %6239 = vmatprep.subr.bf16.mxu0 %v9893_v32 }
 0x80e   :  { %6240 = vmatpush1.bf16.msra.mxu0 %v9894_v24 }
 0x80f   :  { %6241 = vmatprep.subr.bf16.mxu0 %v9895_v23 }
 0x812   :  { %6242 = vmatpush1.bf16.msra.mxu0 %v9896_v5 }
 0x813   :  { %6243 = vmatprep.subr.bf16.mxu0 %v9897_v20 }
 0x816   :  { %6244 = vmatpush1.bf16.msra.mxu0 %v9898_v45 }
 0x817   :  { %6245 = vmatprep.subr.bf16.mxu0 %v9899_v8 }
 0x81a   :  { %6246 = vmatpush1.bf16.msra.mxu0 %v9900_v36  ;;  %v4805_v36 = vld [vmem:[#allocation2 + $0x6] ss:$8 sm:$0xf] }
 0x81b   :  { %6247 = vmatprep.subr.bf16.mxu0 %v9901_v51  ;;  %v4806_v51 = vld [vmem:[#allocation2 + $0x6] ss:$8 sm:$0x30] }
 0x81e   :  { %6248 = vmatpush1.bf16.msra.mxu0 %v9902_v4  ;;  %v4807_v4 = vor.u32 %v4806_v51, %v4805_v36 }
 0x81f   :  { %6249 = vmatprep.subr.bf16.mxu0 %v9903_v40 }
 0x822   :  { %6250 = vmatpush1.bf16.msra.mxu0 %v9904_v7 }
 0x823   :  { %6251 = vmatprep.subr.bf16.mxu0 %v9905_v27  ;;  %v9585_v27 = vld [vmem:[#allocation7] ss:$2 sm:$0x3f] }
 0x826   :  { %6252 = vmatpush1.bf16.msra.mxu0 %v9906_v16 }
 0x827   :  { %6253 = vmatprep.subr.bf16.mxu0 %v9907_v29 }
 0x82a   :  { %6254 = vmatpush1.bf16.msra.mxu0 %v9908_v57 }
 0x82b   :  { %6255 = vmatprep.subr.bf16.mxu0 %v9909_v55 }
 0x82e   :  { %6256 = vmatpush1.bf16.msra.mxu0 %v9910_v56 }
 0x82f   :  { %6257 = vmatprep.subr.bf16.mxu0 %v9911_v33 }
 0x832   :  { %6258 = vmatpush1.bf16.msra.mxu0 %v9912_v30 }
 0x888   :  { %v5431_v15 = vpop.f32.mrb[36].mxu0  ;;  %v5472_v34 = vpop.f32.mrb[36].mxu1 }
 0x889   :  { %v5433_v63 = vpop.f32.mrb[37].mxu0  ;;  %v5474_v1 = vpop.f32.mrb[37].mxu1 }
 0x88a   :  { %v5524_v49 = vcombine.low %v5431_v15, %v5433_v63  ;;  %v5525_v25 = vcombine.low %v5472_v34, %v5474_v1  ;;  %v5435_v32 = vpop.f32.mrb[38].mxu0  ;;  %v5476_v24 = vpop.f32.mrb[38].mxu1 }
 0x88b   :  { %v5436_v23 = vpop.f32.mrb[39].mxu0  ;;  %v5477_v5 = vpop.f32.mrb[39].mxu1  ;;  %v5579_v32 = vrot.slane %v4807_v4, 4 }
 0x88c   :  { %v5532_v20 = vrot.slane %v5524_v49, %v8286_v48  ;;  %v5539_v45 = vrot.slane %v5525_v25, %v8286_v48 }
 0x88e   :  { %v5540_v8 = vcombine.low %v5532_v20, %v5539_v45 }
 0x890   :  { %v5547_v40 = vrot.slane %v5540_v8, %v8286_v48 }
 0x892   :  { %v5549_v7 = vadd.f32 %v5547_v40, %v4807_v4 }
 0x894   :  { %v5550_v16 = vadd.f32 %v9585_v27, %v5549_v7 }
 0x896   :  { %v7076_v29 = vmul.f32 -1.442695, %v5550_v16 }
 0x898   :  { %7793 = vpow2.f32 %v7076_v29 }
 0x8a2   :  { %v7794_v57 = vpop.eup %7793 }
 0x8a3   :  { %v5554_v55 = vadd.f32 1.0, %v7794_v57 }
 0x8a5   :  { %7795 = vrcp.f32 %v5554_v55 }
 0x8af   :  { %v7796_v24 = vpop.eup %7795 }
 0x8b0   :  { %v5584_v20 = vrot.slane %v7796_v24, 2 }
 0x8b2   :  { %v5586_v45 = vsub.f32 1.0, %v5584_v20  ;;  %v5588_v51 = vmul.f32 %v5584_v20, %v9411_v44 }
 0x8c8   :  { %v5513_v56 = vpop.f32.mrb[40].mxu0 }
 0x8c9   :  { %v5557_v33 = vadd.f32 %v5513_v56, %v9856_v52  ;;  %v5515_v30 = vpop.f32.mrb[41].mxu0 }
 0x8ca   :  { %v5558_v15 = vadd.f32 %v5515_v30, %v8300_v43  ;;  %v5517_v34 = vpop.f32.mrb[42].mxu0 }
 0x8cb   :  { %v5518_v63 = vpop.f32.mrb[43].mxu0 }
 0x8cc   :  { %v5561_v1 = vcombine.low %v5557_v33, %v5558_v15 }
 0x8ce   :  { %v5568_v49 = vrot.slane %v5561_v1, %v8286_v48 }
 0x8d0   :  { %v5575_v25 = vrot.slane %v5568_v49, %v8286_v48 }
 0x8d2   :  { %v5577_v23 = vmul.f32 %v7796_v24, %v5575_v25 }
 0x8d4   :  { %v5581_v5 = vadd.f32 %v5579_v32, %v5577_v23 }
 0x8d6   :  { %7797 = vtanh.f32 %v5581_v5 }
 0x8e0   :  { %v7798_v8 = vpop.eup %7797 }
 0x8e1   :  { %v5587_v36 = vmul.f32 %v7798_v8, %v5586_v45 }
 0x8e3   :  { %v9593_v40 = vadd.f32 %v5588_v51, %v5587_v36 }
 0x8e5   :  { %5591 = vst.msk [vmem:[#allocation8 + $0x6] ss:$8 sm:$0x3] %vm8310_vm0, %v9593_v40  ;;  %v5605_v7 = vrot.slane %v9593_v40, %v8062_v46  ;;  %v5601_v4 = vrot.slane %v9593_v40, %v8115_v3 }
 0x8e7   :  { %v5609_v16 = vpack.c.bf16 %v5605_v7, %v5605_v7  ;;  %v5608_v29 = vpack.c.bf16 %v5601_v4, %v5601_v4 }
 0x8e9   :  { %6218 = vmatprep.mubr.bf16.mxu1 %v5609_v16  ;;  %6259 = vmatprep.mubr.bf16.mxu0 %v5609_v16 }
 0x8ea   :  { %6219 = vmatmul.mubr.bf16.vlgmr.msra.gmra.mrb[40].mxu1 %v5608_v29  ;;  %6260 = vmatmul.mubr.bf16.vlgmr.msra.gmra.mrb[44].mxu0 %v5608_v29 }
 0x8eb   :  { %6269 = vmatpush1.bf16.msra.mxu1 %v9420_v62  ;;  %6300 = vmatprep.mubr.bf16.mxu1 %v5609_v16 }
 0x8ec   :  { %6270 = vmatprep.subr.bf16.mxu1 %v9424_v10 }
 0x8ef   :  { %6271 = vmatpush1.bf16.msra.mxu1 %v9429_v2 }
 0x8f0   :  { %6272 = vmatprep.subr.bf16.mxu1 %v9432_v21 }
 0x8f3   :  { %6273 = vmatpush1.bf16.msra.mxu1 %v9437_v22 }
 0x8f4   :  { %6274 = vmatprep.subr.bf16.mxu1 %v9440_v17 }
 0x8f7   :  { %6275 = vmatpush1.bf16.msra.mxu1 %v9445_v35 }
 0x8f8   :  { %6276 = vmatprep.subr.bf16.mxu1 %v9448_v41 }
 0x8fb   :  { %6277 = vmatpush1.bf16.msra.mxu1 %v9453_v38 }
 0x8fc   :  { %6278 = vmatprep.subr.bf16.mxu1 %v9456_v50 }
 0x8ff   :  { %6279 = vmatpush1.bf16.msra.mxu1 %v9461_v39  ;;  %v5594_v39 = vld [vmem:[#allocation2 + $0x7] ss:$8 sm:$0xf] }
 0x900   :  { %6280 = vmatprep.subr.bf16.mxu1 %v9464_v18  ;;  %v5595_v18 = vld [vmem:[#allocation2 + $0x7] ss:$8 sm:$0x30] }
 0x903   :  { %6281 = vmatpush1.bf16.msra.mxu1 %v9469_v0  ;;  %v5596_v0 = vor.u32 %v5595_v18, %v5594_v39 }
 0x904   :  { %6282 = vmatprep.subr.bf16.mxu1 %v9472_v12 }
 0x907   :  { %6283 = vmatpush1.bf16.msra.mxu1 %v9477_v28 }
 0x908   :  { %6284 = vmatprep.subr.bf16.mxu1 %v9480_v42 }
 0x90b   :  { %6285 = vmatpush1.bf16.msra.mxu1 %v9485_v59 }
 0x90c   :  { %6286 = vmatprep.subr.bf16.mxu1 %v9488_v9 }
 0x90f   :  { %6287 = vmatpush1.bf16.msra.mxu1 %v9493_v37 }
 0x910   :  { %6288 = vmatprep.subr.bf16.mxu1 %v9496_v58 }
 0x913   :  { %6289 = vmatpush1.bf16.msra.mxu1 %v9501_v19 }
 0x914   :  { %6290 = vmatprep.subr.bf16.mxu1 %v9504_v11 }
 0x917   :  { %6291 = vmatpush1.bf16.msra.mxu1 %v9509_v53 }
 0x918   :  { %6292 = vmatprep.subr.bf16.mxu1 %v9512_v60 }
 0x91b   :  { %6293 = vmatpush1.bf16.msra.mxu1 %v9517_v47 }
 0x91c   :  { %6294 = vmatprep.subr.bf16.mxu1 %v9520_v31 }
 0x91f   :  { %6295 = vmatpush1.bf16.msra.mxu1 %v9525_v6 }
 0x920   :  { %6296 = vmatprep.subr.bf16.mxu1 %v9528_v26 }
 0x923   :  { %6297 = vmatpush1.bf16.msra.mxu1 %v9533_v61  ;;  %v6368_v61 = vrot.slane %v5596_v0, 4 }
 0x924   :  { %6298 = vmatprep.subr.bf16.mxu1 %v9536_v14 }
 0x927   :  { %6299 = vmatpush1.bf16.msra.mxu1 %v9541_v54 }
 0x92a   :  { %6301 = vmatmul.mubr.bf16.vlgmr.msra.gmra.mrb[44].mxu1 %v5608_v29 }
 0x9bd   :  { %v6220_v46 = vpop.f32.mrb[40].mxu1  ;;  %v6261_v3 = vpop.f32.mrb[44].mxu0 }
 0x9be   :  { %v6222_v44 = vpop.f32.mrb[41].mxu1  ;;  %v6263_v62 = vpop.f32.mrb[45].mxu0 }
 0x9bf   :  { %v6313_v10 = vcombine.low %v6220_v46, %v6222_v44  ;;  %v6314_v2 = vcombine.low %v6261_v3, %v6263_v62  ;;  %v6224_v21 = vpop.f32.mrb[42].mxu1  ;;  %v6265_v22 = vpop.f32.mrb[46].mxu0 }
 0x9c0   :  { %v6225_v17 = vpop.f32.mrb[43].mxu1  ;;  %v6266_v35 = vpop.f32.mrb[47].mxu0 }
 0x9c1   :  { %v6321_v41 = vrot.slane %v6313_v10, %v8286_v48  ;;  %v6328_v38 = vrot.slane %v6314_v2, %v8286_v48 }
 0x9c3   :  { %v6329_v50 = vcombine.low %v6321_v41, %v6328_v38 }
 0x9c5   :  { %v6336_v12 = vrot.slane %v6329_v50, %v8286_v48 }
 0x9c7   :  { %v6338_v28 = vadd.f32 %v6336_v12, %v5596_v0 }
 0x9c9   :  { %v6339_v42 = vadd.f32 %v9585_v27, %v6338_v28 }
 0x9cb   :  { %v7173_v59 = vmul.f32 -1.442695, %v6339_v42 }
 0x9cd   :  { %7799 = vpow2.f32 %v7173_v59 }
 0x9d7   :  { %v7800_v9 = vpop.eup %7799 }
 0x9d8   :  { %v6343_v37 = vadd.f32 1.0, %v7800_v9 }
 0x9da   :  { %7801 = vrcp.f32 %v6343_v37 }
 0x9e4   :  { %v7802_v14 = vpop.eup %7801 }
 0x9e5   :  { %v6373_v57 = vrot.slane %v7802_v14, 2 }
 0x9e7   :  { %v6375_v55 = vsub.f32 1.0, %v6373_v57 }
 0x9fd   :  { %v6302_v58 = vpop.f32.mrb[44].mxu1 }
 0x9fe   :  { %v6346_v19 = vadd.f32 %v6302_v58, %v9856_v52  ;;  %v6304_v11 = vpop.f32.mrb[45].mxu1 }
 0x9ff   :  { %v6347_v53 = vadd.f32 %v6304_v11, %v8300_v43  ;;  %v6306_v60 = vpop.f32.mrb[46].mxu1  ;;  %v6377_v43 = vmul.f32 %v6373_v57, %v9593_v40 }
 0xa00   :  { %v6307_v47 = vpop.f32.mrb[47].mxu1 }
 0xa01   :  { %v6350_v31 = vcombine.low %v6346_v19, %v6347_v53 }
 0xa03   :  { %v6357_v6 = vrot.slane %v6350_v31, %v8286_v48 }
 0xa05   :  { %v6364_v26 = vrot.slane %v6357_v6, %v8286_v48 }
 0xa07   :  { %v6366_v54 = vmul.f32 %v7802_v14, %v6364_v26 }
 0xa09   :  { %v6370_v27 = vadd.f32 %v6368_v61, %v6366_v54 }
 0xa0b   :  { %7803 = vtanh.f32 %v6370_v27 }
 0xa15   :  { %v7804_v56 = vpop.eup %7803 }
 0xa16   :  { %v6376_v52 = vmul.f32 %v7804_v56, %v6375_v55 }
 0xa18   :  { %v6378_v33 = vadd.f32 %v6377_v43, %v6376_v52 }
 0xa1a   :  { %6380 = vst.msk [vmem:[#allocation8 + $0x7] ss:$8 sm:$0x3] %vm8310_vm0, %v6378_v33 }
 0xa1b   :  { %7904 = shalt.err (!%p7901_p0)
}
 0xa1c   :  { %s7905_s6 = scalar_lea.hbm %s9660_s4, 256 }
 0xa1d   :  { %p7906_p1 = scmp.ne.s32.totalorder %s9660_s4, %s7905_s6  ;;  %p7909_p2 = scmp.lt.u32.totalorder %s7905_s6, %s9660_s4 }
 0xa1f   :  { %p7911_p3 = pnand %p7909_p2, %p7906_p1 }
 0xa21   :  { %7914 = shalt.err (!%p7911_p3)
}
 0xa22   :  { %6391 = dma.vmem_to_hbm [thread:$0]  %s6389_s28, 256, %s9660_s4, [#allocation4]  }
 0xa23   :  { %7919 = dma.done.wait [#allocation4], 256  }
 0xa24   :  { %7920 = vsyncadd [#allocation4], 4294967040 }
 0xa25   :  { %6395 = vsyncpa [#allocation3], 1 }
 0xa26   :  { %6396 = vsyncpa [#allocation6], 1 }
 0xa27   :  { %6397 = vsyncpa [#allocation4], 1 }

</bundles_post_ra>
